<compile_context>
chip_gen: v7x
topology: tpu7x:2x2x1
jax: 0.10.0
libtpu: 0.0.40
codegen_flags: <defaults>
</compile_context>

<pallas_src>
import functools

import jax
import jax.numpy as jnp
from jax import lax
from jax.experimental import pallas as pl
from jax.experimental.pallas import tpu as pltpu

_VMEM = pl.BlockSpec(memory_space=pltpu.MemorySpace.VMEM)
_BN_EPS = 1e-5
_SLOPE = 0.2
_LANE = 128          # conv output channels padded to a multiple of this
_SUBLANE = 8         # input channels padded to a multiple of this (layer 1)
_ROW_BLOCK = 256     # row tile for the gridded (no-BN) conv kernel


def _leaky(x):
    return jnp.where(x >= 0, x, _SLOPE * x)


# ----------------------------- Pallas kernels ------------------------------ #

def _conv_act_kernel(x_ref, w_ref, b_ref, o_ref, *, activation):
    """(P,K)@(K,C) + bias with fused activation. bf16 MXU operands, f32 acc."""
    acc = jnp.dot(x_ref[...], w_ref[...], preferred_element_type=jnp.float32)
    acc = acc + b_ref[...]
    if activation == "leaky":
        acc = _leaky(acc)
    elif activation == "sigmoid":
        # exp on the EUP; divide replaced by the (free-slot) EUP reciprocal.
        acc = pl.reciprocal(1.0 + jnp.exp(-acc), approx=True)
        acc = jnp.clip(acc, 0.0, 1.0)
    o_ref[...] = acc.astype(o_ref.dtype)


def _conv_bn_leaky_kernel(x_ref, w_ref, b_ref, g_ref, beta_ref, o_ref):
    """Fused conv-matmul + bias + BatchNorm (batch stats) + LeakyReLU(0.2).

    The full (P, C) activation lives in VMEM, so the per-channel reduction is
    done in-kernel with a two-pass mean / (x-mean)^2 variance (no E[x^2]-E[x]^2
    cancellation) and the normalized result is stored exactly once.
    """
    acc = jnp.dot(x_ref[...], w_ref[...], preferred_element_type=jnp.float32)
    acc = acc + b_ref[...]
    inv_p = 1.0 / acc.shape[0]
    mean = jnp.sum(acc, axis=0, keepdims=True) * inv_p
    xc = acc - mean
    var = jnp.sum(xc * xc, axis=0, keepdims=True) * inv_p
    scale = g_ref[...] * lax.rsqrt(var + _BN_EPS)
    y = xc * scale + beta_ref[...]
    o_ref[...] = _leaky(y).astype(o_ref.dtype)


# ------------------------------- wrappers ---------------------------------- #

def _conv_act(patches, w_mat, bias, activation, out_dtype):
    P, K = patches.shape
    C = w_mat.shape[1]
    kern = functools.partial(_conv_act_kernel, activation=activation)
    out_shape = jax.ShapeDtypeStruct((P, C), out_dtype)
    b2 = bias.reshape(1, C)
    if P % _ROW_BLOCK == 0 and P // _ROW_BLOCK > 1:
        # Row-parallel grid: bounded VMEM + TensorCore sharding on v7x/megacore.
        # Weight/bias index_maps are constant, so their tiles are fetched once
        # and kept resident across grid steps.
        return pl.pallas_call(
            kern,
            out_shape=out_shape,
            grid=(P // _ROW_BLOCK,),
            in_specs=[pl.BlockSpec((_ROW_BLOCK, K), lambda i: (i, 0)),
                      pl.BlockSpec((K, C), lambda i: (0, 0)),
                      pl.BlockSpec((1, C), lambda i: (0, 0))],
            out_specs=pl.BlockSpec((_ROW_BLOCK, C), lambda i: (i, 0)),
            compiler_params=pltpu.CompilerParams(
                dimension_semantics=("parallel",)),
        )(patches, w_mat, b2)
    # Tiny tail layers (e.g. the final (2,4096)@(4096,128) dot): whole-array.
    return pl.pallas_call(
        kern,
        out_shape=out_shape,
        in_specs=[_VMEM, _VMEM, _VMEM],
        out_specs=_VMEM,
    )(patches, w_mat, b2)


def _conv_bn_leaky(patches, w_mat, bias, gamma, beta, out_dtype):
    P, K = patches.shape
    C = w_mat.shape[1]
    return pl.pallas_call(
        _conv_bn_leaky_kernel,
        out_shape=jax.ShapeDtypeStruct((P, C), out_dtype),
        in_specs=[_VMEM] * 5,
        out_specs=_VMEM,
    )(patches, w_mat, bias.reshape(1, C), gamma.reshape(1, C),
      beta.reshape(1, C))


def _extract_patches(x, kh=4, kw=4, stride=2, pad=1):
    """NHWC -> (N*Ho*Wo, kh*kw*C). K order is (ki, kj, cin): tap-major."""
    N, H, W, C = x.shape
    Ho = (H + 2 * pad - kh) // stride + 1
    Wo = (W + 2 * pad - kw) // stride + 1
    xp = jnp.pad(x, ((0, 0), (pad, pad), (pad, pad), (0, 0)))
    taps = [xp[:, ki:ki + stride * Ho:stride, kj:kj + stride * Wo:stride, :]
            for ki in range(kh) for kj in range(kw)]
    patches = jnp.concatenate(taps, axis=-1).reshape(N * Ho * Wo, kh * kw * C)
    return patches, (N, Ho, Wo)


def _prep_weight(w, cin_pad, cout_pad):
    """(Cout,Cin,kh,kw) PyTorch weight -> (kh*kw*cin_pad, cout_pad) bf16."""
    cout, cin, kh, kw = w.shape
    wm = jnp.transpose(w, (2, 3, 1, 0))                    # (kh, kw, cin, cout)
    wm = jnp.pad(wm, ((0, 0), (0, 0),
                      (0, cin_pad - cin), (0, cout_pad - cout)))
    return wm.reshape(kh * kw * cin_pad, cout_pad).astype(jnp.bfloat16)


def _pad_vec(v, n, fill=0.0):
    return jnp.pad(v, (0, n - v.shape[0]), constant_values=fill)


def _conv_layer(x_nhwc, w, b, bn=None, activation="none",
                out_dtype=jnp.bfloat16):
    """Conv2d(4,2,1) (+ BatchNorm2d + LeakyReLU | activation), NHWC in/out."""
    cin_pad = x_nhwc.shape[-1]                 # prev layer already lane-padded
    cout = w.shape[0]
    cout_pad = ((cout + _LANE - 1) // _LANE) * _LANE
    patches, (N, Ho, Wo) = _extract_patches(x_nhwc)
    w_mat = _prep_weight(w, cin_pad, cout_pad)
    bias = _pad_vec(b, cout_pad).astype(jnp.float32)
    if bn is None:
        out = _conv_act(patches, w_mat, bias, activation, out_dtype)
    else:
        gamma, beta = bn
        gamma = _pad_vec(gamma, cout_pad, 1.0).astype(jnp.float32)
        beta = _pad_vec(beta, cout_pad).astype(jnp.float32)
        out = _conv_bn_leaky(patches, w_mat, bias, gamma, beta, out_dtype)
    return out.reshape(N, Ho, Wo, cout_pad)    # free row-major collapse


def discriminator_forward(x_nchw, p):
    # Single boundary conversion to channel-last; bf16 activations thereafter.
    h = jnp.transpose(x_nchw, (0, 2, 3, 1)).astype(jnp.bfloat16)
    # Pad 3 input channels up to a sublane multiple (3 -> 8) so layer 1's
    # im2col taps are aligned and its contraction dim is exactly 16*8 = 128.
    cin = h.shape[-1]
    cin_pad = ((cin + _SUBLANE - 1) // _SUBLANE) * _SUBLANE
    if cin_pad != cin:
        h = jnp.pad(h, ((0, 0), (0, 0), (0, 0), (0, cin_pad - cin)))
    h = _conv_layer(h, p["w1"], p["b1"], activation="leaky")
    h = _conv_layer(h, p["w2"], p["b2"], bn=(p["g2"], p["be2"]))
    h = _conv_layer(h, p["w3"], p["b3"], bn=(p["g3"], p["be3"]))
    h = _conv_layer(h, p["w4"], p["b4"], bn=(p["g4"], p["be4"]))
    # Tail layer is MXU-degenerate ((2,4096)@(4096,1)); kept as its own tiny
    # fused kernel — still a single launch with sigmoid in the epilogue.
    h = _conv_layer(h, p["w5"], p["b5"], activation="sigmoid",
                    out_dtype=jnp.float32)
    # (N, 1, 1, 128) with real Cout=1 in channel 0  ==  out.view(-1) -> (N,)
    return h[:, 0, 0, 0]


# ------------------------------ param init --------------------------------- #

def init_params(key):
    chans = [3, 32, 64, 128, 256, 1]
    keys = jax.random.split(key, 10)
    p = {}
    ki = 0
    for i in range(5):
        ci, co = chans[i], chans[i + 1]
        # Conv weights: normal(0, 0.02) per weights_init; biases zero.
        p[f"w{i+1}"] = 0.02 * jax.random.normal(keys[ki], (co, ci, 4, 4),
                                                jnp.float32)
        p[f"b{i+1}"] = jnp.zeros((co,), jnp.float32)
        ki += 1
    for i in (2, 3, 4):
        co = chans[i]
        # BatchNorm weights: normal(1, 0.02); bias zero, per weights_init.
        p[f"g{i}"] = 1.0 + 0.02 * jax.random.normal(keys[ki], (co,),
                                                    jnp.float32)
        p[f"be{i}"] = jnp.zeros((co,), jnp.float32)
        ki += 1
    return p


# --------------------------------- main ------------------------------------ #

if __name__ == "__main__":
    key = jax.random.PRNGKey(0)
    k_x, k_p = jax.random.split(key)
    # 32x32 RGB input -> spatial 16, 8, 4, 2, 1 through the 5 stride-2 convs.
    x = jax.random.normal(k_x, (2, 3, 32, 32), jnp.float32)
    params = init_params(k_p)

    fwd = jax.jit(discriminator_forward)
    out = fwd(x, params)
    jax.block_until_ready(out)

    assert out.shape == (2,), out.shape                  # (N,1,1,1).view(-1)
    assert bool(jnp.all((out >= 0.0) & (out <= 1.0)))    # sigmoid range
    print("KERNEL_OK")
</pallas_src>

<mosaic_0001>
module attributes {stable_mosaic.version = 11 : i64} {
  func.func @_conv_act_kernel(%arg0: i32, %arg1: memref<256x128xbf16, #tpu.memory_space<vmem>>, %arg2: memref<128x128xbf16, #tpu.memory_space<vmem>>, %arg3: memref<1x128xf32, #tpu.memory_space<vmem>>, %arg4: memref<256x128xbf16, #tpu.memory_space<vmem>>) attributes {dimension_semantics = [#tpu.dimension_semantics<parallel>], iteration_bounds = array<i64: 2>, scalar_prefetch = 0 : i64, scratch_operands = 0 : i64, tpu.core_type = #tpu.core_type<tc>, window_params = [{transform_indices = @transform_0, window_bounds = array<i64: 256, 128>}, {pipeline_mode = #tpu.pipeline_mode<synchronous>, transform_indices = @transform_1, window_bounds = array<i64: 128, 128>}, {pipeline_mode = #tpu.pipeline_mode<synchronous>, transform_indices = @transform_2, window_bounds = array<i64: 1, 128>}, {transform_indices = @transform_3, window_bounds = array<i64: 256, 128>}]} {
    %c0 = arith.constant 0 : index
    %c0_0 = arith.constant 0 : index
    %0 = vector.load %arg1[%c0, %c0_0] : memref<256x128xbf16, #tpu.memory_space<vmem>>, vector<256x128xbf16>
    %c0_1 = arith.constant 0 : index
    %c0_2 = arith.constant 0 : index
    %1 = vector.load %arg2[%c0_1, %c0_2] : memref<128x128xbf16, #tpu.memory_space<vmem>>, vector<128x128xbf16>
    %cst = arith.constant dense<0.000000e+00> : vector<256x128xf32>
    %2 = tpu.matmul %0, %1, %cst {dimension_numbers = #tpu.dot_dimension_numbers<[1], [0], [0], [1], [0, 0, 1, 1], [], []>} : vector<256x128xbf16>, vector<128x128xbf16>, vector<256x128xf32> -> vector<256x128xf32>
    %c0_3 = arith.constant 0 : index
    %c0_4 = arith.constant 0 : index
    %3 = vector.load %arg3[%c0_3, %c0_4] : memref<1x128xf32, #tpu.memory_space<vmem>>, vector<1x128xf32>
    %4 = vector.broadcast %3 : vector<1x128xf32> to vector<256x128xf32>
    %5 = arith.addf %2, %4 : vector<256x128xf32>
    %cst_5 = arith.constant 0.000000e+00 : f32
    %6 = vector.broadcast %cst_5 : f32 to vector<256x128xf32>
    %7 = arith.cmpf oge, %5, %6 : vector<256x128xf32>
    %cst_6 = arith.constant 2.000000e-01 : f32
    %8 = vector.broadcast %cst_6 : f32 to vector<256x128xf32>
    %9 = arith.mulf %8, %5 : vector<256x128xf32>
    %10 = arith.select %7, %5, %9 : vector<256x128xi1>, vector<256x128xf32>
    %11 = arith.truncf %10 : vector<256x128xf32> to vector<256x128xbf16>
    %c0_7 = arith.constant 0 : index
    %c0_8 = arith.constant 0 : index
    %12 = vector.load %arg4[%c0_7, %c0_8] : memref<256x128xbf16, #tpu.memory_space<vmem>>, vector<256x128xbf16>
    tpu.vector_store %arg4[%c0_7, %c0_8], %11 {strides = array<i32>} : memref<256x128xbf16, #tpu.memory_space<vmem>>, vector<256x128xbf16>,
    return
  }
  func.func @transform_0(%arg0: i32) -> (i32, i32) {
    %c0_i32 = arith.constant 0 : i32
    %c0_i32_0 = arith.constant 0 : i32
    return %arg0, %c0_i32 : i32, i32
  }
  func.func @transform_1(%arg0: i32) -> (i32, i32) {
    %c0_i32 = arith.constant 0 : i32
    %c0_i32_0 = arith.constant 0 : i32
    %c0_i32_1 = arith.constant 0 : i32
    return %c0_i32, %c0_i32_0 : i32, i32
  }
  func.func @transform_2(%arg0: i32) -> (i32, i32) {
    %c0_i32 = arith.constant 0 : i32
    %c0_i32_0 = arith.constant 0 : i32
    %c0_i32_1 = arith.constant 0 : i32
    return %c0_i32, %c0_i32_0 : i32, i32
  }
  func.func @transform_3(%arg0: i32) -> (i32, i32) {
    %c0_i32 = arith.constant 0 : i32
    %c0_i32_0 = arith.constant 0 : i32
    return %arg0, %c0_i32 : i32, i32
  }
}

module attributes {stable_mosaic.version = 11 : i64} {
  func.func @_conv_bn_leaky_kernel(%arg0: memref<128x2048xbf16, #tpu.memory_space<vmem>>, %arg1: memref<2048x128xbf16, #tpu.memory_space<vmem>>, %arg2: memref<1x128xf32, #tpu.memory_space<vmem>>, %arg3: memref<1x128xf32, #tpu.memory_space<vmem>>, %arg4: memref<1x128xf32, #tpu.memory_space<vmem>>, %arg5: memref<128x128xbf16, #tpu.memory_space<vmem>>) attributes {dimension_semantics = [], scalar_prefetch = 0 : i64, scratch_operands = 0 : i64, tpu.core_type = #tpu.core_type<tc>} {
    %c0 = arith.constant 0 : index
    %c0_0 = arith.constant 0 : index
    %0 = vector.load %arg0[%c0, %c0_0] : memref<128x2048xbf16, #tpu.memory_space<vmem>>, vector<128x2048xbf16>
    %c0_1 = arith.constant 0 : index
    %c0_2 = arith.constant 0 : index
    %1 = vector.load %arg1[%c0_1, %c0_2] : memref<2048x128xbf16, #tpu.memory_space<vmem>>, vector<2048x128xbf16>
    %cst = arith.constant dense<0.000000e+00> : vector<128x128xf32>
    %2 = tpu.matmul %0, %1, %cst {dimension_numbers = #tpu.dot_dimension_numbers<[1], [0], [0], [1], [0, 0, 1, 1], [], []>} : vector<128x2048xbf16>, vector<2048x128xbf16>, vector<128x128xf32> -> vector<128x128xf32>
    %c0_3 = arith.constant 0 : index
    %c0_4 = arith.constant 0 : index
    %3 = vector.load %arg2[%c0_3, %c0_4] : memref<1x128xf32, #tpu.memory_space<vmem>>, vector<1x128xf32>
    %4 = vector.broadcast %3 : vector<1x128xf32> to vector<128x128xf32>
    %5 = arith.addf %2, %4 : vector<128x128xf32>
    %cst_5 = arith.constant dense<0.000000e+00> : vector<128xf32>
    %6 = vector.multi_reduction <add>, %5, %cst_5 [0] : vector<128x128xf32> to vector<128xf32>
    %7 = vector.shape_cast %6 : vector<128xf32> to vector<1x128xf32>
    %cst_6 = arith.constant 7.812500e-03 : f32
    %8 = vector.broadcast %cst_6 : f32 to vector<1x128xf32>
    %9 = arith.mulf %7, %8 : vector<1x128xf32>
    %10 = vector.broadcast %9 : vector<1x128xf32> to vector<128x128xf32>
    %11 = arith.subf %5, %10 : vector<128x128xf32>
    %12 = arith.mulf %11, %11 : vector<128x128xf32>
    %cst_7 = arith.constant dense<0.000000e+00> : vector<128xf32>
    %13 = vector.multi_reduction <add>, %12, %cst_7 [0] : vector<128x128xf32> to vector<128xf32>
    %14 = vector.shape_cast %13 : vector<128xf32> to vector<1x128xf32>
    %cst_8 = arith.constant 7.812500e-03 : f32
    %15 = vector.broadcast %cst_8 : f32 to vector<1x128xf32>
    %16 = arith.mulf %14, %15 : vector<1x128xf32>
    %c0_9 = arith.constant 0 : index
    %c0_10 = arith.constant 0 : index
    %17 = vector.load %arg3[%c0_9, %c0_10] : memref<1x128xf32, #tpu.memory_space<vmem>>, vector<1x128xf32>
    %cst_11 = arith.constant 9.99999974E-6 : f32
    %18 = vector.broadcast %cst_11 : f32 to vector<1x128xf32>
    %19 = arith.addf %16, %18 : vector<1x128xf32>
    %20 = math.rsqrt %19 : vector<1x128xf32>
    %21 = arith.mulf %17, %20 : vector<1x128xf32>
    %22 = vector.broadcast %21 : vector<1x128xf32> to vector<128x128xf32>
    %23 = arith.mulf %11, %22 : vector<128x128xf32>
    %c0_12 = arith.constant 0 : index
    %c0_13 = arith.constant 0 : index
    %24 = vector.load %arg4[%c0_12, %c0_13] : memref<1x128xf32, #tpu.memory_space<vmem>>, vector<1x128xf32>
    %25 = vector.broadcast %24 : vector<1x128xf32> to vector<128x128xf32>
    %26 = arith.addf %23, %25 : vector<128x128xf32>
    %cst_14 = arith.constant 0.000000e+00 : f32
    %27 = vector.broadcast %cst_14 : f32 to vector<128x128xf32>
    %28 = arith.cmpf oge, %26, %27 : vector<128x128xf32>
    %cst_15 = arith.constant 2.000000e-01 : f32
    %29 = vector.broadcast %cst_15 : f32 to vector<128x128xf32>
    %30 = arith.mulf %29, %26 : vector<128x128xf32>
    %31 = arith.select %28, %26, %30 : vector<128x128xi1>, vector<128x128xf32>
    %32 = arith.truncf %31 : vector<128x128xf32> to vector<128x128xbf16>
    %c0_16 = arith.constant 0 : index
    %c0_17 = arith.constant 0 : index
    %33 = vector.load %arg5[%c0_16, %c0_17] : memref<128x128xbf16, #tpu.memory_space<vmem>>, vector<128x128xbf16>
    tpu.vector_store %arg5[%c0_16, %c0_17], %32 {strides = array<i32>} : memref<128x128xbf16, #tpu.memory_space<vmem>>, vector<128x128xbf16>,
    return
  }
}

module attributes {stable_mosaic.version = 11 : i64} {
  func.func @_conv_bn_leaky_kernel(%arg0: memref<32x2048xbf16, #tpu.memory_space<vmem>>, %arg1: memref<2048x128xbf16, #tpu.memory_space<vmem>>, %arg2: memref<1x128xf32, #tpu.memory_space<vmem>>, %arg3: memref<1x128xf32, #tpu.memory_space<vmem>>, %arg4: memref<1x128xf32, #tpu.memory_space<vmem>>, %arg5: memref<32x128xbf16, #tpu.memory_space<vmem>>) attributes {dimension_semantics = [], scalar_prefetch = 0 : i64, scratch_operands = 0 : i64, tpu.core_type = #tpu.core_type<tc>} {
    %c0 = arith.constant 0 : index
    %c0_0 = arith.constant 0 : index
    %0 = vector.load %arg0[%c0, %c0_0] : memref<32x2048xbf16, #tpu.memory_space<vmem>>, vector<32x2048xbf16>
    %c0_1 = arith.constant 0 : index
    %c0_2 = arith.constant 0 : index
    %1 = vector.load %arg1[%c0_1, %c0_2] : memref<2048x128xbf16, #tpu.memory_space<vmem>>, vector<2048x128xbf16>
    %cst = arith.constant dense<0.000000e+00> : vector<32x128xf32>
    %2 = tpu.matmul %0, %1, %cst {dimension_numbers = #tpu.dot_dimension_numbers<[1], [0], [0], [1], [0, 0, 1, 1], [], []>} : vector<32x2048xbf16>, vector<2048x128xbf16>, vector<32x128xf32> -> vector<32x128xf32>
    %c0_3 = arith.constant 0 : index
    %c0_4 = arith.constant 0 : index
    %3 = vector.load %arg2[%c0_3, %c0_4] : memref<1x128xf32, #tpu.memory_space<vmem>>, vector<1x128xf32>
    %4 = vector.broadcast %3 : vector<1x128xf32> to vector<32x128xf32>
    %5 = arith.addf %2, %4 : vector<32x128xf32>
    %cst_5 = arith.constant dense<0.000000e+00> : vector<128xf32>
    %6 = vector.multi_reduction <add>, %5, %cst_5 [0] : vector<32x128xf32> to vector<128xf32>
    %7 = vector.shape_cast %6 : vector<128xf32> to vector<1x128xf32>
    %cst_6 = arith.constant 3.125000e-02 : f32
    %8 = vector.broadcast %cst_6 : f32 to vector<1x128xf32>
    %9 = arith.mulf %7, %8 : vector<1x128xf32>
    %10 = vector.broadcast %9 : vector<1x128xf32> to vector<32x128xf32>
    %11 = arith.subf %5, %10 : vector<32x128xf32>
    %12 = arith.mulf %11, %11 : vector<32x128xf32>
    %cst_7 = arith.constant dense<0.000000e+00> : vector<128xf32>
    %13 = vector.multi_reduction <add>, %12, %cst_7 [0] : vector<32x128xf32> to vector<128xf32>
    %14 = vector.shape_cast %13 : vector<128xf32> to vector<1x128xf32>
    %cst_8 = arith.constant 3.125000e-02 : f32
    %15 = vector.broadcast %cst_8 : f32 to vector<1x128xf32>
    %16 = arith.mulf %14, %15 : vector<1x128xf32>
    %c0_9 = arith.constant 0 : index
    %c0_10 = arith.constant 0 : index
    %17 = vector.load %arg3[%c0_9, %c0_10] : memref<1x128xf32, #tpu.memory_space<vmem>>, vector<1x128xf32>
    %cst_11 = arith.constant 9.99999974E-6 : f32
    %18 = vector.broadcast %cst_11 : f32 to vector<1x128xf32>
    %19 = arith.addf %16, %18 : vector<1x128xf32>
    %20 = math.rsqrt %19 : vector<1x128xf32>
    %21 = arith.mulf %17, %20 : vector<1x128xf32>
    %22 = vector.broadcast %21 : vector<1x128xf32> to vector<32x128xf32>
    %23 = arith.mulf %11, %22 : vector<32x128xf32>
    %c0_12 = arith.constant 0 : index
    %c0_13 = arith.constant 0 : index
    %24 = vector.load %arg4[%c0_12, %c0_13] : memref<1x128xf32, #tpu.memory_space<vmem>>, vector<1x128xf32>
    %25 = vector.broadcast %24 : vector<1x128xf32> to vector<32x128xf32>
    %26 = arith.addf %23, %25 : vector<32x128xf32>
    %cst_14 = arith.constant 0.000000e+00 : f32
    %27 = vector.broadcast %cst_14 : f32 to vector<32x128xf32>
    %28 = arith.cmpf oge, %26, %27 : vector<32x128xf32>
    %cst_15 = arith.constant 2.000000e-01 : f32
    %29 = vector.broadcast %cst_15 : f32 to vector<32x128xf32>
    %30 = arith.mulf %29, %26 : vector<32x128xf32>
    %31 = arith.select %28, %26, %30 : vector<32x128xi1>, vector<32x128xf32>
    %32 = arith.truncf %31 : vector<32x128xf32> to vector<32x128xbf16>
    %c0_16 = arith.constant 0 : index
    %c0_17 = arith.constant 0 : index
    %33 = vector.load %arg5[%c0_16, %c0_17] : memref<32x128xbf16, #tpu.memory_space<vmem>>, vector<32x128xbf16>
    tpu.vector_store %arg5[%c0_16, %c0_17], %32 {strides = array<i32>} : memref<32x128xbf16, #tpu.memory_space<vmem>>, vector<32x128xbf16>,
    return
  }
}

module attributes {stable_mosaic.version = 11 : i64} {
  func.func @_conv_bn_leaky_kernel(%arg0: memref<8x2048xbf16, #tpu.memory_space<vmem>>, %arg1: memref<2048x256xbf16, #tpu.memory_space<vmem>>, %arg2: memref<1x256xf32, #tpu.memory_space<vmem>>, %arg3: memref<1x256xf32, #tpu.memory_space<vmem>>, %arg4: memref<1x256xf32, #tpu.memory_space<vmem>>, %arg5: memref<8x256xbf16, #tpu.memory_space<vmem>>) attributes {dimension_semantics = [], scalar_prefetch = 0 : i64, scratch_operands = 0 : i64, tpu.core_type = #tpu.core_type<tc>} {
    %c0 = arith.constant 0 : index
    %c0_0 = arith.constant 0 : index
    %0 = vector.load %arg0[%c0, %c0_0] : memref<8x2048xbf16, #tpu.memory_space<vmem>>, vector<8x2048xbf16>
    %c0_1 = arith.constant 0 : index
    %c0_2 = arith.constant 0 : index
    %1 = vector.load %arg1[%c0_1, %c0_2] : memref<2048x256xbf16, #tpu.memory_space<vmem>>, vector<2048x256xbf16>
    %cst = arith.constant dense<0.000000e+00> : vector<8x256xf32>
    %2 = tpu.matmul %0, %1, %cst {dimension_numbers = #tpu.dot_dimension_numbers<[1], [0], [0], [1], [0, 0, 1, 1], [], []>} : vector<8x2048xbf16>, vector<2048x256xbf16>, vector<8x256xf32> -> vector<8x256xf32>
    %c0_3 = arith.constant 0 : index
    %c0_4 = arith.constant 0 : index
    %3 = vector.load %arg2[%c0_3, %c0_4] : memref<1x256xf32, #tpu.memory_space<vmem>>, vector<1x256xf32>
    %4 = vector.broadcast %3 : vector<1x256xf32> to vector<8x256xf32>
    %5 = arith.addf %2, %4 : vector<8x256xf32>
    %cst_5 = arith.constant dense<0.000000e+00> : vector<256xf32>
    %6 = vector.multi_reduction <add>, %5, %cst_5 [0] : vector<8x256xf32> to vector<256xf32>
    %7 = vector.shape_cast %6 : vector<256xf32> to vector<1x256xf32>
    %cst_6 = arith.constant 1.250000e-01 : f32
    %8 = vector.broadcast %cst_6 : f32 to vector<1x256xf32>
    %9 = arith.mulf %7, %8 : vector<1x256xf32>
    %10 = vector.broadcast %9 : vector<1x256xf32> to vector<8x256xf32>
    %11 = arith.subf %5, %10 : vector<8x256xf32>
    %12 = arith.mulf %11, %11 : vector<8x256xf32>
    %cst_7 = arith.constant dense<0.000000e+00> : vector<256xf32>
    %13 = vector.multi_reduction <add>, %12, %cst_7 [0] : vector<8x256xf32> to vector<256xf32>
    %14 = vector.shape_cast %13 : vector<256xf32> to vector<1x256xf32>
    %cst_8 = arith.constant 1.250000e-01 : f32
    %15 = vector.broadcast %cst_8 : f32 to vector<1x256xf32>
    %16 = arith.mulf %14, %15 : vector<1x256xf32>
    %c0_9 = arith.constant 0 : index
    %c0_10 = arith.constant 0 : index
    %17 = vector.load %arg3[%c0_9, %c0_10] : memref<1x256xf32, #tpu.memory_space<vmem>>, vector<1x256xf32>
    %cst_11 = arith.constant 9.99999974E-6 : f32
    %18 = vector.broadcast %cst_11 : f32 to vector<1x256xf32>
    %19 = arith.addf %16, %18 : vector<1x256xf32>
    %20 = math.rsqrt %19 : vector<1x256xf32>
    %21 = arith.mulf %17, %20 : vector<1x256xf32>
    %22 = vector.broadcast %21 : vector<1x256xf32> to vector<8x256xf32>
    %23 = arith.mulf %11, %22 : vector<8x256xf32>
    %c0_12 = arith.constant 0 : index
    %c0_13 = arith.constant 0 : index
    %24 = vector.load %arg4[%c0_12, %c0_13] : memref<1x256xf32, #tpu.memory_space<vmem>>, vector<1x256xf32>
    %25 = vector.broadcast %24 : vector<1x256xf32> to vector<8x256xf32>
    %26 = arith.addf %23, %25 : vector<8x256xf32>
    %cst_14 = arith.constant 0.000000e+00 : f32
    %27 = vector.broadcast %cst_14 : f32 to vector<8x256xf32>
    %28 = arith.cmpf oge, %26, %27 : vector<8x256xf32>
    %cst_15 = arith.constant 2.000000e-01 : f32
    %29 = vector.broadcast %cst_15 : f32 to vector<8x256xf32>
    %30 = arith.mulf %29, %26 : vector<8x256xf32>
    %31 = arith.select %28, %26, %30 : vector<8x256xi1>, vector<8x256xf32>
    %32 = arith.truncf %31 : vector<8x256xf32> to vector<8x256xbf16>
    %c0_16 = arith.constant 0 : index
    %c0_17 = arith.constant 0 : index
    %33 = vector.load %arg5[%c0_16, %c0_17] : memref<8x256xbf16, #tpu.memory_space<vmem>>, vector<8x256xbf16>
    tpu.vector_store %arg5[%c0_16, %c0_17], %32 {strides = array<i32>} : memref<8x256xbf16, #tpu.memory_space<vmem>>, vector<8x256xbf16>,
    return
  }
}

module attributes {stable_mosaic.version = 11 : i64} {
  func.func @_conv_act_kernel(%arg0: memref<2x4096xbf16, #tpu.memory_space<vmem>>, %arg1: memref<4096x128xbf16, #tpu.memory_space<vmem>>, %arg2: memref<1x128xf32, #tpu.memory_space<vmem>>, %arg3: memref<2x128xf32, #tpu.memory_space<vmem>>) attributes {dimension_semantics = [], scalar_prefetch = 0 : i64, scratch_operands = 0 : i64, tpu.core_type = #tpu.core_type<tc>} {
    %c0 = arith.constant 0 : index
    %c0_0 = arith.constant 0 : index
    %0 = vector.load %arg0[%c0, %c0_0] : memref<2x4096xbf16, #tpu.memory_space<vmem>>, vector<2x4096xbf16>
    %c0_1 = arith.constant 0 : index
    %c0_2 = arith.constant 0 : index
    %1 = vector.load %arg1[%c0_1, %c0_2] : memref<4096x128xbf16, #tpu.memory_space<vmem>>, vector<4096x128xbf16>
    %cst = arith.constant dense<0.000000e+00> : vector<2x128xf32>
    %2 = tpu.matmul %0, %1, %cst {dimension_numbers = #tpu.dot_dimension_numbers<[1], [0], [0], [1], [0, 0, 1, 1], [], []>} : vector<2x4096xbf16>, vector<4096x128xbf16>, vector<2x128xf32> -> vector<2x128xf32>
    %c0_3 = arith.constant 0 : index
    %c0_4 = arith.constant 0 : index
    %3 = vector.load %arg2[%c0_3, %c0_4] : memref<1x128xf32, #tpu.memory_space<vmem>>, vector<1x128xf32>
    %4 = vector.broadcast %3 : vector<1x128xf32> to vector<2x128xf32>
    %5 = arith.addf %2, %4 : vector<2x128xf32>
    %cst_5 = arith.constant 0.000000e+00 : f32
    %6 = vector.broadcast %cst_5 : f32 to vector<2x128xf32>
    %7 = arith.subf %6, %5 : vector<2x128xf32>
    %8 = math.exp %7 : vector<2x128xf32>
    %cst_6 = arith.constant 1.000000e+00 : f32
    %9 = vector.broadcast %cst_6 : f32 to vector<2x128xf32>
    %10 = arith.addf %9, %8 : vector<2x128xf32>
    %11 = tpu.reciprocal %10 {approx = true} : vector<2x128xf32> -> vector<2x128xf32>
    %cst_7 = arith.constant 0.000000e+00 : f32
    %cst_8 = arith.constant 1.000000e+00 : f32
    %12 = vector.broadcast %cst_7 : f32 to vector<2x128xf32>
    %13 = arith.maximumf %12, %11 : vector<2x128xf32>
    %14 = vector.broadcast %cst_8 : f32 to vector<2x128xf32>
    %15 = arith.minimumf %14, %13 : vector<2x128xf32>
    %c0_9 = arith.constant 0 : index
    %c0_10 = arith.constant 0 : index
    %16 = vector.load %arg3[%c0_9, %c0_10] : memref<2x128xf32, #tpu.memory_space<vmem>>, vector<2x128xf32>
    tpu.vector_store %arg3[%c0_9, %c0_10], %15 {strides = array<i32>} : memref<2x128xf32, #tpu.memory_space<vmem>>, vector<2x128xf32>,
    return
  }
}

</mosaic_0001>

<bundles_post_ra>
// kernel: discriminator_forward.5
= control target key start
LH: loop header
LB: loop body
LE: loop exit
PB: predicated region body
PF: predicated region fallthrough
CT: control target
= control target key end

     0   :  { %s1190_s12 = smov 0   ;;  %s1317_s0 = inlined_call_operand.vmem [shape: bf16[512,128], index: 0, kind: input, shape index: {}]   ;;  %s1318_s1 = inlined_call_operand.vmem [shape: bf16[128,128], index: 1, kind: input, shape index: {}]   ;;  %s1319_s2 = inlined_call_operand.vmem [shape: f32[1,128], index: 2, kind: input, shape index: {}]   ;;  %s1320_s3 = inlined_call_operand.vmem [shape: bf16[512,128], index: 3, kind: output, shape index: {}]  }
   0x1 LB: > { %s847_s13 = sadd.s32 4294967295, %s1168_s12   ;;  %p851_p0 = scmp.ge.s32.totalorder %s1168_s12, 1  ;;  %s1168_s12 = sphi %s1190_s12, %s13_s12  }
   0x2   : > { %p138_p1 = scmp.lt.s32.totalorder %s1168_s12, 3 }
   0x4   : > { %p139_p2 = pnand %p851_p0, %p138_p1 }
   0x5   : > { %v1138_v0 = vld [vmem:[%s1318_s1] sm:$0xff] (!%p139_p2)   ;;  %s852_s16 = sshll.u32 (!%p139_p2), %s847_s13, 5  ;;  %v1139_v1 = vld [vmem:[%s1318_s1 + $0x8] sm:$0xff] (!%p139_p2)   ;;  %v1140_v2 = vld [vmem:[%s1318_s1 + $0x10] sm:$0xff] (!%p139_p2)  }
   0x6   : > { %142 = sbr.rel (%p139_p2) target bundleno = 293 (0x125), region = 32  ;;  %p163_p3 = scmp.lt.s32.totalorder (!%p139_p2), %s852_s16, 63  ;;  %1066 = vmatprep.subr.bf16.mxu0 (!%p139_p2), %v1138_v0  ;;  %1114 = vmatprep.subr.bf16.mxu1 (!%p139_p2), %v1138_v0  ;;  %v1141_v3 = vld [vmem:[%s1318_s1 + $0x18] sm:$0xff] (!%p139_p2)   ;;  %v1142_v6 = vld [vmem:[%s1318_s1 + $0x20] sm:$0xff] (!%p139_p2)   ;;  %v1143_v7 = vld [vmem:[%s1318_s1 + $0x28] sm:$0xff] (!%p139_p2)  }
   0x7   : > { %1067 = vmatpush3.bf16.msra.mxu0 (!%p139_p2), %v1138_v0  ;;  %1122 = vmatpush3.bf16.msra.mxu1 (!%p139_p2), %v1138_v0  ;;  %v1144_v8 = vld [vmem:[%s1318_s1 + $0x30] sm:$0xff] (!%p139_p2)   ;;  %v1145_v9 = vld [vmem:[%s1318_s1 + $0x38] sm:$0xff] (!%p139_p2)   ;;  %v1251_v24 = vld [vmem:[%s1319_s2] ss:$0 sm:$0xff] (!%p139_p2) }
   0x8   : > { %1068 = vmatprep.subr.bf16.mxu0 (!%p139_p2), %v1139_v1  ;;  %1115 = vmatprep.subr.bf16.mxu1 (!%p139_p2), %v1139_v1 }
   0xb   : > { %1069 = vmatpush3.bf16.msra.mxu0 (!%p139_p2), %v1139_v1  ;;  %1123 = vmatpush3.bf16.msra.mxu1 (!%p139_p2), %v1139_v1 }
   0xc   : > { %1070 = vmatprep.subr.bf16.mxu0 (!%p139_p2), %v1140_v2  ;;  %1116 = vmatprep.subr.bf16.mxu1 (!%p139_p2), %v1140_v2 }
   0xd   : > { %s1322_s16 = smov (!%p163_p3, %s852_s16), 63 }
   0xe   : > { %s853_s21 = sshll.u32 %s1322_s16, 2 }
   0xf   : > { %s1215_s24 = scalar_lea.vmem %s1317_s0, %s853_s21  ;;  %1071 = vmatpush3.bf16.msra.mxu0 %v1140_v2  ;;  %1124 = vmatpush3.bf16.msra.mxu1 %v1140_v2  ;;  %s1268_s13 = scalar_lea.vmem %s1320_s3, %s853_s21 }
  0x10   : > { %v1146_v4 = vld [vmem:[%s1215_s24] sm:$0xff]   ;;  %1072 = vmatprep.subr.bf16.mxu0 %v1141_v3  ;;  %1117 = vmatprep.subr.bf16.mxu1 %v1141_v3  ;;  %v1148_v10 = vld [vmem:[%s1215_s24 + $0x8] sm:$0xff]   ;;  %v1150_v12 = vld [vmem:[%s1215_s24 + $0x10] sm:$0xff]  }
  0x11   : > { %v1147_v5 = vld [vmem:[%s1215_s24 + $0x40] sm:$0xff]   ;;  %1082 = vmatprep.mubr.bf16.mxu0 %v1146_v4  ;;  %v1149_v11 = vld [vmem:[%s1215_s24 + $0x48] sm:$0xff]   ;;  %v1151_v13 = vld [vmem:[%s1215_s24 + $0x50] sm:$0xff]  }
  0x12   : > { %1098 = vmatprep.mubr.bf16.mxu1 %v1147_v5  ;;  %v1152_v14 = vld [vmem:[%s1215_s24 + $0x18] sm:$0xff]   ;;  %v1154_v16 = vld [vmem:[%s1215_s24 + $0x20] sm:$0xff]   ;;  %v1156_v18 = vld [vmem:[%s1215_s24 + $0x28] sm:$0xff]  }
  0x13   : > { %1073 = vmatpush3.bf16.msra.mxu0 %v1141_v3  ;;  %1125 = vmatpush3.bf16.msra.mxu1 %v1141_v3  ;;  %v1153_v15 = vld [vmem:[%s1215_s24 + $0x58] sm:$0xff]   ;;  %v1155_v17 = vld [vmem:[%s1215_s24 + $0x60] sm:$0xff]   ;;  %v1157_v19 = vld [vmem:[%s1215_s24 + $0x68] sm:$0xff]  }
  0x14   : > { %1074 = vmatprep.subr.bf16.mxu0 %v1142_v6  ;;  %1118 = vmatprep.subr.bf16.mxu1 %v1142_v6  ;;  %v1158_v20 = vld [vmem:[%s1215_s24 + $0x30] sm:$0xff]   ;;  %v1160_v22 = vld [vmem:[%s1215_s24 + $0x38] sm:$0xff]  }
  0x15   : > { %v1159_v21 = vld [vmem:[%s1215_s24 + $0x70] sm:$0xff]   ;;  %v1161_v23 = vld [vmem:[%s1215_s24 + $0x78] sm:$0xff]  }
  0x17   : > { %1075 = vmatpush3.bf16.msra.mxu0 %v1142_v6  ;;  %1126 = vmatpush3.bf16.msra.mxu1 %v1142_v6 }
  0x18   : > { %1076 = vmatprep.subr.bf16.mxu0 %v1143_v7  ;;  %1119 = vmatprep.subr.bf16.mxu1 %v1143_v7 }
  0x1b   : > { %1077 = vmatpush3.bf16.msra.mxu0 %v1143_v7  ;;  %1127 = vmatpush3.bf16.msra.mxu1 %v1143_v7 }
  0x1c   : > { %1078 = vmatprep.subr.bf16.mxu0 %v1144_v8  ;;  %1120 = vmatprep.subr.bf16.mxu1 %v1144_v8 }
  0x1f   : > { %1079 = vmatpush3.bf16.msra.mxu0 %v1144_v8  ;;  %1128 = vmatpush3.bf16.msra.mxu1 %v1144_v8 }
  0x20   : > { %1080 = vmatprep.subr.bf16.mxu0 %v1145_v9  ;;  %1121 = vmatprep.subr.bf16.mxu1 %v1145_v9 }
  0x23   : > { %1081 = vmatpush3.bf16.msra.mxu0 %v1145_v9  ;;  %1129 = vmatpush3.bf16.msra.mxu1 %v1145_v9 }
  0x26   : > { %1083 = vmatmul.mubr.bf16.vlgmr.msra.gmra.mrb[0].mxu0 %v1148_v10  ;;  %1099 = vmatmul.mubr.bf16.vlgmr.msra.gmra.mrb[0].mxu1 %v1149_v11 }
  0x27   : > { %1086 = vmatprep.mubr.bf16.mxu0 %v1150_v12  ;;  %1102 = vmatprep.mubr.bf16.mxu1 %v1151_v13 }
  0x2e   : > { %1087 = vmatmul.mubr.bf16.gmra.mrb[4].mxu0 %v1152_v14  ;;  %1103 = vmatmul.mubr.bf16.gmra.mrb[4].mxu1 %v1153_v15 }
  0x2f   : > { %1090 = vmatprep.mubr.bf16.mxu0 %v1154_v16  ;;  %1106 = vmatprep.mubr.bf16.mxu1 %v1155_v17 }
  0x36   : > { %1091 = vmatmul.mubr.bf16.gmra.mrb[8].mxu0 %v1156_v18  ;;  %1107 = vmatmul.mubr.bf16.gmra.mrb[8].mxu1 %v1157_v19 }
  0x37   : > { %1094 = vmatprep.mubr.bf16.mxu0 %v1158_v20  ;;  %1110 = vmatprep.mubr.bf16.mxu1 %v1159_v21 }
  0x3e   : > { %1095 = vmatmul.mubr.bf16.gmra.mrb[12].mxu0 %v1160_v22  ;;  %1111 = vmatmul.mubr.bf16.gmra.mrb[12].mxu1 %v1161_v23 }
  0xf9   : > { %v1084_v25 = vpop.f32.mrb[0].mxu0  ;;  %v1100_v26 = vpop.f32.mrb[0].mxu1 }
  0xfa   : > { %v417_v27 = vadd.f32 %v1084_v25, %v1251_v24  ;;  %v481_v28 = vadd.f32 %v1100_v26, %v1251_v24  ;;  %v408_v29 = vpop.f32.mrb[1].mxu0  ;;  %v472_v30 = vpop.f32.mrb[1].mxu1 }
  0xfb   : > { %v409_v31 = vadd.f32 %v1251_v24, %v408_v29  ;;  %v473_v32 = vadd.f32 %v1251_v24, %v472_v30  ;;  %v1085_v33 = vpop.f32.mrb[2].mxu0  ;;  %v1101_v34 = vpop.f32.mrb[2].mxu1 }
  0xfc   : > { %vm537_vm0 = vcmp.ge.f32.partialorder %v417_v27, 0.0  ;;  %v569_v35 = vmul.f32 0.2, %v417_v27  ;;  %vm553_vm1 = vcmp.ge.f32.partialorder %v481_v28, 0.0  ;;  %v585_v36 = vmul.f32 0.2, %v481_v28 }
  0xfd   : > { %vm535_vm2 = vcmp.ge.f32.partialorder %v409_v31, 0.0  ;;  %v567_v37 = vmul.f32 0.2, %v409_v31  ;;  %vm551_vm3 = vcmp.ge.f32.partialorder %v473_v32, 0.0  ;;  %v583_v38 = vmul.f32 0.2, %v473_v32 }
  0xfe   : > { %v420_v39 = vadd.f32 %v1085_v33, %v1251_v24  ;;  %v484_v40 = vadd.f32 %v1101_v34, %v1251_v24  ;;  %v411_v41 = vpop.f32.mrb[3].mxu0  ;;  %v475_v42 = vpop.f32.mrb[3].mxu1  ;;  %v601_v43 = vsel %vm537_vm0, %v417_v27, %v569_v35  ;;  %v617_v44 = vsel %vm553_vm1, %v481_v28, %v585_v36 }
  0xff   : > { %v412_v45 = vadd.f32 %v1251_v24, %v411_v41  ;;  %v476_v46 = vadd.f32 %v1251_v24, %v475_v42  ;;  %v599_v51 = vsel %vm535_vm2, %v409_v31, %v567_v37  ;;  %v615_v52 = vsel %vm551_vm3, %v473_v32, %v583_v38 }
 0x100   : > { %vm538_vm4 = vcmp.ge.f32.partialorder %v420_v39, 0.0  ;;  %v570_v47 = vmul.f32 0.2, %v420_v39  ;;  %vm554_vm5 = vcmp.ge.f32.partialorder %v484_v40, 0.0  ;;  %v586_v48 = vmul.f32 0.2, %v484_v40 }
 0x101   : > { %vm536_vm6 = vcmp.ge.f32.partialorder %v412_v45, 0.0  ;;  %v568_v49 = vmul.f32 0.2, %v412_v45  ;;  %vm552_vm7 = vcmp.ge.f32.partialorder %v476_v46, 0.0  ;;  %v584_v50 = vmul.f32 0.2, %v476_v46 }
 0x102   : > { %v602_v53 = vsel %vm538_vm4, %v420_v39, %v570_v47  ;;  %v618_v54 = vsel %vm554_vm5, %v484_v40, %v586_v48  ;;  %v1088_v55 = vpop.f32.mrb[4].mxu0  ;;  %v1104_v56 = vpop.f32.mrb[4].mxu1 }
 0x103   : > { %v955_v57 = vpack.c.bf16 %v602_v53, %v601_v43  ;;  %v995_v58 = vpack.c.bf16 %v618_v54, %v617_v44  ;;  %v600_v59 = vsel %vm536_vm6, %v412_v45, %v568_v49  ;;  %v616_v60 = vsel %vm552_vm7, %v476_v46, %v584_v50  ;;  %v424_v61 = vpop.f32.mrb[5].mxu0  ;;  %v488_v62 = vpop.f32.mrb[5].mxu1 }
 0x104   : > { %v950_v63 = vpack.c.bf16 %v600_v59, %v599_v51  ;;  %v990_v0 = vpack.c.bf16 %v616_v60, %v615_v52  ;;  %v433_v1 = vadd.f32 %v1088_v55, %v1251_v24  ;;  %v497_v2 = vadd.f32 %v1104_v56, %v1251_v24  ;;  %v1089_v3 = vpop.f32.mrb[6].mxu0  ;;  %v1105_v4 = vpop.f32.mrb[6].mxu1 }
 0x105   : > { %1027 = vst [vmem:[%s1268_s13 + $0x8] sm:$0xff] %v955_v57   ;;  %1035 = vst [vmem:[%s1268_s13 + $0x48] sm:$0xff] %v995_v58   ;;  %v425_v5 = vadd.f32 %v1251_v24, %v424_v61  ;;  %v489_v6 = vadd.f32 %v1251_v24, %v488_v62  ;;  %v436_v7 = vadd.f32 %v1089_v3, %v1251_v24  ;;  %v427_v9 = vpop.f32.mrb[7].mxu0  ;;  %v491_v10 = vpop.f32.mrb[7].mxu1 }
 0x106   : > { %v500_v8 = vadd.f32 %v1105_v4, %v1251_v24  ;;  %951 = vst [vmem:[%s1268_s13] sm:$0xff] %v950_v63   ;;  %1034 = vst [vmem:[%s1268_s13 + $0x40] sm:$0xff] %v990_v0   ;;  %vm541_vm8 = vcmp.ge.f32.partialorder %v433_v1, 0.0  ;;  %v573_v11 = vmul.f32 0.2, %v433_v1  ;;  %vm557_vm9 = vcmp.ge.f32.partialorder %v497_v2, 0.0 }
 0x107   : > { %v589_v12 = vmul.f32 0.2, %v497_v2  ;;  %vm539_vm10 = vcmp.ge.f32.partialorder %v425_v5, 0.0  ;;  %v571_v13 = vmul.f32 0.2, %v425_v5  ;;  %vm555_vm11 = vcmp.ge.f32.partialorder %v489_v6, 0.0 }
 0x108   : > { %v605_v14 = vsel %vm541_vm8, %v433_v1, %v573_v11  ;;  %v587_v15 = vmul.f32 0.2, %v489_v6  ;;  %vm542_vm12 = vcmp.ge.f32.partialorder %v436_v7, 0.0  ;;  %v574_v16 = vmul.f32 0.2, %v436_v7 }
 0x109   : > { %v621_v17 = vsel %vm557_vm9, %v497_v2, %v589_v12  ;;  %v603_v18 = vsel %vm539_vm10, %v425_v5, %v571_v13  ;;  %vm558_vm13 = vcmp.ge.f32.partialorder %v500_v8, 0.0  ;;  %v590_v19 = vmul.f32 0.2, %v500_v8  ;;  %v1092_v20 = vpop.f32.mrb[8].mxu0  ;;  %v1108_v21 = vpop.f32.mrb[8].mxu1 }
 0x10a   : > { %v606_v22 = vsel %vm542_vm12, %v436_v7, %v574_v16  ;;  %v428_v23 = vadd.f32 %v1251_v24, %v427_v9  ;;  %v492_v25 = vadd.f32 %v1251_v24, %v491_v10  ;;  %v449_v26 = vadd.f32 %v1092_v20, %v1251_v24  ;;  %v440_v27 = vpop.f32.mrb[9].mxu0  ;;  %v504_v28 = vpop.f32.mrb[9].mxu1 }
 0x10b   : > { %v965_v29 = vpack.c.bf16 %v606_v22, %v605_v14  ;;  %v622_v30 = vsel %vm558_vm13, %v500_v8, %v590_v19  ;;  %v513_v31 = vadd.f32 %v1108_v21, %v1251_v24  ;;  %v441_v32 = vadd.f32 %v1251_v24, %v440_v27  ;;  %v1093_v33 = vpop.f32.mrb[10].mxu0  ;;  %v1109_v34 = vpop.f32.mrb[10].mxu1 }
 0x10c   : > { %v1005_v35 = vpack.c.bf16 %v622_v30, %v621_v17  ;;  %vm540_vm14 = vcmp.ge.f32.partialorder %v428_v23, 0.0  ;;  %v572_v36 = vmul.f32 0.2, %v428_v23  ;;  %vm556_vm15 = vcmp.ge.f32.partialorder %v492_v25, 0.0  ;;  %v443_v37 = vpop.f32.mrb[11].mxu0  ;;  %v507_v38 = vpop.f32.mrb[11].mxu1 }
 0x10d   : > { %1029 = vst [vmem:[%s1268_s13 + $0x18] sm:$0xff] %v965_v29   ;;  %v588_v39 = vmul.f32 0.2, %v492_v25  ;;  %vm545_vm0 = vcmp.ge.f32.partialorder %v449_v26, 0.0  ;;  %v577_v40 = vmul.f32 0.2, %v449_v26  ;;  %v619_v41 = vsel %vm555_vm11, %v489_v6, %v587_v15 }
 0x10e   : > { %vm561_vm1 = vcmp.ge.f32.partialorder %v513_v31, 0.0  ;;  %1037 = vst [vmem:[%s1268_s13 + $0x58] sm:$0xff] %v1005_v35   ;;  %v604_v42 = vsel %vm540_vm14, %v428_v23, %v572_v36  ;;  %v593_v43 = vmul.f32 0.2, %v513_v31  ;;  %vm543_vm2 = vcmp.ge.f32.partialorder %v441_v32, 0.0 }
 0x10f   : > { %v960_v44 = vpack.c.bf16 %v604_v42, %v603_v18  ;;  %v620_v45 = vsel %vm556_vm15, %v492_v25, %v588_v39  ;;  %v575_v46 = vmul.f32 0.2, %v441_v32  ;;  %v505_v47 = vadd.f32 %v1251_v24, %v504_v28 }
 0x110   : > { %v1000_v48 = vpack.c.bf16 %v620_v45, %v619_v41  ;;  %v609_v49 = vsel %vm545_vm0, %v449_v26, %v577_v40  ;;  %v625_v50 = vsel %vm561_vm1, %v513_v31, %v593_v43  ;;  %v452_v51 = vadd.f32 %v1093_v33, %v1251_v24 }
 0x111   : > { %1028 = vst [vmem:[%s1268_s13 + $0x10] sm:$0xff] %v960_v44   ;;  %vm559_vm3 = vcmp.ge.f32.partialorder %v505_v47, 0.0  ;;  %v591_v52 = vmul.f32 0.2, %v505_v47  ;;  %v516_v53 = vadd.f32 %v1109_v34, %v1251_v24  ;;  %v444_v54 = vadd.f32 %v1251_v24, %v443_v37  ;;  %v1096_v55 = vpop.f32.mrb[12].mxu0  ;;  %v1112_v56 = vpop.f32.mrb[12].mxu1 }
 0x112   : > { %1036 = vst [vmem:[%s1268_s13 + $0x50] sm:$0xff] %v1000_v48   ;;  %vm546_vm4 = vcmp.ge.f32.partialorder %v452_v51, 0.0  ;;  %v578_v57 = vmul.f32 0.2, %v452_v51  ;;  %v508_v58 = vadd.f32 %v1251_v24, %v507_v38  ;;  %v465_v59 = vadd.f32 %v1096_v55, %v1251_v24  ;;  %v456_v60 = vpop.f32.mrb[13].mxu0  ;;  %v520_v61 = vpop.f32.mrb[13].mxu1 }
 0x113   : > { %v607_v62 = vsel %vm543_vm2, %v441_v32, %v575_v46  ;;  %vm562_vm5 = vcmp.ge.f32.partialorder %v516_v53, 0.0  ;;  %v594_v63 = vmul.f32 0.2, %v516_v53  ;;  %vm544_vm6 = vcmp.ge.f32.partialorder %v444_v54, 0.0  ;;  %v1097_v0 = vpop.f32.mrb[14].mxu0  ;;  %v1113_v1 = vpop.f32.mrb[14].mxu1 }
 0x114   : > { %v610_v2 = vsel %vm546_vm4, %v452_v51, %v578_v57  ;;  %v576_v3 = vmul.f32 0.2, %v444_v54  ;;  %vm560_vm7 = vcmp.ge.f32.partialorder %v508_v58, 0.0  ;;  %v592_v4 = vmul.f32 0.2, %v508_v58  ;;  %v459_v5 = vpop.f32.mrb[15].mxu0 }
 0x115   : > { %v623_v6 = vsel %vm559_vm3, %v505_v47, %v591_v52  ;;  %v975_v7 = vpack.c.bf16 %v610_v2, %v609_v49  ;;  %v626_v8 = vsel %vm562_vm5, %v516_v53, %v594_v63  ;;  %v581_v9 = vmul.f32 0.2, %v465_v59  ;;  %v523_v10 = vpop.f32.mrb[15].mxu1 }
 0x116   : > { %v1015_v11 = vpack.c.bf16 %v626_v8, %v625_v50  ;;  %v608_v12 = vsel %vm544_vm6, %v444_v54, %v576_v3  ;;  %v624_v13 = vsel %vm560_vm7, %v508_v58, %v592_v4  ;;  %v529_v14 = vadd.f32 %v1112_v56, %v1251_v24 }
 0x117   : > { %1031 = vst [vmem:[%s1268_s13 + $0x28] sm:$0xff] %v975_v7   ;;  %v970_v15 = vpack.c.bf16 %v608_v12, %v607_v62  ;;  %v1010_v16 = vpack.c.bf16 %v624_v13, %v623_v6  ;;  %vm549_vm8 = vcmp.ge.f32.partialorder %v465_v59, 0.0  ;;  %v457_v17 = vadd.f32 %v1251_v24, %v456_v60 }
 0x118   : > { %1039 = vst [vmem:[%s1268_s13 + $0x68] sm:$0xff] %v1015_v11   ;;  %vm565_vm9 = vcmp.ge.f32.partialorder %v529_v14, 0.0  ;;  %v597_v18 = vmul.f32 0.2, %v529_v14  ;;  %v521_v19 = vadd.f32 %v1251_v24, %v520_v61  ;;  %v468_v20 = vadd.f32 %v1097_v0, %v1251_v24 }
 0x119   : > { %1030 = vst [vmem:[%s1268_s13 + $0x20] sm:$0xff] %v970_v15   ;;  %1038 = vst [vmem:[%s1268_s13 + $0x60] sm:$0xff] %v1010_v16   ;;  %v579_v21 = vmul.f32 0.2, %v457_v17  ;;  %v532_v22 = vadd.f32 %v1113_v1, %v1251_v24  ;;  %v460_v23 = vadd.f32 %v1251_v24, %v459_v5  ;;  %v613_v25 = vsel %vm549_vm8, %v465_v59, %v581_v9 }
 0x11a   : > { %vm547_vm10 = vcmp.ge.f32.partialorder %v457_v17, 0.0  ;;  %vm550_vm11 = vcmp.ge.f32.partialorder %v468_v20, 0.0  ;;  %v629_v26 = vsel %vm565_vm9, %v529_v14, %v597_v18  ;;  %v582_v27 = vmul.f32 0.2, %v468_v20 }
 0x11b   : > { %vm566_vm12 = vcmp.ge.f32.partialorder %v532_v22, 0.0  ;;  %v598_v28 = vmul.f32 0.2, %v532_v22  ;;  %vm563_vm13 = vcmp.ge.f32.partialorder %v521_v19, 0.0  ;;  %vm548_vm14 = vcmp.ge.f32.partialorder %v460_v23, 0.0 }
 0x11c   : > { %v580_v29 = vmul.f32 0.2, %v460_v23  ;;  %v524_v30 = vadd.f32 %v1251_v24, %v523_v10  ;;  %v611_v31 = vsel %vm547_vm10, %v457_v17, %v579_v21  ;;  %v595_v32 = vmul.f32 0.2, %v521_v19 }
 0x11d   : > { %v614_v33 = vsel %vm550_vm11, %v468_v20, %v582_v27  ;;  %v630_v34 = vsel %vm566_vm12, %v532_v22, %v598_v28 }
 0x11e   : > { %v985_v35 = vpack.c.bf16 %v614_v33, %v613_v25  ;;  %v1025_v36 = vpack.c.bf16 %v630_v34, %v629_v26  ;;  %v612_v37 = vsel %vm548_vm14, %v460_v23, %v580_v29  ;;  %vm564_vm15 = vcmp.ge.f32.partialorder %v524_v30, 0.0 }
 0x11f   : > { %v980_v38 = vpack.c.bf16 %v612_v37, %v611_v31  ;;  %v596_v39 = vmul.f32 0.2, %v524_v30  ;;  %v627_v40 = vsel %vm563_vm13, %v521_v19, %v595_v32 }
 0x120   : > { %1033 = vst [vmem:[%s1268_s13 + $0x38] sm:$0xff] %v985_v35   ;;  %1041 = vst [vmem:[%s1268_s13 + $0x78] sm:$0xff] %v1025_v36  }
 0x121   : > { %1032 = vst [vmem:[%s1268_s13 + $0x30] sm:$0xff] %v980_v38   ;;  %v628_v41 = vsel %vm564_vm15, %v524_v30, %v596_v39 }
 0x122   : > { %v1020_v42 = vpack.c.bf16 %v628_v41, %v627_v40 }
 0x124   : > { %1040 = vst [vmem:[%s1268_s13 + $0x70] sm:$0xff] %v1020_v42  }
 0x125 PF: > { %s13_s12 = sadd.s32 1, %s1168_s12  }
 0x126   : > { %p10_p4 = scmp.ge.s32.totalorder %s13_s12, 4  }
 0x128   :  { %12 = sbr.rel (!%p10_p4) target bundleno = 1 (0x1), region = 62 }

// kernel: discriminator_forward.6
= control target key start
LH: loop header
LB: loop body
LE: loop exit
PB: predicated region body
PF: predicated region fallthrough
CT: control target
= control target key end

     0   :  { %s4961_s1 = inlined_call_operand.vmem [shape: bf16[2048,128], index: 1, kind: input, shape index: {}]   ;;  %s4962_s0 = inlined_call_operand.vmem [shape: bf16[128,2048], index: 0, kind: input, shape index: {}]   ;;  %s4963_s2 = inlined_call_operand.vmem [shape: f32[1,128], index: 2, kind: input, shape index: {}]   ;;  %s4964_s3 = inlined_call_operand.vmem [shape: f32[1,128], index: 3, kind: input, shape index: {}]   ;;  %s4965_s4 = inlined_call_operand.vmem [shape: f32[1,128], index: 4, kind: input, shape index: {}]   ;;  %s4966_s5 = inlined_call_operand.vmem [shape: bf16[128,128], index: 5, kind: output, shape index: {}]  }
   0x1   :  { %v3702_v0 = vld [vmem:[%s4961_s1 + $0x40] sm:$0xff]   ;;  %v3706_v4 = vld [vmem:[%s4961_s1 + $0x48] sm:$0xff]   ;;  %v3710_v8 = vld [vmem:[%s4961_s1 + $0x50] sm:$0xff]  }
   0x2   :  { %v3703_v1 = vld [vmem:[%s4961_s1 + $0xc0] sm:$0xff]   ;;  %3190 = vmatprep.subr.bf16.mxu0 %v3702_v0  ;;  %v3707_v5 = vld [vmem:[%s4961_s1 + $0xc8] sm:$0xff]   ;;  %v3711_v9 = vld [vmem:[%s4961_s1 + $0xd0] sm:$0xff]  }
   0x3   :  { %v3704_v2 = vld [vmem:[%s4961_s1] sm:$0xff]   ;;  %3254 = vmatprep.subr.bf16.mxu1 %v3703_v1  ;;  %v3708_v6 = vld [vmem:[%s4961_s1 + $0x8] sm:$0xff]   ;;  %v3712_v10 = vld [vmem:[%s4961_s1 + $0x10] sm:$0xff]  }
   0x4   :  { %v3705_v3 = vld [vmem:[%s4961_s1 + $0x80] sm:$0xff]   ;;  %3191 = vmatpush3.bf16.msra.mxu0 %v3704_v2  ;;  %v3709_v7 = vld [vmem:[%s4961_s1 + $0x88] sm:$0xff]   ;;  %v3713_v11 = vld [vmem:[%s4961_s1 + $0x90] sm:$0xff]  }
   0x5   :  { %3255 = vmatpush3.bf16.msra.mxu1 %v3705_v3  ;;  %3192 = vmatprep.subr.bf16.mxu0 %v3706_v4  ;;  %v3714_v12 = vld [vmem:[%s4961_s1 + $0x58] sm:$0xff]   ;;  %v3718_v16 = vld [vmem:[%s4961_s1 + $0x60] sm:$0xff]   ;;  %v3722_v20 = vld [vmem:[%s4961_s1 + $0x68] sm:$0xff]  }
   0x6   :  { %3256 = vmatprep.subr.bf16.mxu1 %v3707_v5  ;;  %v3715_v13 = vld [vmem:[%s4961_s1 + $0xd8] sm:$0xff]   ;;  %v3719_v17 = vld [vmem:[%s4961_s1 + $0xe0] sm:$0xff]   ;;  %v3723_v21 = vld [vmem:[%s4961_s1 + $0xe8] sm:$0xff]  }
   0x7   :  { %v3716_v14 = vld [vmem:[%s4961_s1 + $0x18] sm:$0xff]   ;;  %v3720_v18 = vld [vmem:[%s4961_s1 + $0x20] sm:$0xff]   ;;  %v3724_v22 = vld [vmem:[%s4961_s1 + $0x28] sm:$0xff]  }
   0x8   :  { %3193 = vmatpush3.bf16.msra.mxu0 %v3708_v6  ;;  %v3717_v15 = vld [vmem:[%s4961_s1 + $0x98] sm:$0xff]   ;;  %v3721_v19 = vld [vmem:[%s4961_s1 + $0xa0] sm:$0xff]   ;;  %v3725_v23 = vld [vmem:[%s4961_s1 + $0xa8] sm:$0xff]  }
   0x9   :  { %3257 = vmatpush3.bf16.msra.mxu1 %v3709_v7  ;;  %3194 = vmatprep.subr.bf16.mxu0 %v3710_v8  ;;  %v3726_v24 = vld [vmem:[%s4961_s1 + $0x70] sm:$0xff]   ;;  %v3730_v28 = vld [vmem:[%s4961_s1 + $0x78] sm:$0xff]   ;;  %v21_v32 = vld [vmem:[%s4962_s0] sm:$0xff] }
   0xa   :  { %3258 = vmatprep.subr.bf16.mxu1 %v3711_v9  ;;  %v3727_v25 = vld [vmem:[%s4961_s1 + $0xf0] sm:$0xff]   ;;  %v3731_v29 = vld [vmem:[%s4961_s1 + $0xf8] sm:$0xff]   ;;  %v29_v33 = vld [vmem:[%s4962_s0 + $0x40] sm:$0xff] }
   0xb   :  { %v3728_v26 = vld [vmem:[%s4961_s1 + $0x30] sm:$0xff]   ;;  %v3732_v30 = vld [vmem:[%s4961_s1 + $0x38] sm:$0xff]   ;;  %v22_v34 = vld [vmem:[%s4962_s0 + $0x8] sm:$0xff]  ;;  %v2854_v35 = vcombine.low %v21_v32, %v29_v33  ;;  %v2855_v36 = vcombine.high %v21_v32, %v29_v33 }
   0xc   :  { %3195 = vmatpush3.bf16.msra.mxu0 %v3712_v10  ;;  %v3729_v27 = vld [vmem:[%s4961_s1 + $0xb0] sm:$0xff]   ;;  %v3733_v31 = vld [vmem:[%s4961_s1 + $0xb8] sm:$0xff]   ;;  %v30_v37 = vld [vmem:[%s4962_s0 + $0x48] sm:$0xff] }
   0xd   :  { %3259 = vmatpush3.bf16.msra.mxu1 %v3713_v11  ;;  %3196 = vmatprep.subr.bf16.mxu0 %v3714_v12  ;;  %v2856_v38 = vcombine.low %v22_v34, %v30_v37  ;;  %v2857_v39 = vcombine.high %v22_v34, %v30_v37  ;;  %v3734_v40 = vld [vmem:[%s4961_s1 + $0x140] sm:$0xff]   ;;  %v38_v47 = vld [vmem:[%s4962_s0 + $0x88] sm:$0xff]  ;;  %v3742_v62 = vld [vmem:[%s4961_s1 + $0x150] sm:$0xff]  }
   0xe   :  { %3260 = vmatprep.subr.bf16.mxu1 %v3715_v13  ;;  %1852 = vmatprep.mubr.bf16.mxu0 %v2855_v36  ;;  %v3735_v41 = vld [vmem:[%s4961_s1 + $0x100] sm:$0xff]   ;;  %v46_v48 = vld [vmem:[%s4962_s0 + $0xc8] sm:$0xff]  ;;  %v3743_v63 = vld [vmem:[%s4961_s1 + $0x110] sm:$0xff]  }
   0xf   :  { %1949 = vmatprep.mubr.bf16.mxu1 %v2857_v39  ;;  %v3736_v42 = vld [vmem:[%s4961_s1 + $0x1c0] sm:$0xff]   ;;  %v2873_v49 = vcombine.high %v38_v47, %v46_v48  ;;  %v3738_v50 = vld [vmem:[%s4961_s1 + $0x148] sm:$0xff]   ;;  %v2872_v53 = vcombine.low %v38_v47, %v46_v48  ;;  %v3744_v0 = vld [vmem:[%s4961_s1 + $0x1d0] sm:$0xff]  }
  0x10   :  { %3197 = vmatpush3.bf16.msra.mxu0 %v3716_v14  ;;  %v3737_v43 = vld [vmem:[%s4961_s1 + $0x180] sm:$0xff]   ;;  %v3739_v52 = vld [vmem:[%s4961_s1 + $0x108] sm:$0xff]   ;;  %v3745_v1 = vld [vmem:[%s4961_s1 + $0x190] sm:$0xff]  }
  0x11   :  { %3261 = vmatpush3.bf16.msra.mxu1 %v3717_v15  ;;  %3198 = vmatprep.subr.bf16.mxu0 %v3718_v16  ;;  %v37_v44 = vld [vmem:[%s4962_s0 + $0x80] sm:$0xff]  ;;  %v3740_v54 = vld [vmem:[%s4961_s1 + $0x1c8] sm:$0xff]   ;;  %v3746_v10 = vld [vmem:[%s4961_s1 + $0x158] sm:$0xff]  }
  0x12   :  { %3262 = vmatprep.subr.bf16.mxu1 %v3719_v17  ;;  %v45_v45 = vld [vmem:[%s4962_s0 + $0xc0] sm:$0xff]  ;;  %v3741_v55 = vld [vmem:[%s4961_s1 + $0x188] sm:$0xff]   ;;  %v3747_v11 = vld [vmem:[%s4961_s1 + $0x118] sm:$0xff]  }
  0x13   :  { %v2871_v46 = vcombine.high %v37_v44, %v45_v45  ;;  %v2870_v51 = vcombine.low %v37_v44, %v45_v45  ;;  %v53_v56 = vld [vmem:[%s4962_s0 + $0x100] sm:$0xff]  ;;  %v54_v58 = vld [vmem:[%s4962_s0 + $0x108] sm:$0xff]  ;;  %v3748_v12 = vld [vmem:[%s4961_s1 + $0x1d8] sm:$0xff]  }
  0x14   :  { %3199 = vmatpush3.bf16.msra.mxu0 %v3720_v18  ;;  %v61_v57 = vld [vmem:[%s4962_s0 + $0x140] sm:$0xff]  ;;  %v62_v59 = vld [vmem:[%s4962_s0 + $0x148] sm:$0xff]  ;;  %v3749_v13 = vld [vmem:[%s4961_s1 + $0x198] sm:$0xff]  }
  0x15   :  { %3263 = vmatpush3.bf16.msra.mxu1 %v3721_v19  ;;  %3200 = vmatprep.subr.bf16.mxu0 %v3722_v20  ;;  %v2887_v60 = vcombine.high %v53_v56, %v61_v57  ;;  %v2889_v61 = vcombine.high %v54_v58, %v62_v59  ;;  %v2886_v2 = vcombine.low %v53_v56, %v61_v57  ;;  %v69_v3 = vld [vmem:[%s4962_s0 + $0x180] sm:$0xff]  ;;  %v70_v5 = vld [vmem:[%s4962_s0 + $0x188] sm:$0xff]  ;;  %v3759_v39 = vld [vmem:[%s4961_s1 + $0x130] sm:$0xff]  }
  0x16   :  { %3264 = vmatprep.subr.bf16.mxu1 %v3723_v21  ;;  %v77_v4 = vld [vmem:[%s4962_s0 + $0x1c0] sm:$0xff]  ;;  %v2888_v6 = vcombine.low %v54_v58, %v62_v59  ;;  %v78_v8 = vld [vmem:[%s4962_s0 + $0x1c8] sm:$0xff]  ;;  %v3763_v48 = vld [vmem:[%s4961_s1 + $0x138] sm:$0xff]  }
  0x17   :  { %v2903_v7 = vcombine.high %v69_v3, %v77_v4  ;;  %v2905_v9 = vcombine.high %v70_v5, %v78_v8  ;;  %v85_v14 = vld [vmem:[%s4962_s0 + $0x200] sm:$0xff]  ;;  %v86_v16 = vld [vmem:[%s4962_s0 + $0x208] sm:$0xff]  ;;  %v2902_v19 = vcombine.low %v69_v3, %v77_v4  ;;  %v2904_v21 = vcombine.low %v70_v5, %v78_v8  ;;  %v32_v3 = vld [vmem:[%s4962_s0 + $0x58] sm:$0xff] }
  0x18   :  { %3201 = vmatpush3.bf16.msra.mxu0 %v3724_v22  ;;  %v93_v15 = vld [vmem:[%s4962_s0 + $0x240] sm:$0xff]  ;;  %v94_v17 = vld [vmem:[%s4962_s0 + $0x248] sm:$0xff]  ;;  %v39_v8 = vld [vmem:[%s4962_s0 + $0x90] sm:$0xff] }
  0x19   :  { %3265 = vmatpush3.bf16.msra.mxu1 %v3725_v23  ;;  %3202 = vmatprep.subr.bf16.mxu0 %v3726_v24  ;;  %v3750_v18 = vld [vmem:[%s4961_s1 + $0x160] sm:$0xff]   ;;  %v2919_v22 = vcombine.high %v85_v14, %v93_v15  ;;  %v2921_v24 = vcombine.high %v86_v16, %v94_v17  ;;  %v3756_v32 = vld [vmem:[%s4961_s1 + $0x1e8] sm:$0xff]   ;;  %v2918_v34 = vcombine.low %v85_v14, %v93_v15 }
  0x1a   :  { %3266 = vmatprep.subr.bf16.mxu1 %v3727_v25  ;;  %v3751_v20 = vld [vmem:[%s4961_s1 + $0x120] sm:$0xff]   ;;  %v3757_v33 = vld [vmem:[%s4961_s1 + $0x1a8] sm:$0xff]  }
  0x1b   :  { %v3752_v23 = vld [vmem:[%s4961_s1 + $0x1e0] sm:$0xff]   ;;  %v118_v44 = vld [vmem:[%s4962_s0 + $0x308] sm:$0xff] }
  0x1c   :  { %3203 = vmatpush3.bf16.msra.mxu0 %v3728_v26  ;;  %v3753_v25 = vld [vmem:[%s4961_s1 + $0x1a0] sm:$0xff]   ;;  %v126_v45 = vld [vmem:[%s4962_s0 + $0x348] sm:$0xff] }
  0x1d   :  { %3267 = vmatpush3.bf16.msra.mxu1 %v3729_v27  ;;  %3204 = vmatprep.subr.bf16.mxu0 %v3730_v28  ;;  %v101_v26 = vld [vmem:[%s4962_s0 + $0x280] sm:$0xff]  ;;  %v3754_v28 = vld [vmem:[%s4961_s1 + $0x168] sm:$0xff]  }
  0x1e   :  { %3268 = vmatprep.subr.bf16.mxu1 %v3731_v29  ;;  %v109_v27 = vld [vmem:[%s4962_s0 + $0x2c0] sm:$0xff]  ;;  %v102_v29 = vld [vmem:[%s4962_s0 + $0x288] sm:$0xff] }
  0x1f   :  { %v2935_v36 = vcombine.high %v101_v26, %v109_v27  ;;  %v2934_v47 = vcombine.low %v101_v26, %v109_v27  ;;  %v3766_v56 = vld [vmem:[%s4961_s1 + $0x240] sm:$0xff]   ;;  %v134_v57 = vld [vmem:[%s4962_s0 + $0x388] sm:$0xff]  ;;  %v3774_v26 = vld [vmem:[%s4961_s1 + $0x250] sm:$0xff]  }
  0x20   :  { %3205 = vmatpush3.bf16.msra.mxu0 %v3732_v30  ;;  %v110_v30 = vld [vmem:[%s4962_s0 + $0x2c8] sm:$0xff]  ;;  %v3768_v58 = vld [vmem:[%s4961_s1 + $0x2c0] sm:$0xff]   ;;  %v3776_v27 = vld [vmem:[%s4961_s1 + $0x2d0] sm:$0xff]  }
  0x21   :  { %3269 = vmatpush3.bf16.msra.mxu1 %v3733_v31  ;;  %3318 = vmatprep.subr.bf16.mxu0 %v3734_v40  ;;  %v3755_v31 = vld [vmem:[%s4961_s1 + $0x128] sm:$0xff]   ;;  %v2937_v37 = vcombine.high %v102_v29, %v110_v30  ;;  %v3760_v40 = vld [vmem:[%s4961_s1 + $0x1f0] sm:$0xff]   ;;  %v3769_v15 = vld [vmem:[%s4961_s1 + $0x280] sm:$0xff]  }
  0x22   :  { %3382 = vmatprep.subr.bf16.mxu1 %v3736_v42  ;;  %v125_v42 = vld [vmem:[%s4962_s0 + $0x340] sm:$0xff]  ;;  %v142_v59 = vld [vmem:[%s4962_s0 + $0x3c8] sm:$0xff] }
  0x23   :  { %1853 = vmatmul.mubr.bf16.vlgmr.msra.gmra.mrb[0].mxu0 %v2854_v35  ;;  %v2920_v35 = vcombine.low %v86_v16, %v94_v17  ;;  %v2968_v5 = vcombine.low %v134_v57, %v142_v59  ;;  %v3770_v17 = vld [vmem:[%s4961_s1 + $0x248] sm:$0xff]  }
  0x24   :  { %1950 = vmatmul.mubr.bf16.vlgmr.msra.gmra.mrb[0].mxu1 %v2856_v38  ;;  %3319 = vmatpush3.bf16.msra.mxu0 %v3735_v41  ;;  %v3758_v38 = vld [vmem:[%s4961_s1 + $0x170] sm:$0xff]   ;;  %v117_v41 = vld [vmem:[%s4962_s0 + $0x300] sm:$0xff] }
  0x25   :  { %3383 = vmatpush3.bf16.msra.mxu1 %v3737_v43  ;;  %1860 = vmatprep.mubr.bf16.mxu0 %v2871_v46  ;;  %v3761_v43 = vld [vmem:[%s4961_s1 + $0x1b0] sm:$0xff]   ;;  %v3762_v46 = vld [vmem:[%s4961_s1 + $0x178] sm:$0xff]  }
  0x26   :  { %1957 = vmatprep.mubr.bf16.mxu1 %v2873_v49  ;;  %3320 = vmatprep.subr.bf16.mxu0 %v3738_v50  ;;  %v2936_v49 = vcombine.low %v102_v29, %v110_v30  ;;  %v2951_v50 = vcombine.high %v117_v41, %v125_v42 }
  0x27   :  { %3384 = vmatprep.subr.bf16.mxu1 %v3740_v54  ;;  %v133_v54 = vld [vmem:[%s4962_s0 + $0x380] sm:$0xff] }
  0x28   :  { %3321 = vmatpush3.bf16.msra.mxu0 %v3739_v52  ;;  %v2953_v52 = vcombine.high %v118_v44, %v126_v45 }
  0x29   :  { %3385 = vmatpush3.bf16.msra.mxu1 %v3741_v55  ;;  %3322 = vmatprep.subr.bf16.mxu0 %v3742_v62  ;;  %v141_v55 = vld [vmem:[%s4962_s0 + $0x3c0] sm:$0xff] }
  0x2a   :  { %3386 = vmatprep.subr.bf16.mxu1 %v3744_v0  ;;  %v2967_v62 = vcombine.high %v133_v54, %v141_v55  ;;  %v23_v0 = vld [vmem:[%s4962_s0 + $0x10] sm:$0xff]  ;;  %v2966_v4 = vcombine.low %v133_v54, %v141_v55  ;;  %v88_v54 = vld [vmem:[%s4962_s0 + $0x218] sm:$0xff] }
  0x2b   :  { %1861 = vmatmul.mubr.bf16.gmra.mrb[4].mxu0 %v2870_v51  ;;  %v3764_v51 = vld [vmem:[%s4961_s1 + $0x1f8] sm:$0xff]  }
  0x2c   :  { %1958 = vmatmul.mubr.bf16.gmra.mrb[4].mxu1 %v2872_v53  ;;  %1868 = vmatprep.mubr.bf16.mxu0 %v2887_v60  ;;  %v3765_v53 = vld [vmem:[%s4961_s1 + $0x1b8] sm:$0xff]   ;;  %v2950_v60 = vcombine.low %v117_v41, %v125_v42  ;;  %v3782_v42 = vld [vmem:[%s4961_s1 + $0x260] sm:$0xff]  }
  0x2d   :  { %1965 = vmatprep.mubr.bf16.mxu1 %v2889_v61  ;;  %3323 = vmatpush3.bf16.msra.mxu0 %v3743_v63  ;;  %v2952_v61 = vcombine.low %v118_v44, %v126_v45  ;;  %v2969_v63 = vcombine.high %v134_v57, %v142_v59  ;;  %v3781_v41 = vld [vmem:[%s4961_s1 + $0x298] sm:$0xff]   ;;  %v3784_v44 = vld [vmem:[%s4961_s1 + $0x2e0] sm:$0xff]   ;;  %v3789_v57 = vld [vmem:[%s4961_s1 + $0x2a8] sm:$0xff]  }
  0x2e   :  { %3387 = vmatpush3.bf16.msra.mxu1 %v3745_v1  ;;  %3324 = vmatprep.subr.bf16.mxu0 %v3746_v10  ;;  %v31_v1 = vld [vmem:[%s4962_s0 + $0x50] sm:$0xff]  ;;  %v96_v55 = vld [vmem:[%s4962_s0 + $0x258] sm:$0xff] }
  0x2f   :  { %3388 = vmatprep.subr.bf16.mxu1 %v3748_v12  ;;  %v2858_v10 = vcombine.low %v23_v0, %v31_v1  ;;  %v40_v12 = vld [vmem:[%s4962_s0 + $0x98] sm:$0xff] }
  0x31   :  { %3325 = vmatpush3.bf16.msra.mxu0 %v3747_v11  ;;  %v3767_v11 = vld [vmem:[%s4961_s1 + $0x200] sm:$0xff]  }
  0x32   :  { %3389 = vmatpush3.bf16.msra.mxu1 %v3749_v13  ;;  %3326 = vmatprep.subr.bf16.mxu0 %v3750_v18  ;;  %v48_v13 = vld [vmem:[%s4962_s0 + $0xd8] sm:$0xff] }
  0x33   :  { %1869 = vmatmul.mubr.bf16.gmra.mrb[8].mxu0 %v2886_v2  ;;  %3390 = vmatprep.subr.bf16.mxu1 %v3752_v23  ;;  %v24_v2 = vld [vmem:[%s4962_s0 + $0x18] sm:$0xff]  ;;  %v2877_v18 = vcombine.high %v40_v12, %v48_v13  ;;  %v63_v23 = vld [vmem:[%s4962_s0 + $0x150] sm:$0xff]  ;;  %v2876_v29 = vcombine.low %v40_v12, %v48_v13  ;;  %v3800_v12 = vld [vmem:[%s4961_s1 + $0x3c0] sm:$0xff]   ;;  %v2924_v13 = vcombine.low %v88_v54, %v96_v55 }
  0x34   :  { %1966 = vmatmul.mubr.bf16.gmra.mrb[8].mxu1 %v2888_v6  ;;  %1876 = vmatprep.mubr.bf16.mxu0 %v2903_v7  ;;  %v2859_v6 = vcombine.high %v23_v0, %v31_v1  ;;  %v2861_v7 = vcombine.high %v24_v2, %v32_v3  ;;  %v2860_v14 = vcombine.low %v24_v2, %v32_v3  ;;  %v3791_v0 = vld [vmem:[%s4961_s1 + $0x230] sm:$0xff]   ;;  %v3794_v2 = vld [vmem:[%s4961_s1 + $0x278] sm:$0xff]  }
  0x35   :  { %1973 = vmatprep.mubr.bf16.mxu1 %v2905_v9  ;;  %3327 = vmatpush3.bf16.msra.mxu0 %v3751_v20  ;;  %v47_v9 = vld [vmem:[%s4962_s0 + $0xd0] sm:$0xff]  ;;  %v3772_v20 = vld [vmem:[%s4961_s1 + $0x2c8] sm:$0xff]  }
  0x36   :  { %3391 = vmatpush3.bf16.msra.mxu1 %v3753_v25  ;;  %3328 = vmatprep.subr.bf16.mxu0 %v3754_v28  ;;  %v2875_v16 = vcombine.high %v39_v8, %v47_v9  ;;  %v64_v25 = vld [vmem:[%s4962_s0 + $0x158] sm:$0xff]  ;;  %v2874_v28 = vcombine.low %v39_v8, %v47_v9  ;;  %v3793_v1 = vld [vmem:[%s4961_s1 + $0x2b0] sm:$0xff]  }
  0x37   :  { %3392 = vmatprep.subr.bf16.mxu1 %v3756_v32  ;;  %v3775_v32 = vld [vmem:[%s4961_s1 + $0x210] sm:$0xff]   ;;  %v3795_v8 = vld [vmem:[%s4961_s1 + $0x238] sm:$0xff]  }
  0x38   :  { %v103_v3 = vld [vmem:[%s4962_s0 + $0x290] sm:$0xff]  ;;  %v3797_v9 = vld [vmem:[%s4961_s1 + $0x2b8] sm:$0xff]  }
  0x39   :  { %3329 = vmatpush3.bf16.msra.mxu0 %v3755_v31 }
  0x3a   :  { %3393 = vmatpush3.bf16.msra.mxu1 %v3757_v33  ;;  %3330 = vmatprep.subr.bf16.mxu0 %v3758_v38  ;;  %v3777_v33 = vld [vmem:[%s4961_s1 + $0x290] sm:$0xff]   ;;  %v72_v38 = vld [vmem:[%s4962_s0 + $0x198] sm:$0xff] }
  0x3b   :  { %1877 = vmatmul.mubr.bf16.gmra.mrb[12].mxu0 %v2902_v19  ;;  %3394 = vmatprep.subr.bf16.mxu1 %v3760_v40  ;;  %v3771_v19 = vld [vmem:[%s4961_s1 + $0x208] sm:$0xff]   ;;  %v3779_v40 = vld [vmem:[%s4961_s1 + $0x218] sm:$0xff]  }
  0x3c   :  { %1974 = vmatmul.mubr.bf16.gmra.mrb[12].mxu1 %v2904_v21  ;;  %1884 = vmatprep.mubr.bf16.mxu0 %v2919_v22  ;;  %v3773_v21 = vld [vmem:[%s4961_s1 + $0x288] sm:$0xff]   ;;  %v55_v22 = vld [vmem:[%s4962_s0 + $0x110] sm:$0xff] }
  0x3d   :  { %1981 = vmatprep.mubr.bf16.mxu1 %v2921_v24  ;;  %3331 = vmatpush3.bf16.msra.mxu0 %v3759_v39  ;;  %v56_v24 = vld [vmem:[%s4962_s0 + $0x118] sm:$0xff]  ;;  %v2891_v30 = vcombine.high %v55_v22, %v63_v23 }
  0x3e   :  { %3395 = vmatpush3.bf16.msra.mxu1 %v3761_v43  ;;  %3332 = vmatprep.subr.bf16.mxu0 %v3762_v46  ;;  %v2893_v31 = vcombine.high %v56_v24, %v64_v25  ;;  %v80_v39 = vld [vmem:[%s4962_s0 + $0x1d8] sm:$0xff]  ;;  %v2890_v43 = vcombine.low %v55_v22, %v63_v23  ;;  %v2892_v45 = vcombine.low %v56_v24, %v64_v25  ;;  %v135_v24 = vld [vmem:[%s4962_s0 + $0x390] sm:$0xff] }
  0x3f   :  { %3396 = vmatprep.subr.bf16.mxu1 %v3764_v51  ;;  %v87_v51 = vld [vmem:[%s4962_s0 + $0x210] sm:$0xff] }
  0x40   :  { %v143_v25 = vld [vmem:[%s4962_s0 + $0x3d0] sm:$0xff] }
  0x41   :  { %3333 = vmatpush3.bf16.msra.mxu0 %v3763_v48  ;;  %v2909_v48 = vcombine.high %v72_v38, %v80_v39 }
  0x42   :  { %3397 = vmatpush3.bf16.msra.mxu1 %v3765_v53  ;;  %3446 = vmatprep.subr.bf16.mxu0 %v3766_v56  ;;  %v95_v53 = vld [vmem:[%s4962_s0 + $0x250] sm:$0xff]  ;;  %v3787_v56 = vld [vmem:[%s4961_s1 + $0x228] sm:$0xff]  }
  0x43   :  { %1885 = vmatmul.mubr.bf16.gmra.mrb[16].mxu0 %v2918_v34  ;;  %3510 = vmatprep.subr.bf16.mxu1 %v3768_v58  ;;  %v3778_v34 = vld [vmem:[%s4961_s1 + $0x258] sm:$0xff]   ;;  %v3790_v58 = vld [vmem:[%s4961_s1 + $0x270] sm:$0xff]  }
  0x44   :  { %1982 = vmatmul.mubr.bf16.gmra.mrb[16].mxu1 %v2920_v35  ;;  %1892 = vmatprep.mubr.bf16.mxu0 %v2935_v36  ;;  %v71_v35 = vld [vmem:[%s4962_s0 + $0x190] sm:$0xff] }
  0x45   :  { %1989 = vmatprep.mubr.bf16.mxu1 %v2937_v37  ;;  %v79_v36 = vld [vmem:[%s4962_s0 + $0x1d0] sm:$0xff]  ;;  %v3780_v37 = vld [vmem:[%s4961_s1 + $0x2d8] sm:$0xff]  }
  0x46   :  { %v2907_v46 = vcombine.high %v71_v35, %v79_v36  ;;  %v2906_v59 = vcombine.low %v71_v35, %v79_v36  ;;  %v34_v35 = vld [vmem:[%s4962_s0 + $0x68] sm:$0xff]  ;;  %v2970_v36 = vcombine.low %v135_v24, %v143_v25 }
  0x4b   :  { %1893 = vmatmul.mubr.bf16.gmra.mrb[20].mxu0 %v2934_v47  ;;  %v3783_v47 = vld [vmem:[%s4961_s1 + $0x220] sm:$0xff]  }
  0x4c   :  { %1990 = vmatmul.mubr.bf16.gmra.mrb[20].mxu1 %v2936_v49  ;;  %1900 = vmatprep.mubr.bf16.mxu0 %v2951_v50  ;;  %v3785_v49 = vld [vmem:[%s4961_s1 + $0x2a0] sm:$0xff]   ;;  %v3786_v50 = vld [vmem:[%s4961_s1 + $0x268] sm:$0xff]  }
  0x4d   :  { %1997 = vmatprep.mubr.bf16.mxu1 %v2953_v52  ;;  %v3788_v52 = vld [vmem:[%s4961_s1 + $0x2e8] sm:$0xff]  }
  0x53   :  { %1901 = vmatmul.mubr.bf16.gmra.mrb[24].mxu0 %v2950_v60  ;;  %v3792_v60 = vld [vmem:[%s4961_s1 + $0x2f0] sm:$0xff]  }
  0x54   :  { %1998 = vmatmul.mubr.bf16.gmra.mrb[24].mxu1 %v2952_v61  ;;  %1908 = vmatprep.mubr.bf16.mxu0 %v2967_v62  ;;  %v2908_v61 = vcombine.low %v72_v38, %v80_v39  ;;  %v2923_v62 = vcombine.high %v87_v51, %v95_v53 }
  0x55   :  { %2005 = vmatprep.mubr.bf16.mxu1 %v2969_v63  ;;  %v2925_v63 = vcombine.high %v88_v54, %v96_v55  ;;  %v57_v54 = vld [vmem:[%s4962_s0 + $0x120] sm:$0xff] }
  0x56   :  { %v65_v55 = vld [vmem:[%s4962_s0 + $0x160] sm:$0xff] }
  0x5b   :  { %1909 = vmatmul.mubr.bf16.gmra.mrb[28].mxu0 %v2966_v4  ;;  %v111_v4 = vld [vmem:[%s4962_s0 + $0x2d0] sm:$0xff] }
  0x5c   :  { %2006 = vmatmul.mubr.bf16.gmra.mrb[28].mxu1 %v2968_v5  ;;  %2046 = vmatprep.mubr.bf16.mxu0 %v2859_v6  ;;  %v3796_v5 = vld [vmem:[%s4961_s1 + $0x2f8] sm:$0xff]  }
  0x5d   :  { %2143 = vmatprep.mubr.bf16.mxu1 %v2861_v7  ;;  %v104_v6 = vld [vmem:[%s4962_s0 + $0x298] sm:$0xff] }
  0x5e   :  { %v112_v7 = vld [vmem:[%s4962_s0 + $0x2d8] sm:$0xff] }
  0x63   :  { %2047 = vmatmul.mubr.bf16.vlgmr.msra.gmra.mrb[32].mxu0 %v2858_v10  ;;  %v3798_v10 = vld [vmem:[%s4961_s1 + $0x340] sm:$0xff]  }
  0x64   :  { %2144 = vmatmul.mubr.bf16.vlgmr.msra.gmra.mrb[32].mxu1 %v2860_v14  ;;  %3447 = vmatpush3.bf16.msra.mxu0 %v3767_v11  ;;  %v2922_v11 = vcombine.low %v87_v51, %v95_v53  ;;  %v2939_v14 = vcombine.high %v103_v3, %v111_v4  ;;  %v3804_v51 = vld [vmem:[%s4961_s1 + $0x3c8] sm:$0xff]  }
  0x65   :  { %3511 = vmatpush3.bf16.msra.mxu1 %v3769_v15  ;;  %2054 = vmatprep.mubr.bf16.mxu0 %v2875_v16  ;;  %v2941_v15 = vcombine.high %v104_v6, %v112_v7  ;;  %v119_v16 = vld [vmem:[%s4962_s0 + $0x310] sm:$0xff]  ;;  %v3805_v53 = vld [vmem:[%s4961_s1 + $0x388] sm:$0xff]  }
  0x66   :  { %2151 = vmatprep.mubr.bf16.mxu1 %v2877_v18  ;;  %3448 = vmatprep.subr.bf16.mxu0 %v3770_v17  ;;  %v127_v17 = vld [vmem:[%s4962_s0 + $0x350] sm:$0xff]  ;;  %v120_v18 = vld [vmem:[%s4962_s0 + $0x318] sm:$0xff] }
  0x67   :  { %3512 = vmatprep.subr.bf16.mxu1 %v3772_v20  ;;  %v2938_v20 = vcombine.low %v103_v3, %v111_v4  ;;  %v2955_v22 = vcombine.high %v119_v16, %v127_v17  ;;  %v3812_v3 = vld [vmem:[%s4961_s1 + $0x3d8] sm:$0xff]   ;;  %v73_v4 = vld [vmem:[%s4962_s0 + $0x1a0] sm:$0xff] }
  0x68   :  { %3449 = vmatpush3.bf16.msra.mxu0 %v3771_v19  ;;  %v128_v19 = vld [vmem:[%s4962_s0 + $0x358] sm:$0xff] }
  0x69   :  { %3513 = vmatpush3.bf16.msra.mxu1 %v3773_v21  ;;  %3450 = vmatprep.subr.bf16.mxu0 %v3774_v26  ;;  %v2940_v21 = vcombine.low %v104_v6, %v112_v7  ;;  %v2957_v23 = vcombine.high %v120_v18, %v128_v19  ;;  %v136_v26 = vld [vmem:[%s4962_s0 + $0x398] sm:$0xff]  ;;  %v74_v6 = vld [vmem:[%s4962_s0 + $0x1a8] sm:$0xff] }
  0x6a   :  { %3514 = vmatprep.subr.bf16.mxu1 %v3776_v27  ;;  %v144_v27 = vld [vmem:[%s4962_s0 + $0x3d8] sm:$0xff] }
  0x6b   :  { %2055 = vmatmul.mubr.bf16.gmra.mrb[36].mxu0 %v2874_v28  ;;  %v2954_v28 = vcombine.low %v119_v16, %v127_v17  ;;  %v3811_v7 = vld [vmem:[%s4961_s1 + $0x318] sm:$0xff]   ;;  %v3815_v16 = vld [vmem:[%s4961_s1 + $0x320] sm:$0xff]  }
  0x6c   :  { %2152 = vmatmul.mubr.bf16.gmra.mrb[36].mxu1 %v2876_v29  ;;  %2062 = vmatprep.mubr.bf16.mxu0 %v2891_v30  ;;  %v2956_v29 = vcombine.low %v120_v18, %v128_v19  ;;  %v2971_v30 = vcombine.high %v135_v24, %v143_v25  ;;  %v3817_v17 = vld [vmem:[%s4961_s1 + $0x3a0] sm:$0xff]   ;;  %v3818_v18 = vld [vmem:[%s4961_s1 + $0x368] sm:$0xff]  }
  0x6d   :  { %2159 = vmatprep.mubr.bf16.mxu1 %v2893_v31  ;;  %3451 = vmatpush3.bf16.msra.mxu0 %v3775_v32  ;;  %v2973_v31 = vcombine.high %v136_v26, %v144_v27  ;;  %v25_v32 = vld [vmem:[%s4962_s0 + $0x20] sm:$0xff]  ;;  %v3820_v19 = vld [vmem:[%s4961_s1 + $0x3e8] sm:$0xff]  }
  0x6e   :  { %3515 = vmatpush3.bf16.msra.mxu1 %v3777_v33  ;;  %3452 = vmatprep.subr.bf16.mxu0 %v3778_v34  ;;  %v33_v33 = vld [vmem:[%s4962_s0 + $0x60] sm:$0xff]  ;;  %v26_v34 = vld [vmem:[%s4962_s0 + $0x28] sm:$0xff] }
  0x6f   :  { %3516 = vmatprep.subr.bf16.mxu1 %v3780_v37  ;;  %v2972_v37 = vcombine.low %v136_v26, %v144_v27  ;;  %v2863_v38 = vcombine.high %v25_v32, %v33_v33  ;;  %v2865_v39 = vcombine.high %v26_v34, %v34_v35  ;;  %v98_v24 = vld [vmem:[%s4962_s0 + $0x268] sm:$0xff]  ;;  %v3822_v26 = vld [vmem:[%s4961_s1 + $0x370] sm:$0xff]  }
  0x70   :  { %v3821_v25 = vld [vmem:[%s4961_s1 + $0x3a8] sm:$0xff]  }
  0x71   :  { %3453 = vmatpush3.bf16.msra.mxu0 %v3779_v40  ;;  %v41_v40 = vld [vmem:[%s4962_s0 + $0xa0] sm:$0xff] }
  0x72   :  { %3517 = vmatpush3.bf16.msra.mxu1 %v3781_v41  ;;  %3454 = vmatprep.subr.bf16.mxu0 %v3782_v42  ;;  %v49_v41 = vld [vmem:[%s4962_s0 + $0xe0] sm:$0xff]  ;;  %v2862_v42 = vcombine.low %v25_v32, %v33_v33  ;;  %v3823_v32 = vld [vmem:[%s4961_s1 + $0x330] sm:$0xff]  }
  0x73   :  { %2063 = vmatmul.mubr.bf16.gmra.mrb[40].mxu0 %v2890_v43  ;;  %3518 = vmatprep.subr.bf16.mxu1 %v3784_v44  ;;  %v42_v43 = vld [vmem:[%s4962_s0 + $0xa8] sm:$0xff]  ;;  %v3825_v33 = vld [vmem:[%s4961_s1 + $0x3b0] sm:$0xff]  }
  0x74   :  { %2160 = vmatmul.mubr.bf16.gmra.mrb[40].mxu1 %v2892_v45  ;;  %2070 = vmatprep.mubr.bf16.mxu0 %v2907_v46  ;;  %v50_v44 = vld [vmem:[%s4962_s0 + $0xe8] sm:$0xff]  ;;  %v2864_v45 = vcombine.low %v26_v34, %v34_v35  ;;  %v3799_v46 = vld [vmem:[%s4961_s1 + $0x300] sm:$0xff]   ;;  %v3826_v34 = vld [vmem:[%s4961_s1 + $0x378] sm:$0xff]  }
  0x75   :  { %2167 = vmatprep.mubr.bf16.mxu1 %v2909_v48  ;;  %3455 = vmatpush3.bf16.msra.mxu0 %v3783_v47  ;;  %v3801_v47 = vld [vmem:[%s4961_s1 + $0x380] sm:$0xff]   ;;  %v2879_v48 = vcombine.high %v41_v40, %v49_v41  ;;  %v3828_v35 = vld [vmem:[%s4961_s1 + $0x3f8] sm:$0xff]  }
  0x76   :  { %3519 = vmatpush3.bf16.msra.mxu1 %v3785_v49  ;;  %3456 = vmatprep.subr.bf16.mxu0 %v3786_v50  ;;  %v2881_v49 = vcombine.high %v42_v43, %v50_v44  ;;  %v3802_v50 = vld [vmem:[%s4961_s1 + $0x348] sm:$0xff]  }
  0x77   :  { %3520 = vmatprep.subr.bf16.mxu1 %v3788_v52  ;;  %v3803_v52 = vld [vmem:[%s4961_s1 + $0x308] sm:$0xff]  }
  0x79   :  { %3457 = vmatpush3.bf16.msra.mxu0 %v3787_v56  ;;  %v3806_v56 = vld [vmem:[%s4961_s1 + $0x350] sm:$0xff]  }
  0x7a   :  { %3521 = vmatpush3.bf16.msra.mxu1 %v3789_v57  ;;  %3458 = vmatprep.subr.bf16.mxu0 %v3790_v58  ;;  %v58_v57 = vld [vmem:[%s4962_s0 + $0x128] sm:$0xff] }
  0x7b   :  { %2071 = vmatmul.mubr.bf16.gmra.mrb[44].mxu0 %v2906_v59  ;;  %3522 = vmatprep.subr.bf16.mxu1 %v3792_v60  ;;  %v66_v58 = vld [vmem:[%s4962_s0 + $0x168] sm:$0xff]  ;;  %v3808_v59 = vld [vmem:[%s4961_s1 + $0x3d0] sm:$0xff]   ;;  %v2878_v60 = vcombine.low %v41_v40, %v49_v41  ;;  %v3829_v41 = vld [vmem:[%s4961_s1 + $0x3b8] sm:$0xff]  }
  0x7c   :  { %2168 = vmatmul.mubr.bf16.gmra.mrb[44].mxu1 %v2908_v61  ;;  %2078 = vmatprep.mubr.bf16.mxu0 %v2923_v62  ;;  %v2880_v61 = vcombine.low %v42_v43, %v50_v44  ;;  %v2895_v62 = vcombine.high %v57_v54, %v65_v55  ;;  %v114_v40 = vld [vmem:[%s4962_s0 + $0x2e8] sm:$0xff] }
  0x7d   :  { %2175 = vmatprep.mubr.bf16.mxu1 %v2925_v63  ;;  %3459 = vmatpush3.bf16.msra.mxu0 %v3791_v0  ;;  %v2897_v63 = vcombine.high %v58_v57, %v66_v58  ;;  %v3807_v0 = vld [vmem:[%s4961_s1 + $0x310] sm:$0xff]  }
  0x7e   :  { %3523 = vmatpush3.bf16.msra.mxu1 %v3793_v1  ;;  %3460 = vmatprep.subr.bf16.mxu0 %v3794_v2  ;;  %v3809_v1 = vld [vmem:[%s4961_s1 + $0x390] sm:$0xff]   ;;  %v3810_v2 = vld [vmem:[%s4961_s1 + $0x358] sm:$0xff]  }
  0x7f   :  { %3524 = vmatprep.subr.bf16.mxu1 %v3796_v5  ;;  %v81_v5 = vld [vmem:[%s4962_s0 + $0x1e0] sm:$0xff] }
  0x80   :  { %v2910_v27 = vcombine.low %v73_v4, %v81_v5 }
  0x81   :  { %3461 = vmatpush3.bf16.msra.mxu0 %v3795_v8  ;;  %v82_v8 = vld [vmem:[%s4962_s0 + $0x1e8] sm:$0xff] }
  0x82   :  { %3525 = vmatpush3.bf16.msra.mxu1 %v3797_v9  ;;  %3574 = vmatprep.subr.bf16.mxu0 %v3798_v10  ;;  %v3813_v9 = vld [vmem:[%s4961_s1 + $0x398] sm:$0xff]   ;;  %v3814_v10 = vld [vmem:[%s4961_s1 + $0x360] sm:$0xff]  }
  0x83   :  { %2079 = vmatmul.mubr.bf16.gmra.mrb[48].mxu0 %v2922_v11  ;;  %3638 = vmatprep.subr.bf16.mxu1 %v3800_v12  ;;  %v2894_v11 = vcombine.low %v57_v54, %v65_v55  ;;  %v3816_v12 = vld [vmem:[%s4961_s1 + $0x3e0] sm:$0xff]  }
  0x84   :  { %2176 = vmatmul.mubr.bf16.gmra.mrb[48].mxu1 %v2924_v13  ;;  %2086 = vmatprep.mubr.bf16.mxu0 %v2939_v14  ;;  %v2896_v13 = vcombine.low %v58_v57, %v66_v58  ;;  %v2911_v14 = vcombine.high %v73_v4, %v81_v5  ;;  %v137_v54 = vld [vmem:[%s4962_s0 + $0x3a0] sm:$0xff]  ;;  %v146_v57 = vld [vmem:[%s4962_s0 + $0x3e8] sm:$0xff] }
  0x85   :  { %2183 = vmatprep.mubr.bf16.mxu1 %v2941_v15  ;;  %v2913_v15 = vcombine.high %v74_v6, %v82_v8  ;;  %v145_v55 = vld [vmem:[%s4962_s0 + $0x3e0] sm:$0xff] }
  0x8b   :  { %2087 = vmatmul.mubr.bf16.gmra.mrb[52].mxu0 %v2938_v20  ;;  %v89_v20 = vld [vmem:[%s4962_s0 + $0x220] sm:$0xff] }
  0x8c   :  { %2184 = vmatmul.mubr.bf16.gmra.mrb[52].mxu1 %v2940_v21  ;;  %2094 = vmatprep.mubr.bf16.mxu0 %v2955_v22  ;;  %v97_v21 = vld [vmem:[%s4962_s0 + $0x260] sm:$0xff]  ;;  %v90_v22 = vld [vmem:[%s4962_s0 + $0x228] sm:$0xff] }
  0x8d   :  { %2191 = vmatprep.mubr.bf16.mxu1 %v2957_v23  ;;  %v3819_v23 = vld [vmem:[%s4961_s1 + $0x328] sm:$0xff]   ;;  %v2928_v43 = vcombine.low %v90_v22, %v98_v24 }
  0x93   :  { %2095 = vmatmul.mubr.bf16.gmra.mrb[56].mxu0 %v2954_v28  ;;  %v3824_v28 = vld [vmem:[%s4961_s1 + $0x3f0] sm:$0xff]  }
  0x94   :  { %2192 = vmatmul.mubr.bf16.gmra.mrb[56].mxu1 %v2956_v29  ;;  %2102 = vmatprep.mubr.bf16.mxu0 %v2971_v30  ;;  %v2912_v29 = vcombine.low %v74_v6, %v82_v8  ;;  %v2927_v30 = vcombine.high %v89_v20, %v97_v21  ;;  %v43_v6 = vld [vmem:[%s4962_s0 + $0xb0] sm:$0xff]  ;;  %v44_v8 = vld [vmem:[%s4962_s0 + $0xb8] sm:$0xff] }
  0x95   :  { %2199 = vmatprep.mubr.bf16.mxu1 %v2973_v31  ;;  %v2929_v31 = vcombine.high %v90_v22, %v98_v24  ;;  %v75_v22 = vld [vmem:[%s4962_s0 + $0x1b0] sm:$0xff]  ;;  %v76_v24 = vld [vmem:[%s4962_s0 + $0x1b8] sm:$0xff] }
  0x9b   :  { %2103 = vmatmul.mubr.bf16.gmra.mrb[60].mxu0 %v2970_v36  ;;  %v105_v36 = vld [vmem:[%s4962_s0 + $0x2a0] sm:$0xff] }
  0x9c   :  { %2200 = vmatmul.mubr.bf16.gmra.mrb[60].mxu1 %v2972_v37  ;;  %2240 = vmatprep.mubr.bf16.mxu0 %v2863_v38  ;;  %v113_v37 = vld [vmem:[%s4962_s0 + $0x2e0] sm:$0xff]  ;;  %v3827_v38 = vld [vmem:[%s4961_s1 + $0x338] sm:$0xff]  }
  0x9d   :  { %2337 = vmatprep.mubr.bf16.mxu1 %v2865_v39  ;;  %v106_v39 = vld [vmem:[%s4962_s0 + $0x2a8] sm:$0xff]  ;;  %v2943_v44 = vcombine.high %v105_v36, %v113_v37 }
  0xa3   :  { %2241 = vmatmul.mubr.bf16.vlgmr.msra.gmra.mrb[64].mxu0 %v2862_v42  ;;  %v2926_v42 = vcombine.low %v89_v20, %v97_v21 }
  0xa4   :  { %2338 = vmatmul.mubr.bf16.vlgmr.msra.gmra.mrb[64].mxu1 %v2864_v45  ;;  %3575 = vmatpush3.bf16.msra.mxu0 %v3799_v46  ;;  %v2945_v45 = vcombine.high %v106_v39, %v114_v40  ;;  %v121_v46 = vld [vmem:[%s4962_s0 + $0x320] sm:$0xff] }
  0xa5   :  { %3639 = vmatpush3.bf16.msra.mxu1 %v3801_v47  ;;  %2248 = vmatprep.mubr.bf16.mxu0 %v2879_v48  ;;  %v129_v47 = vld [vmem:[%s4962_s0 + $0x360] sm:$0xff]  ;;  %v122_v48 = vld [vmem:[%s4962_s0 + $0x328] sm:$0xff] }
  0xa6   :  { %2345 = vmatprep.mubr.bf16.mxu1 %v2881_v49  ;;  %3576 = vmatprep.subr.bf16.mxu0 %v3802_v50  ;;  %v130_v49 = vld [vmem:[%s4962_s0 + $0x368] sm:$0xff]  ;;  %v2942_v50 = vcombine.low %v105_v36, %v113_v37  ;;  %v2958_v58 = vcombine.low %v121_v46, %v129_v47  ;;  %v4597_v36 = vld [vmem:[%s4963_s2] ss:$0 sm:$0xff] }
  0xa7   :  { %3640 = vmatprep.subr.bf16.mxu1 %v3804_v51  ;;  %v2944_v51 = vcombine.low %v106_v39, %v114_v40 }
  0xa8   :  { %3577 = vmatpush3.bf16.msra.mxu0 %v3803_v52  ;;  %v2959_v52 = vcombine.high %v121_v46, %v129_v47 }
  0xa9   :  { %3641 = vmatpush3.bf16.msra.mxu1 %v3805_v53  ;;  %3578 = vmatprep.subr.bf16.mxu0 %v3806_v56  ;;  %v2961_v53 = vcombine.high %v122_v48, %v130_v49  ;;  %v138_v56 = vld [vmem:[%s4962_s0 + $0x3a8] sm:$0xff] }
  0xaa   :  { %3642 = vmatprep.subr.bf16.mxu1 %v3808_v59  ;;  %v2960_v59 = vcombine.low %v122_v48, %v130_v49 }
  0xab   :  { %2249 = vmatmul.mubr.bf16.gmra.mrb[68].mxu0 %v2878_v60  ;;  %v2975_v60 = vcombine.high %v137_v54, %v145_v55 }
  0xac   :  { %2346 = vmatmul.mubr.bf16.gmra.mrb[68].mxu1 %v2880_v61  ;;  %2256 = vmatprep.mubr.bf16.mxu0 %v2895_v62  ;;  %v2977_v61 = vcombine.high %v138_v56, %v146_v57  ;;  %v27_v62 = vld [vmem:[%s4962_s0 + $0x30] sm:$0xff] }
  0xad   :  { %2353 = vmatprep.mubr.bf16.mxu1 %v2897_v63  ;;  %3579 = vmatpush3.bf16.msra.mxu0 %v3807_v0  ;;  %v35_v63 = vld [vmem:[%s4962_s0 + $0x70] sm:$0xff]  ;;  %v28_v0 = vld [vmem:[%s4962_s0 + $0x38] sm:$0xff] }
  0xae   :  { %3643 = vmatpush3.bf16.msra.mxu1 %v3809_v1  ;;  %3580 = vmatprep.subr.bf16.mxu0 %v3810_v2  ;;  %v36_v1 = vld [vmem:[%s4962_s0 + $0x78] sm:$0xff]  ;;  %v2974_v2 = vcombine.low %v137_v54, %v145_v55  ;;  %v2867_v4 = vcombine.high %v27_v62, %v35_v63  ;;  %v107_v54 = vld [vmem:[%s4962_s0 + $0x2b0] sm:$0xff] }
  0xaf   :  { %3644 = vmatprep.subr.bf16.mxu1 %v3812_v3  ;;  %v2976_v3 = vcombine.low %v138_v56, %v146_v57  ;;  %v2869_v5 = vcombine.high %v28_v0, %v36_v1  ;;  %v115_v55 = vld [vmem:[%s4962_s0 + $0x2f0] sm:$0xff] }
  0xb1   :  { %3581 = vmatpush3.bf16.msra.mxu0 %v3811_v7  ;;  %v51_v7 = vld [vmem:[%s4962_s0 + $0xf0] sm:$0xff] }
  0xb2   :  { %3645 = vmatpush3.bf16.msra.mxu1 %v3813_v9  ;;  %3582 = vmatprep.subr.bf16.mxu0 %v3814_v10  ;;  %v52_v9 = vld [vmem:[%s4962_s0 + $0xf8] sm:$0xff]  ;;  %v2866_v10 = vcombine.low %v27_v62, %v35_v63 }
  0xb3   :  { %2257 = vmatmul.mubr.bf16.gmra.mrb[72].mxu0 %v2894_v11  ;;  %3646 = vmatprep.subr.bf16.mxu1 %v3816_v12  ;;  %v2868_v11 = vcombine.low %v28_v0, %v36_v1  ;;  %v2883_v12 = vcombine.high %v43_v6, %v51_v7 }
  0xb4   :  { %2354 = vmatmul.mubr.bf16.gmra.mrb[72].mxu1 %v2896_v13  ;;  %2264 = vmatprep.mubr.bf16.mxu0 %v2911_v14  ;;  %v2885_v13 = vcombine.high %v44_v8, %v52_v9  ;;  %v59_v14 = vld [vmem:[%s4962_s0 + $0x130] sm:$0xff] }
  0xb5   :  { %2361 = vmatprep.mubr.bf16.mxu1 %v2913_v15  ;;  %3583 = vmatpush3.bf16.msra.mxu0 %v3815_v16  ;;  %v67_v15 = vld [vmem:[%s4962_s0 + $0x170] sm:$0xff]  ;;  %v60_v16 = vld [vmem:[%s4962_s0 + $0x138] sm:$0xff] }
  0xb6   :  { %3647 = vmatpush3.bf16.msra.mxu1 %v3817_v17  ;;  %3584 = vmatprep.subr.bf16.mxu0 %v3818_v18  ;;  %v68_v17 = vld [vmem:[%s4962_s0 + $0x178] sm:$0xff]  ;;  %v2882_v18 = vcombine.low %v43_v6, %v51_v7  ;;  %v2899_v20 = vcombine.high %v59_v14, %v67_v15 }
  0xb7   :  { %3648 = vmatprep.subr.bf16.mxu1 %v3820_v19  ;;  %v2884_v19 = vcombine.low %v44_v8, %v52_v9  ;;  %v2901_v21 = vcombine.high %v60_v16, %v68_v17 }
  0xb9   :  { %3585 = vmatpush3.bf16.msra.mxu0 %v3819_v23  ;;  %v83_v23 = vld [vmem:[%s4962_s0 + $0x1f0] sm:$0xff] }
  0xba   :  { %3649 = vmatpush3.bf16.msra.mxu1 %v3821_v25  ;;  %3586 = vmatprep.subr.bf16.mxu0 %v3822_v26  ;;  %v84_v25 = vld [vmem:[%s4962_s0 + $0x1f8] sm:$0xff]  ;;  %v2898_v26 = vcombine.low %v59_v14, %v67_v15  ;;  %v123_v14 = vld [vmem:[%s4962_s0 + $0x330] sm:$0xff] }
  0xbb   :  { %2265 = vmatmul.mubr.bf16.gmra.mrb[76].mxu0 %v2910_v27  ;;  %3650 = vmatprep.subr.bf16.mxu1 %v3824_v28  ;;  %v2900_v27 = vcombine.low %v60_v16, %v68_v17  ;;  %v2915_v28 = vcombine.high %v75_v22, %v83_v23  ;;  %v131_v15 = vld [vmem:[%s4962_s0 + $0x370] sm:$0xff] }
  0xbc   :  { %2362 = vmatmul.mubr.bf16.gmra.mrb[76].mxu1 %v2912_v29  ;;  %2272 = vmatprep.mubr.bf16.mxu0 %v2927_v30  ;;  %v2917_v29 = vcombine.high %v76_v24, %v84_v25  ;;  %v91_v30 = vld [vmem:[%s4962_s0 + $0x230] sm:$0xff] }
  0xbd   :  { %2369 = vmatprep.mubr.bf16.mxu1 %v2929_v31  ;;  %3587 = vmatpush3.bf16.msra.mxu0 %v3823_v32  ;;  %v99_v31 = vld [vmem:[%s4962_s0 + $0x270] sm:$0xff] }
  0xbe   :  { %3651 = vmatpush3.bf16.msra.mxu1 %v3825_v33  ;;  %3588 = vmatprep.subr.bf16.mxu0 %v3826_v34  ;;  %v92_v33 = vld [vmem:[%s4962_s0 + $0x238] sm:$0xff]  ;;  %v2930_v62 = vcombine.low %v91_v30, %v99_v31 }
  0xbf   :  { %3652 = vmatprep.subr.bf16.mxu1 %v3828_v35  ;;  %v100_v34 = vld [vmem:[%s4962_s0 + $0x278] sm:$0xff] }
  0xc0   :  { %v2933_v47 = vcombine.high %v92_v33, %v100_v34 }
  0xc1   :  { %3589 = vmatpush3.bf16.msra.mxu0 %v3827_v38  ;;  %v2914_v38 = vcombine.low %v75_v22, %v83_v23  ;;  %v2946_v22 = vcombine.low %v107_v54, %v115_v55 }
  0xc2   :  { %3653 = vmatpush3.bf16.msra.mxu1 %v3829_v41 }
  0xc3   :  { %2273 = vmatmul.mubr.bf16.gmra.mrb[80].mxu0 %v2926_v42  ;;  %v2916_v42 = vcombine.low %v76_v24, %v84_v25 }
  0xc4   :  { %2370 = vmatmul.mubr.bf16.gmra.mrb[80].mxu1 %v2928_v43  ;;  %2280 = vmatprep.mubr.bf16.mxu0 %v2943_v44  ;;  %v2931_v43 = vcombine.high %v91_v30, %v99_v31 }
  0xc5   :  { %2377 = vmatprep.mubr.bf16.mxu1 %v2945_v45 }
  0xcb   :  { %2281 = vmatmul.mubr.bf16.gmra.mrb[84].mxu0 %v2942_v50 }
  0xcc   :  { %2378 = vmatmul.mubr.bf16.gmra.mrb[84].mxu1 %v2944_v51  ;;  %2288 = vmatprep.mubr.bf16.mxu0 %v2959_v52 }
  0xcd   :  { %2385 = vmatprep.mubr.bf16.mxu1 %v2961_v53 }
  0xd3   :  { %2289 = vmatmul.mubr.bf16.gmra.mrb[88].mxu0 %v2958_v58  ;;  %v108_v58 = vld [vmem:[%s4962_s0 + $0x2b8] sm:$0xff] }
  0xd4   :  { %2386 = vmatmul.mubr.bf16.gmra.mrb[88].mxu1 %v2960_v59  ;;  %2296 = vmatprep.mubr.bf16.mxu0 %v2975_v60  ;;  %v116_v59 = vld [vmem:[%s4962_s0 + $0x2f8] sm:$0xff] }
  0xd5   :  { %2393 = vmatprep.mubr.bf16.mxu1 %v2977_v61  ;;  %v2949_v7 = vcombine.high %v108_v58, %v116_v59 }
  0xdb   :  { %2297 = vmatmul.mubr.bf16.gmra.mrb[92].mxu0 %v2974_v2  ;;  %v2932_v2 = vcombine.low %v92_v33, %v100_v34 }
  0xdc   :  { %2394 = vmatmul.mubr.bf16.gmra.mrb[92].mxu1 %v2976_v3  ;;  %2434 = vmatprep.mubr.bf16.mxu0 %v2867_v4  ;;  %v2947_v3 = vcombine.high %v107_v54, %v115_v55 }
  0xdd   :  { %2531 = vmatprep.mubr.bf16.mxu1 %v2869_v5 }
  0xe3   :  { %2435 = vmatmul.mubr.bf16.vlgmr.msra.gmra.mrb[96].mxu0 %v2866_v10 }
  0xe4   :  { %2532 = vmatmul.mubr.bf16.vlgmr.msra.gmra.mrb[96].mxu1 %v2868_v11  ;;  %2442 = vmatprep.mubr.bf16.mxu0 %v2883_v12 }
  0xe5   :  { %2539 = vmatprep.mubr.bf16.mxu1 %v2885_v13 }
  0xeb   :  { %2443 = vmatmul.mubr.bf16.gmra.mrb[100].mxu0 %v2882_v18  ;;  %v124_v18 = vld [vmem:[%s4962_s0 + $0x338] sm:$0xff] }
  0xec   :  { %2540 = vmatmul.mubr.bf16.gmra.mrb[100].mxu1 %v2884_v19  ;;  %2450 = vmatprep.mubr.bf16.mxu0 %v2899_v20  ;;  %v132_v19 = vld [vmem:[%s4962_s0 + $0x378] sm:$0xff] }
  0xed   :  { %2547 = vmatprep.mubr.bf16.mxu1 %v2901_v21  ;;  %v2965_v31 = vcombine.high %v124_v18, %v132_v19 }
  0xf3   :  { %2451 = vmatmul.mubr.bf16.gmra.mrb[104].mxu0 %v2898_v26  ;;  %v2948_v26 = vcombine.low %v108_v58, %v116_v59 }
  0xf4   :  { %2548 = vmatmul.mubr.bf16.gmra.mrb[104].mxu1 %v2900_v27  ;;  %2458 = vmatprep.mubr.bf16.mxu0 %v2915_v28  ;;  %v2963_v27 = vcombine.high %v123_v14, %v131_v15 }
  0xf5   :  { %2555 = vmatprep.mubr.bf16.mxu1 %v2917_v29 }
  0xf6   :  { %v3206_v32 = vpop.f32.mrb[0].mxu0 }
  0xf7   :  { %v3270_v35 = vpop.f32.mrb[0].mxu1  ;;  %v3207_v37 = vpop.f32.mrb[1].mxu0 }
  0xf8   :  { %v3208_v39 = vadd.f32 %v3207_v37, %v3206_v32  ;;  %v3271_v40 = vpop.f32.mrb[1].mxu1  ;;  %v3209_v41 = vpop.f32.mrb[2].mxu0 }
  0xf9   :  { %v3272_v44 = vadd.f32 %v3271_v40, %v3270_v35  ;;  %v3273_v45 = vpop.f32.mrb[2].mxu1  ;;  %v3210_v46 = vpop.f32.mrb[3].mxu0  ;;  %v147_v40 = vld [vmem:[%s4962_s0 + $0x3f0] sm:$0xff] }
  0xfa   :  { %v1855_v48 = vadd.f32 %v3208_v39, %v4597_v36  ;;  %v3211_v49 = vadd.f32 %v3210_v46, %v3209_v41  ;;  %v3274_v50 = vpop.f32.mrb[3].mxu1  ;;  %v139_v39 = vld [vmem:[%s4962_s0 + $0x3b0] sm:$0xff] }
  0xfb   :  { %v3275_v51 = vadd.f32 %v3274_v50, %v3273_v45  ;;  %2459 = vmatmul.mubr.bf16.gmra.mrb[108].mxu0 %v2914_v38 }
  0xfc   :  { %v4600_v52 = vadd.f32 %v3272_v44, %v1855_v48  ;;  %v1858_v53 = vadd.f32 %v3211_v49, %v4597_v36  ;;  %2556 = vmatmul.mubr.bf16.gmra.mrb[108].mxu1 %v2916_v42  ;;  %2466 = vmatprep.mubr.bf16.mxu0 %v2931_v43  ;;  %v140_v43 = vld [vmem:[%s4962_s0 + $0x3b8] sm:$0xff] }
  0xfd   :  { %2563 = vmatprep.mubr.bf16.mxu1 %v2933_v47  ;;  %v148_v44 = vld [vmem:[%s4962_s0 + $0x3f8] sm:$0xff]  ;;  %v2962_v47 = vcombine.low %v123_v14, %v131_v15 }
  0xfe   :  { %v4609_v56 = vadd.f32 %v3275_v51, %v1858_v53  ;;  %v3212_v57 = vpop.f32.mrb[4].mxu0  ;;  %v2964_v51 = vcombine.low %v124_v18, %v132_v19  ;;  %v2979_v53 = vcombine.high %v139_v39, %v147_v40  ;;  %v2981_v58 = vcombine.high %v140_v43, %v148_v44 }
  0xff   :  { %v3276_v60 = vpop.f32.mrb[4].mxu1  ;;  %v3213_v61 = vpop.f32.mrb[5].mxu0 }
 0x100   :  { %v3214_v63 = vadd.f32 %v3213_v61, %v3212_v57  ;;  %v3277_v0 = vpop.f32.mrb[5].mxu1  ;;  %v3215_v1 = vpop.f32.mrb[6].mxu0 }
 0x101   :  { %v3278_v4 = vadd.f32 %v3277_v0, %v3276_v60  ;;  %v3279_v5 = vpop.f32.mrb[6].mxu1  ;;  %v3216_v6 = vpop.f32.mrb[7].mxu0 }
 0x102   :  { %v1863_v8 = vadd.f32 %v3214_v63, %v4597_v36  ;;  %v3217_v9 = vadd.f32 %v3216_v6, %v3215_v1  ;;  %v3280_v10 = vpop.f32.mrb[7].mxu1 }
 0x103   :  { %v3281_v11 = vadd.f32 %v3280_v10, %v3279_v5  ;;  %2467 = vmatmul.mubr.bf16.gmra.mrb[112].mxu0 %v2930_v62  ;;  %v2978_v5 = vcombine.low %v139_v39, %v147_v40 }
 0x104   :  { %v4618_v12 = vadd.f32 %v3278_v4, %v1863_v8  ;;  %v1866_v13 = vadd.f32 %v3217_v9, %v4597_v36  ;;  %2564 = vmatmul.mubr.bf16.gmra.mrb[112].mxu1 %v2932_v2  ;;  %2474 = vmatprep.mubr.bf16.mxu0 %v2947_v3  ;;  %v2980_v9 = vcombine.low %v140_v43, %v148_v44 }
 0x105   :  { %2571 = vmatprep.mubr.bf16.mxu1 %v2949_v7 }
 0x106   :  { %v4627_v16 = vadd.f32 %v3281_v11, %v1866_v13  ;;  %v3218_v17 = vpop.f32.mrb[8].mxu0 }
 0x107   :  { %v3282_v20 = vpop.f32.mrb[8].mxu1  ;;  %v3219_v21 = vpop.f32.mrb[9].mxu0 }
 0x108   :  { %v3220_v23 = vadd.f32 %v3219_v21, %v3218_v17  ;;  %v3283_v24 = vpop.f32.mrb[9].mxu1  ;;  %v3221_v25 = vpop.f32.mrb[10].mxu0 }
 0x109   :  { %v3284_v28 = vadd.f32 %v3283_v24, %v3282_v20  ;;  %v3285_v29 = vpop.f32.mrb[10].mxu1  ;;  %v3222_v30 = vpop.f32.mrb[11].mxu0 }
 0x10a   :  { %v1871_v32 = vadd.f32 %v3220_v23, %v4597_v36  ;;  %v3223_v33 = vadd.f32 %v3222_v30, %v3221_v25  ;;  %v3286_v34 = vpop.f32.mrb[11].mxu1 }
 0x10b   :  { %v3287_v35 = vadd.f32 %v3286_v34, %v3285_v29  ;;  %2475 = vmatmul.mubr.bf16.gmra.mrb[116].mxu0 %v2946_v22 }
 0x10c   :  { %v4636_v37 = vadd.f32 %v3284_v28, %v1871_v32  ;;  %v1874_v38 = vadd.f32 %v3223_v33, %v4597_v36  ;;  %2572 = vmatmul.mubr.bf16.gmra.mrb[116].mxu1 %v2948_v26  ;;  %2482 = vmatprep.mubr.bf16.mxu0 %v2963_v27 }
 0x10d   :  { %2579 = vmatprep.mubr.bf16.mxu1 %v2965_v31 }
 0x10e   :  { %v4645_v41 = vadd.f32 %v3287_v35, %v1874_v38  ;;  %v3224_v42 = vpop.f32.mrb[12].mxu0 }
 0x10f   :  { %v3288_v45 = vpop.f32.mrb[12].mxu1  ;;  %v3225_v46 = vpop.f32.mrb[13].mxu0 }
 0x110   :  { %v3226_v48 = vadd.f32 %v3225_v46, %v3224_v42  ;;  %v3289_v49 = vpop.f32.mrb[13].mxu1  ;;  %v3227_v50 = vpop.f32.mrb[14].mxu0 }
 0x111   :  { %v3290_v54 = vadd.f32 %v3289_v49, %v3288_v45  ;;  %v3291_v55 = vpop.f32.mrb[14].mxu1  ;;  %v3228_v57 = vpop.f32.mrb[15].mxu0 }
 0x112   :  { %v1879_v59 = vadd.f32 %v3226_v48, %v4597_v36  ;;  %v3229_v60 = vadd.f32 %v3228_v57, %v3227_v50  ;;  %v3292_v61 = vpop.f32.mrb[15].mxu1 }
 0x113   :  { %v3293_v62 = vadd.f32 %v3292_v61, %v3291_v55  ;;  %2483 = vmatmul.mubr.bf16.gmra.mrb[120].mxu0 %v2962_v47 }
 0x114   :  { %v4654_v63 = vadd.f32 %v3290_v54, %v1879_v59  ;;  %v1882_v0 = vadd.f32 %v3229_v60, %v4597_v36  ;;  %2580 = vmatmul.mubr.bf16.gmra.mrb[120].mxu1 %v2964_v51  ;;  %2490 = vmatprep.mubr.bf16.mxu0 %v2979_v53 }
 0x115   :  { %2587 = vmatprep.mubr.bf16.mxu1 %v2981_v58 }
 0x116   :  { %v4657_v1 = vadd.f32 %v3293_v62, %v1882_v0  ;;  %v3230_v2 = vpop.f32.mrb[16].mxu0 }
 0x117   :  { %v3294_v3 = vpop.f32.mrb[16].mxu1  ;;  %v3231_v4 = vpop.f32.mrb[17].mxu0 }
 0x118   :  { %v3232_v6 = vadd.f32 %v3231_v4, %v3230_v2  ;;  %v3295_v7 = vpop.f32.mrb[17].mxu1  ;;  %v3233_v8 = vpop.f32.mrb[18].mxu0 }
 0x119   :  { %v3296_v10 = vadd.f32 %v3295_v7, %v3294_v3  ;;  %v3297_v11 = vpop.f32.mrb[18].mxu1  ;;  %v3234_v13 = vpop.f32.mrb[19].mxu0 }
 0x11a   :  { %v1887_v14 = vadd.f32 %v3232_v6, %v4597_v36  ;;  %v3235_v15 = vadd.f32 %v3234_v13, %v3233_v8  ;;  %v3298_v17 = vpop.f32.mrb[19].mxu1 }
 0x11b   :  { %v3299_v18 = vadd.f32 %v3298_v17, %v3297_v11  ;;  %2491 = vmatmul.mubr.bf16.gmra.mrb[124].mxu0 %v2978_v5 }
 0x11c   :  { %v4660_v19 = vadd.f32 %v3296_v10, %v1887_v14  ;;  %v1890_v20 = vadd.f32 %v3235_v15, %v4597_v36  ;;  %2588 = vmatmul.mubr.bf16.gmra.mrb[124].mxu1 %v2980_v9 }
 0x11e   :  { %v4663_v21 = vadd.f32 %v3299_v18, %v1890_v20  ;;  %v3236_v22 = vpop.f32.mrb[20].mxu0 }
 0x11f   :  { %v3300_v23 = vpop.f32.mrb[20].mxu1  ;;  %v3237_v24 = vpop.f32.mrb[21].mxu0 }
 0x120   :  { %v3238_v25 = vadd.f32 %v3237_v24, %v3236_v22  ;;  %v3301_v26 = vpop.f32.mrb[21].mxu1  ;;  %v3239_v27 = vpop.f32.mrb[22].mxu0 }
 0x121   :  { %v3302_v28 = vadd.f32 %v3301_v26, %v3300_v23  ;;  %v3303_v29 = vpop.f32.mrb[22].mxu1  ;;  %v3240_v30 = vpop.f32.mrb[23].mxu0 }
 0x122   :  { %v1895_v31 = vadd.f32 %v3238_v25, %v4597_v36  ;;  %v3241_v32 = vadd.f32 %v3240_v30, %v3239_v27  ;;  %v3304_v33 = vpop.f32.mrb[23].mxu1 }
 0x123   :  { %v3305_v34 = vadd.f32 %v3304_v33, %v3303_v29 }
 0x124   :  { %v4666_v35 = vadd.f32 %v3302_v28, %v1895_v31  ;;  %v1898_v38 = vadd.f32 %v3241_v32, %v4597_v36 }
 0x126   :  { %v4669_v39 = vadd.f32 %v3305_v34, %v1898_v38  ;;  %v3242_v40 = vpop.f32.mrb[24].mxu0 }
 0x127   :  { %v3306_v42 = vpop.f32.mrb[24].mxu1  ;;  %v3243_v43 = vpop.f32.mrb[25].mxu0 }
 0x128   :  { %v3244_v44 = vadd.f32 %v3243_v43, %v3242_v40  ;;  %v3307_v45 = vpop.f32.mrb[25].mxu1  ;;  %v3245_v46 = vpop.f32.mrb[26].mxu0 }
 0x129   :  { %v3308_v47 = vadd.f32 %v3307_v45, %v3306_v42  ;;  %v3309_v48 = vpop.f32.mrb[26].mxu1  ;;  %v3246_v49 = vpop.f32.mrb[27].mxu0 }
 0x12a   :  { %v1903_v50 = vadd.f32 %v3244_v44, %v4597_v36  ;;  %v3247_v51 = vadd.f32 %v3246_v49, %v3245_v46  ;;  %v3310_v53 = vpop.f32.mrb[27].mxu1 }
 0x12b   :  { %v3311_v54 = vadd.f32 %v3310_v53, %v3309_v48 }
 0x12c   :  { %v4672_v55 = vadd.f32 %v3308_v47, %v1903_v50  ;;  %v1906_v57 = vadd.f32 %v3247_v51, %v4597_v36 }
 0x12e   :  { %v4675_v58 = vadd.f32 %v3311_v54, %v1906_v57  ;;  %v3248_v59 = vpop.f32.mrb[28].mxu0 }
 0x12f   :  { %v3312_v60 = vpop.f32.mrb[28].mxu1  ;;  %v3249_v61 = vpop.f32.mrb[29].mxu0 }
 0x130   :  { %v3250_v62 = vadd.f32 %v3249_v61, %v3248_v59  ;;  %v3313_v0 = vpop.f32.mrb[29].mxu1  ;;  %v3251_v2 = vpop.f32.mrb[30].mxu0 }
 0x131   :  { %v3314_v3 = vadd.f32 %v3313_v0, %v3312_v60  ;;  %v3315_v4 = vpop.f32.mrb[30].mxu1  ;;  %v3252_v5 = vpop.f32.mrb[31].mxu0 }
 0x132   :  { %v1911_v6 = vadd.f32 %v3250_v62, %v4597_v36  ;;  %v3253_v7 = vadd.f32 %v3252_v5, %v3251_v2  ;;  %v3316_v8 = vpop.f32.mrb[31].mxu1 }
 0x133   :  { %v3317_v9 = vadd.f32 %v3316_v8, %v3315_v4 }
 0x134   :  { %v4678_v10 = vadd.f32 %v3314_v3, %v1911_v6  ;;  %v1914_v11 = vadd.f32 %v3253_v7, %v4597_v36 }
 0x136   :  { %v4681_v13 = vadd.f32 %v3317_v9, %v1914_v11  ;;  %v3334_v14 = vpop.f32.mrb[32].mxu0 }
 0x137   :  { %v3398_v15 = vpop.f32.mrb[32].mxu1  ;;  %v3335_v17 = vpop.f32.mrb[33].mxu0 }
 0x138   :  { %v3336_v18 = vadd.f32 %v3335_v17, %v3334_v14  ;;  %v3399_v20 = vpop.f32.mrb[33].mxu1  ;;  %v3337_v22 = vpop.f32.mrb[34].mxu0 }
 0x139   :  { %v3400_v23 = vadd.f32 %v3399_v20, %v3398_v15  ;;  %v3401_v24 = vpop.f32.mrb[34].mxu1  ;;  %v3338_v25 = vpop.f32.mrb[35].mxu0 }
 0x13a   :  { %v2049_v26 = vadd.f32 %v3336_v18, %v4600_v52  ;;  %v3339_v27 = vadd.f32 %v3338_v25, %v3337_v22  ;;  %v3402_v28 = vpop.f32.mrb[35].mxu1 }
 0x13b   :  { %v3403_v29 = vadd.f32 %v3402_v28, %v3401_v24 }
 0x13c   :  { %v4684_v30 = vadd.f32 %v3400_v23, %v2049_v26  ;;  %v2052_v36 = vadd.f32 %v3339_v27, %v4609_v56 }
 0x13e   :  { %v4687_v31 = vadd.f32 %v3403_v29, %v2052_v36  ;;  %v3340_v32 = vpop.f32.mrb[36].mxu0 }
 0x13f   :  { %v3404_v33 = vpop.f32.mrb[36].mxu1  ;;  %v3341_v34 = vpop.f32.mrb[37].mxu0 }
 0x140   :  { %v3342_v38 = vadd.f32 %v3341_v34, %v3340_v32  ;;  %v3405_v40 = vpop.f32.mrb[37].mxu1  ;;  %v3343_v42 = vpop.f32.mrb[38].mxu0 }
 0x141   :  { %v3406_v43 = vadd.f32 %v3405_v40, %v3404_v33  ;;  %v3407_v44 = vpop.f32.mrb[38].mxu1  ;;  %v3344_v45 = vpop.f32.mrb[39].mxu0 }
 0x142   :  { %v2057_v52 = vadd.f32 %v3342_v38, %v4618_v12  ;;  %v3345_v46 = vadd.f32 %v3344_v45, %v3343_v42  ;;  %v3408_v47 = vpop.f32.mrb[39].mxu1 }
 0x143   :  { %v3409_v48 = vadd.f32 %v3408_v47, %v3407_v44 }
 0x144   :  { %v4690_v49 = vadd.f32 %v3406_v43, %v2057_v52  ;;  %v2060_v56 = vadd.f32 %v3345_v46, %v4627_v16 }
 0x146   :  { %v4693_v50 = vadd.f32 %v3409_v48, %v2060_v56  ;;  %v3346_v51 = vpop.f32.mrb[40].mxu0 }
 0x147   :  { %v3410_v53 = vpop.f32.mrb[40].mxu1  ;;  %v3347_v54 = vpop.f32.mrb[41].mxu0 }
 0x148   :  { %v3348_v57 = vadd.f32 %v3347_v54, %v3346_v51  ;;  %v3411_v59 = vpop.f32.mrb[41].mxu1  ;;  %v3349_v60 = vpop.f32.mrb[42].mxu0 }
 0x149   :  { %v3412_v61 = vadd.f32 %v3411_v59, %v3410_v53  ;;  %v3413_v62 = vpop.f32.mrb[42].mxu1  ;;  %v3350_v0 = vpop.f32.mrb[43].mxu0 }
 0x14a   :  { %v2065_v12 = vadd.f32 %v3348_v57, %v4636_v37  ;;  %v3351_v2 = vadd.f32 %v3350_v0, %v3349_v60  ;;  %v3414_v3 = vpop.f32.mrb[43].mxu1 }
 0x14b   :  { %v3415_v4 = vadd.f32 %v3414_v3, %v3413_v62 }
 0x14c   :  { %v4696_v5 = vadd.f32 %v3412_v61, %v2065_v12  ;;  %v2068_v16 = vadd.f32 %v3351_v2, %v4645_v41 }
 0x14e   :  { %v4699_v6 = vadd.f32 %v3415_v4, %v2068_v16  ;;  %v3352_v7 = vpop.f32.mrb[44].mxu0 }
 0x14f   :  { %v3416_v8 = vpop.f32.mrb[44].mxu1  ;;  %v3353_v9 = vpop.f32.mrb[45].mxu0 }
 0x150   :  { %v3354_v11 = vadd.f32 %v3353_v9, %v3352_v7  ;;  %v3417_v14 = vpop.f32.mrb[45].mxu1  ;;  %v3355_v15 = vpop.f32.mrb[46].mxu0 }
 0x151   :  { %v3418_v17 = vadd.f32 %v3417_v14, %v3416_v8  ;;  %v3419_v18 = vpop.f32.mrb[46].mxu1  ;;  %v3356_v20 = vpop.f32.mrb[47].mxu0 }
 0x152   :  { %v2073_v37 = vadd.f32 %v3354_v11, %v4654_v63  ;;  %v3357_v22 = vadd.f32 %v3356_v20, %v3355_v15  ;;  %v3420_v23 = vpop.f32.mrb[47].mxu1 }
 0x153   :  { %v3421_v24 = vadd.f32 %v3420_v23, %v3419_v18 }
 0x154   :  { %v4702_v25 = vadd.f32 %v3418_v17, %v2073_v37  ;;  %v2076_v41 = vadd.f32 %v3357_v22, %v4657_v1 }
 0x156   :  { %v4705_v26 = vadd.f32 %v3421_v24, %v2076_v41  ;;  %v3358_v27 = vpop.f32.mrb[48].mxu0 }
 0x157   :  { %v3422_v28 = vpop.f32.mrb[48].mxu1  ;;  %v3359_v29 = vpop.f32.mrb[49].mxu0 }
 0x158   :  { %v3360_v36 = vadd.f32 %v3359_v29, %v3358_v27  ;;  %v3423_v32 = vpop.f32.mrb[49].mxu1  ;;  %v3361_v33 = vpop.f32.mrb[50].mxu0 }
 0x159   :  { %v3424_v34 = vadd.f32 %v3423_v32, %v3422_v28  ;;  %v3425_v38 = vpop.f32.mrb[50].mxu1  ;;  %v3362_v40 = vpop.f32.mrb[51].mxu0 }
 0x15a   :  { %v2081_v63 = vadd.f32 %v3360_v36, %v4660_v19  ;;  %v3363_v42 = vadd.f32 %v3362_v40, %v3361_v33  ;;  %v3426_v43 = vpop.f32.mrb[51].mxu1 }
 0x15b   :  { %v3427_v44 = vadd.f32 %v3426_v43, %v3425_v38 }
 0x15c   :  { %v4708_v45 = vadd.f32 %v3424_v34, %v2081_v63  ;;  %v2084_v1 = vadd.f32 %v3363_v42, %v4663_v21 }
 0x15e   :  { %v4711_v52 = vadd.f32 %v3427_v44, %v2084_v1  ;;  %v3364_v46 = vpop.f32.mrb[52].mxu0 }
 0x15f   :  { %v3428_v47 = vpop.f32.mrb[52].mxu1  ;;  %v3365_v48 = vpop.f32.mrb[53].mxu0 }
 0x160   :  { %v3366_v56 = vadd.f32 %v3365_v48, %v3364_v46  ;;  %v3429_v51 = vpop.f32.mrb[53].mxu1  ;;  %v3367_v53 = vpop.f32.mrb[54].mxu0 }
 0x161   :  { %v3430_v54 = vadd.f32 %v3429_v51, %v3428_v47  ;;  %v3431_v57 = vpop.f32.mrb[54].mxu1  ;;  %v3368_v59 = vpop.f32.mrb[55].mxu0 }
 0x162   :  { %v2089_v19 = vadd.f32 %v3366_v56, %v4666_v35  ;;  %v3369_v60 = vadd.f32 %v3368_v59, %v3367_v53  ;;  %v3432_v61 = vpop.f32.mrb[55].mxu1 }
 0x163   :  { %v3433_v62 = vadd.f32 %v3432_v61, %v3431_v57 }
 0x164   :  { %v4714_v0 = vadd.f32 %v3430_v54, %v2089_v19  ;;  %v2092_v21 = vadd.f32 %v3369_v60, %v4669_v39 }
 0x166   :  { %v4717_v12 = vadd.f32 %v3433_v62, %v2092_v21  ;;  %v3370_v2 = vpop.f32.mrb[56].mxu0 }
 0x167   :  { %v3434_v3 = vpop.f32.mrb[56].mxu1  ;;  %v3371_v4 = vpop.f32.mrb[57].mxu0 }
 0x168   :  { %v3372_v16 = vadd.f32 %v3371_v4, %v3370_v2  ;;  %v3435_v7 = vpop.f32.mrb[57].mxu1  ;;  %v3373_v8 = vpop.f32.mrb[58].mxu0 }
 0x169   :  { %v3436_v9 = vadd.f32 %v3435_v7, %v3434_v3  ;;  %v3437_v11 = vpop.f32.mrb[58].mxu1  ;;  %v3374_v14 = vpop.f32.mrb[59].mxu0 }
 0x16a   :  { %v2097_v35 = vadd.f32 %v3372_v16, %v4672_v55  ;;  %v3375_v15 = vadd.f32 %v3374_v14, %v3373_v8  ;;  %v3438_v17 = vpop.f32.mrb[59].mxu1 }
 0x16b   :  { %v3439_v18 = vadd.f32 %v3438_v17, %v3437_v11 }
 0x16c   :  { %v4720_v20 = vadd.f32 %v3436_v9, %v2097_v35  ;;  %v2100_v39 = vadd.f32 %v3375_v15, %v4675_v58 }
 0x16e   :  { %v4723_v37 = vadd.f32 %v3439_v18, %v2100_v39  ;;  %v3376_v22 = vpop.f32.mrb[60].mxu0 }
 0x16f   :  { %v3440_v23 = vpop.f32.mrb[60].mxu1  ;;  %v3377_v24 = vpop.f32.mrb[61].mxu0 }
 0x170   :  { %v3378_v41 = vadd.f32 %v3377_v24, %v3376_v22  ;;  %v3441_v27 = vpop.f32.mrb[61].mxu1  ;;  %v3379_v28 = vpop.f32.mrb[62].mxu0 }
 0x171   :  { %v3442_v29 = vadd.f32 %v3441_v27, %v3440_v23  ;;  %v3443_v36 = vpop.f32.mrb[62].mxu1  ;;  %v3380_v32 = vpop.f32.mrb[63].mxu0 }
 0x172   :  { %v2105_v55 = vadd.f32 %v3378_v41, %v4678_v10  ;;  %v3381_v33 = vadd.f32 %v3380_v32, %v3379_v28  ;;  %v3444_v34 = vpop.f32.mrb[63].mxu1 }
 0x173   :  { %v3445_v38 = vadd.f32 %v3444_v34, %v3443_v36 }
 0x174   :  { %v4726_v40 = vadd.f32 %v3442_v29, %v2105_v55  ;;  %v2108_v58 = vadd.f32 %v3381_v33, %v4681_v13 }
 0x176   :  { %v4729_v63 = vadd.f32 %v3445_v38, %v2108_v58  ;;  %v3462_v42 = vpop.f32.mrb[64].mxu0 }
 0x177   :  { %v3526_v43 = vpop.f32.mrb[64].mxu1  ;;  %v3463_v44 = vpop.f32.mrb[65].mxu0 }
 0x178   :  { %v3464_v1 = vadd.f32 %v3463_v44, %v3462_v42  ;;  %v3527_v46 = vpop.f32.mrb[65].mxu1  ;;  %v3465_v47 = vpop.f32.mrb[66].mxu0 }
 0x179   :  { %v3528_v48 = vadd.f32 %v3527_v46, %v3526_v43  ;;  %v3529_v56 = vpop.f32.mrb[66].mxu1  ;;  %v3466_v51 = vpop.f32.mrb[67].mxu0 }
 0x17a   :  { %v2243_v10 = vadd.f32 %v3464_v1, %v4684_v30  ;;  %v3467_v53 = vadd.f32 %v3466_v51, %v3465_v47  ;;  %v3530_v54 = vpop.f32.mrb[67].mxu1 }
 0x17b   :  { %v3531_v57 = vadd.f32 %v3530_v54, %v3529_v56 }
 0x17c   :  { %v4732_v59 = vadd.f32 %v3528_v48, %v2243_v10  ;;  %v2246_v13 = vadd.f32 %v3467_v53, %v4687_v31 }
 0x17e   :  { %v4735_v19 = vadd.f32 %v3531_v57, %v2246_v13  ;;  %v3468_v60 = vpop.f32.mrb[68].mxu0 }
 0x17f   :  { %v3532_v61 = vpop.f32.mrb[68].mxu1  ;;  %v3469_v62 = vpop.f32.mrb[69].mxu0 }
 0x180   :  { %v3470_v21 = vadd.f32 %v3469_v62, %v3468_v60  ;;  %v3533_v2 = vpop.f32.mrb[69].mxu1  ;;  %v3471_v3 = vpop.f32.mrb[70].mxu0 }
 0x181   :  { %v3534_v4 = vadd.f32 %v3533_v2, %v3532_v61  ;;  %v3535_v16 = vpop.f32.mrb[70].mxu1  ;;  %v3472_v7 = vpop.f32.mrb[71].mxu0 }
 0x182   :  { %v2251_v30 = vadd.f32 %v3470_v21, %v4690_v49  ;;  %v3473_v8 = vadd.f32 %v3472_v7, %v3471_v3  ;;  %v3536_v9 = vpop.f32.mrb[71].mxu1 }
 0x183   :  { %v3537_v11 = vadd.f32 %v3536_v9, %v3535_v16 }
 0x184   :  { %v4738_v14 = vadd.f32 %v3534_v4, %v2251_v30  ;;  %v2254_v31 = vadd.f32 %v3473_v8, %v4693_v50 }
 0x186   :  { %v4741_v35 = vadd.f32 %v3537_v11, %v2254_v31  ;;  %v3474_v15 = vpop.f32.mrb[72].mxu0 }
 0x187   :  { %v3538_v17 = vpop.f32.mrb[72].mxu1  ;;  %v3475_v18 = vpop.f32.mrb[73].mxu0 }
 0x188   :  { %v3476_v39 = vadd.f32 %v3475_v18, %v3474_v15  ;;  %v3539_v22 = vpop.f32.mrb[73].mxu1  ;;  %v3477_v23 = vpop.f32.mrb[74].mxu0 }
 0x189   :  { %v3540_v24 = vadd.f32 %v3539_v22, %v3538_v17  ;;  %v3541_v41 = vpop.f32.mrb[74].mxu1  ;;  %v3478_v27 = vpop.f32.mrb[75].mxu0 }
 0x18a   :  { %v2259_v49 = vadd.f32 %v3476_v39, %v4696_v5  ;;  %v3479_v28 = vadd.f32 %v3478_v27, %v3477_v23  ;;  %v3542_v29 = vpop.f32.mrb[75].mxu1 }
 0x18b   :  { %v3543_v36 = vadd.f32 %v3542_v29, %v3541_v41 }
 0x18c   :  { %v4744_v32 = vadd.f32 %v3540_v24, %v2259_v49  ;;  %v2262_v50 = vadd.f32 %v3479_v28, %v4699_v6 }
 0x18e   :  { %v4747_v55 = vadd.f32 %v3543_v36, %v2262_v50  ;;  %v3480_v33 = vpop.f32.mrb[76].mxu0 }
 0x18f   :  { %v3544_v34 = vpop.f32.mrb[76].mxu1  ;;  %v3481_v38 = vpop.f32.mrb[77].mxu0 }
 0x190   :  { %v3482_v58 = vadd.f32 %v3481_v38, %v3480_v33  ;;  %v3545_v42 = vpop.f32.mrb[77].mxu1  ;;  %v3483_v43 = vpop.f32.mrb[78].mxu0 }
 0x191   :  { %v3546_v44 = vadd.f32 %v3545_v42, %v3544_v34  ;;  %v3547_v1 = vpop.f32.mrb[78].mxu1  ;;  %v3484_v46 = vpop.f32.mrb[79].mxu0 }
 0x192   :  { %v2267_v5 = vadd.f32 %v3482_v58, %v4702_v25  ;;  %v3485_v47 = vadd.f32 %v3484_v46, %v3483_v43  ;;  %v3548_v48 = vpop.f32.mrb[79].mxu1 }
 0x193   :  { %v3549_v56 = vadd.f32 %v3548_v48, %v3547_v1 }
 0x194   :  { %v4750_v51 = vadd.f32 %v3546_v44, %v2267_v5  ;;  %v2270_v6 = vadd.f32 %v3485_v47, %v4705_v26 }
 0x196   :  { %v4753_v10 = vadd.f32 %v3549_v56, %v2270_v6  ;;  %v3486_v53 = vpop.f32.mrb[80].mxu0 }
 0x197   :  { %v3550_v54 = vpop.f32.mrb[80].mxu1  ;;  %v3487_v57 = vpop.f32.mrb[81].mxu0 }
 0x198   :  { %v3488_v13 = vadd.f32 %v3487_v57, %v3486_v53  ;;  %v3551_v60 = vpop.f32.mrb[81].mxu1  ;;  %v3489_v61 = vpop.f32.mrb[82].mxu0 }
 0x199   :  { %v3552_v62 = vadd.f32 %v3551_v60, %v3550_v54  ;;  %v3553_v21 = vpop.f32.mrb[82].mxu1  ;;  %v3490_v2 = vpop.f32.mrb[83].mxu0 }
 0x19a   :  { %v2275_v25 = vadd.f32 %v3488_v13, %v4708_v45  ;;  %v3491_v3 = vadd.f32 %v3490_v2, %v3489_v61  ;;  %v3554_v4 = vpop.f32.mrb[83].mxu1 }
 0x19b   :  { %v3555_v16 = vadd.f32 %v3554_v4, %v3553_v21 }
 0x19c   :  { %v4756_v7 = vadd.f32 %v3552_v62, %v2275_v25  ;;  %v2278_v26 = vadd.f32 %v3491_v3, %v4711_v52 }
 0x19e   :  { %v4759_v30 = vadd.f32 %v3555_v16, %v2278_v26  ;;  %v3492_v8 = vpop.f32.mrb[84].mxu0 }
 0x19f   :  { %v3556_v9 = vpop.f32.mrb[84].mxu1  ;;  %v3493_v11 = vpop.f32.mrb[85].mxu0 }
 0x1a0   :  { %v3494_v31 = vadd.f32 %v3493_v11, %v3492_v8  ;;  %v3557_v15 = vpop.f32.mrb[85].mxu1  ;;  %v3495_v17 = vpop.f32.mrb[86].mxu0 }
 0x1a1   :  { %v3558_v18 = vadd.f32 %v3557_v15, %v3556_v9  ;;  %v3559_v39 = vpop.f32.mrb[86].mxu1  ;;  %v3496_v22 = vpop.f32.mrb[87].mxu0 }
 0x1a2   :  { %v2283_v45 = vadd.f32 %v3494_v31, %v4714_v0  ;;  %v3497_v23 = vadd.f32 %v3496_v22, %v3495_v17  ;;  %v3560_v24 = vpop.f32.mrb[87].mxu1 }
 0x1a3   :  { %v3561_v41 = vadd.f32 %v3560_v24, %v3559_v39 }
 0x1a4   :  { %v4762_v27 = vadd.f32 %v3558_v18, %v2283_v45  ;;  %v2286_v52 = vadd.f32 %v3497_v23, %v4717_v12 }
 0x1a6   :  { %v4765_v49 = vadd.f32 %v3561_v41, %v2286_v52  ;;  %v3498_v28 = vpop.f32.mrb[88].mxu0 }
 0x1a7   :  { %v3562_v29 = vpop.f32.mrb[88].mxu1  ;;  %v3499_v36 = vpop.f32.mrb[89].mxu0 }
 0x1a8   :  { %v3500_v50 = vadd.f32 %v3499_v36, %v3498_v28  ;;  %v3563_v33 = vpop.f32.mrb[89].mxu1  ;;  %v3501_v34 = vpop.f32.mrb[90].mxu0 }
 0x1a9   :  { %v3564_v38 = vadd.f32 %v3563_v33, %v3562_v29  ;;  %v3565_v58 = vpop.f32.mrb[90].mxu1  ;;  %v3502_v42 = vpop.f32.mrb[91].mxu0 }
 0x1aa   :  { %v2291_v0 = vadd.f32 %v3500_v50, %v4720_v20  ;;  %v3503_v43 = vadd.f32 %v3502_v42, %v3501_v34  ;;  %v3566_v44 = vpop.f32.mrb[91].mxu1 }
 0x1ab   :  { %v3567_v1 = vadd.f32 %v3566_v44, %v3565_v58 }
 0x1ac   :  { %v4768_v46 = vadd.f32 %v3564_v38, %v2291_v0  ;;  %v2294_v12 = vadd.f32 %v3503_v43, %v4723_v37 }
 0x1ae   :  { %v4771_v5 = vadd.f32 %v3567_v1, %v2294_v12  ;;  %v3504_v47 = vpop.f32.mrb[92].mxu0 }
 0x1af   :  { %v3568_v48 = vpop.f32.mrb[92].mxu1  ;;  %v3505_v56 = vpop.f32.mrb[93].mxu0 }
 0x1b0   :  { %v3506_v6 = vadd.f32 %v3505_v56, %v3504_v47  ;;  %v3569_v53 = vpop.f32.mrb[93].mxu1  ;;  %v3507_v54 = vpop.f32.mrb[94].mxu0 }
 0x1b1   :  { %v3570_v57 = vadd.f32 %v3569_v53, %v3568_v48  ;;  %v3571_v13 = vpop.f32.mrb[94].mxu1  ;;  %v3508_v60 = vpop.f32.mrb[95].mxu0 }
 0x1b2   :  { %v2299_v20 = vadd.f32 %v3506_v6, %v4726_v40  ;;  %v3509_v61 = vadd.f32 %v3508_v60, %v3507_v54  ;;  %v3572_v62 = vpop.f32.mrb[95].mxu1 }
 0x1b3   :  { %v3573_v21 = vadd.f32 %v3572_v62, %v3571_v13 }
 0x1b4   :  { %v4774_v2 = vadd.f32 %v3570_v57, %v2299_v20  ;;  %v2302_v37 = vadd.f32 %v3509_v61, %v4729_v63 }
 0x1b6   :  { %v4777_v25 = vadd.f32 %v3573_v21, %v2302_v37  ;;  %v3590_v3 = vpop.f32.mrb[96].mxu0 }
 0x1b7   :  { %v3654_v4 = vpop.f32.mrb[96].mxu1  ;;  %v3591_v16 = vpop.f32.mrb[97].mxu0 }
 0x1b8   :  { %v3592_v26 = vadd.f32 %v3591_v16, %v3590_v3  ;;  %v3655_v8 = vpop.f32.mrb[97].mxu1  ;;  %v3593_v9 = vpop.f32.mrb[98].mxu0 }
 0x1b9   :  { %v3656_v11 = vadd.f32 %v3655_v8, %v3654_v4  ;;  %v3657_v31 = vpop.f32.mrb[98].mxu1  ;;  %v3594_v15 = vpop.f32.mrb[99].mxu0 }
 0x1ba   :  { %v2437_v40 = vadd.f32 %v3592_v26, %v4732_v59  ;;  %v3595_v17 = vadd.f32 %v3594_v15, %v3593_v9  ;;  %v3658_v18 = vpop.f32.mrb[99].mxu1 }
 0x1bb   :  { %v3659_v39 = vadd.f32 %v3658_v18, %v3657_v31 }
 0x1bc   :  { %v4780_v22 = vadd.f32 %v3656_v11, %v2437_v40  ;;  %v2440_v63 = vadd.f32 %v3595_v17, %v4735_v19 }
 0x1be   :  { %v4783_v45 = vadd.f32 %v3659_v39, %v2440_v63  ;;  %v3596_v23 = vpop.f32.mrb[100].mxu0 }
 0x1bf   :  { %v3660_v24 = vpop.f32.mrb[100].mxu1  ;;  %v3597_v41 = vpop.f32.mrb[101].mxu0 }
 0x1c0   :  { %v2596_v52 = vadd.f32 %v4783_v45, %v4780_v22  ;;  %v3598_v28 = vadd.f32 %v3597_v41, %v3596_v23  ;;  %v3661_v29 = vpop.f32.mrb[101].mxu1  ;;  %v3599_v36 = vpop.f32.mrb[102].mxu0 }
 0x1c1   :  { %v3662_v50 = vadd.f32 %v3661_v29, %v3660_v24  ;;  %v3663_v59 = vpop.f32.mrb[102].mxu1  ;;  %v3600_v33 = vpop.f32.mrb[103].mxu0 }
 0x1c2   :  { %v2445_v34 = vadd.f32 %v3598_v28, %v4738_v14  ;;  %v3601_v38 = vadd.f32 %v3600_v33, %v3599_v36  ;;  %v3664_v58 = vpop.f32.mrb[103].mxu1 }
 0x1c3   :  { %v3665_v42 = vadd.f32 %v3664_v58, %v3663_v59 }
 0x1c4   :  { %v4788_v19 = vadd.f32 %v3662_v50, %v2445_v34  ;;  %v2448_v0 = vadd.f32 %v3601_v38, %v4741_v35 }
 0x1c6   :  { %v2597_v43 = vadd.f32 %v2596_v52, %v4788_v19  ;;  %v4792_v44 = vadd.f32 %v3665_v42, %v2448_v0  ;;  %v3602_v1 = vpop.f32.mrb[104].mxu0 }
 0x1c7   :  { %v3666_v12 = vpop.f32.mrb[104].mxu1  ;;  %v3603_v47 = vpop.f32.mrb[105].mxu0 }
 0x1c8   :  { %v2598_v48 = vadd.f32 %v2597_v43, %v4792_v44  ;;  %v3604_v56 = vadd.f32 %v3603_v47, %v3602_v1  ;;  %v3667_v6 = vpop.f32.mrb[105].mxu1  ;;  %v3605_v53 = vpop.f32.mrb[106].mxu0 }
 0x1c9   :  { %v3668_v14 = vadd.f32 %v3667_v6, %v3666_v12  ;;  %v3669_v54 = vpop.f32.mrb[106].mxu1  ;;  %v3606_v57 = vpop.f32.mrb[107].mxu0 }
 0x1ca   :  { %v2453_v13 = vadd.f32 %v3604_v56, %v4744_v32  ;;  %v3607_v60 = vadd.f32 %v3606_v57, %v3605_v53  ;;  %v3670_v20 = vpop.f32.mrb[107].mxu1 }
 0x1cb   :  { %v3671_v35 = vadd.f32 %v3670_v20, %v3669_v54 }
 0x1cc   :  { %v4796_v61 = vadd.f32 %v3668_v14, %v2453_v13  ;;  %v2456_v62 = vadd.f32 %v3607_v60, %v4747_v55 }
 0x1ce   :  { %v2599_v21 = vadd.f32 %v2598_v48, %v4796_v61  ;;  %v4800_v37 = vadd.f32 %v3671_v35, %v2456_v62  ;;  %v3608_v3 = vpop.f32.mrb[108].mxu0 }
 0x1cf   :  { %v3672_v4 = vpop.f32.mrb[108].mxu1  ;;  %v3609_v16 = vpop.f32.mrb[109].mxu0 }
 0x1d0   :  { %v2600_v26 = vadd.f32 %v2599_v21, %v4800_v37  ;;  %v3610_v8 = vadd.f32 %v3609_v16, %v3608_v3  ;;  %v3673_v9 = vpop.f32.mrb[109].mxu1  ;;  %v3611_v11 = vpop.f32.mrb[110].mxu0 }
 0x1d1   :  { %v3674_v32 = vadd.f32 %v3673_v9, %v3672_v4  ;;  %v3675_v31 = vpop.f32.mrb[110].mxu1  ;;  %v3612_v15 = vpop.f32.mrb[111].mxu0 }
 0x1d2   :  { %v2461_v40 = vadd.f32 %v3610_v8, %v4750_v51  ;;  %v3613_v17 = vadd.f32 %v3612_v15, %v3611_v11  ;;  %v3676_v18 = vpop.f32.mrb[111].mxu1 }
 0x1d3   :  { %v3677_v55 = vadd.f32 %v3676_v18, %v3675_v31 }
 0x1d4   :  { %v4804_v39 = vadd.f32 %v3674_v32, %v2461_v40  ;;  %v2464_v63 = vadd.f32 %v3613_v17, %v4753_v10 }
 0x1d6   :  { %v2601_v23 = vadd.f32 %v2600_v26, %v4804_v39  ;;  %v4808_v24 = vadd.f32 %v3677_v55, %v2464_v63  ;;  %v3614_v41 = vpop.f32.mrb[112].mxu0 }
 0x1d7   :  { %v3678_v52 = vpop.f32.mrb[112].mxu1  ;;  %v3615_v28 = vpop.f32.mrb[113].mxu0 }
 0x1d8   :  { %v2602_v29 = vadd.f32 %v2601_v23, %v4808_v24  ;;  %v3616_v36 = vadd.f32 %v3615_v28, %v3614_v41  ;;  %v3679_v50 = vpop.f32.mrb[113].mxu1  ;;  %v3617_v59 = vpop.f32.mrb[114].mxu0 }
 0x1d9   :  { %v3680_v51 = vadd.f32 %v3679_v50, %v3678_v52  ;;  %v3681_v33 = vpop.f32.mrb[114].mxu1  ;;  %v3618_v34 = vpop.f32.mrb[115].mxu0 }
 0x1da   :  { %v2469_v38 = vadd.f32 %v3616_v36, %v4756_v7  ;;  %v3619_v58 = vadd.f32 %v3618_v34, %v3617_v59  ;;  %v3682_v42 = vpop.f32.mrb[115].mxu1 }
 0x1db   :  { %v3683_v10 = vadd.f32 %v3682_v42, %v3681_v33 }
 0x1dc   :  { %v4812_v0 = vadd.f32 %v3680_v51, %v2469_v38  ;;  %v2472_v43 = vadd.f32 %v3619_v58, %v4759_v30 }
 0x1de   :  { %v2603_v1 = vadd.f32 %v2602_v29, %v4812_v0  ;;  %v4816_v12 = vadd.f32 %v3683_v10, %v2472_v43  ;;  %v3620_v47 = vpop.f32.mrb[116].mxu0 }
 0x1df   :  { %v3684_v48 = vpop.f32.mrb[116].mxu1  ;;  %v3621_v56 = vpop.f32.mrb[117].mxu0 }
 0x1e0   :  { %v2604_v6 = vadd.f32 %v2603_v1, %v4816_v12  ;;  %v3622_v53 = vadd.f32 %v3621_v56, %v3620_v47  ;;  %v3685_v14 = vpop.f32.mrb[117].mxu1  ;;  %v3623_v54 = vpop.f32.mrb[118].mxu0 }
 0x1e1   :  { %v3686_v7 = vadd.f32 %v3685_v14, %v3684_v48  ;;  %v3687_v57 = vpop.f32.mrb[118].mxu1  ;;  %v3624_v13 = vpop.f32.mrb[119].mxu0 }
 0x1e2   :  { %v2477_v60 = vadd.f32 %v3622_v53, %v4762_v27  ;;  %v3625_v20 = vadd.f32 %v3624_v13, %v3623_v54  ;;  %v3688_v35 = vpop.f32.mrb[119].mxu1 }
 0x1e3   :  { %v3689_v30 = vadd.f32 %v3688_v35, %v3687_v57 }
 0x1e4   :  { %v2574_v62 = vadd.f32 %v3686_v7, %v2477_v60  ;;  %v2480_v21 = vadd.f32 %v3625_v20, %v4765_v49 }
 0x1e6   :  { %v2605_v3 = vadd.f32 %v2604_v6, %v2574_v62  ;;  %v2577_v4 = vadd.f32 %v3689_v30, %v2480_v21  ;;  %v3626_v16 = vpop.f32.mrb[120].mxu0 }
 0x1e7   :  { %v3690_v26 = vpop.f32.mrb[120].mxu1  ;;  %v3627_v8 = vpop.f32.mrb[121].mxu0 }
 0x1e8   :  { %v2606_v9 = vadd.f32 %v2605_v3, %v2577_v4  ;;  %v3628_v11 = vadd.f32 %v3627_v8, %v3626_v16  ;;  %v3691_v32 = vpop.f32.mrb[121].mxu1  ;;  %v3629_v31 = vpop.f32.mrb[122].mxu0 }
 0x1e9   :  { %v3692_v15 = vadd.f32 %v3691_v32, %v3690_v26  ;;  %v3693_v40 = vpop.f32.mrb[122].mxu1  ;;  %v3630_v17 = vpop.f32.mrb[123].mxu0 }
 0x1ea   :  { %v2485_v27 = vadd.f32 %v3628_v11, %v4768_v46  ;;  %v3631_v18 = vadd.f32 %v3630_v17, %v3629_v31  ;;  %v3694_v55 = vpop.f32.mrb[123].mxu1 }
 0x1eb   :  { %v3695_v63 = vadd.f32 %v3694_v55, %v3693_v40 }
 0x1ec   :  { %v2582_v23 = vadd.f32 %v3692_v15, %v2485_v27  ;;  %v2488_v49 = vadd.f32 %v3631_v18, %v4771_v5 }
 0x1ee   :  { %v2607_v41 = vadd.f32 %v2606_v9, %v2582_v23  ;;  %v2585_v52 = vadd.f32 %v3695_v63, %v2488_v49  ;;  %v3632_v28 = vpop.f32.mrb[124].mxu0 }
 0x1ef   :  { %v3696_v29 = vpop.f32.mrb[124].mxu1  ;;  %v3633_v36 = vpop.f32.mrb[125].mxu0 }
 0x1f0   :  { %v2608_v50 = vadd.f32 %v2607_v41, %v2585_v52  ;;  %v3634_v59 = vadd.f32 %v3633_v36, %v3632_v28  ;;  %v3697_v51 = vpop.f32.mrb[125].mxu1  ;;  %v3635_v33 = vpop.f32.mrb[126].mxu0 }
 0x1f1   :  { %v3698_v34 = vadd.f32 %v3697_v51, %v3696_v29  ;;  %v3699_v38 = vpop.f32.mrb[126].mxu1  ;;  %v3636_v58 = vpop.f32.mrb[127].mxu0 }
 0x1f2   :  { %v2493_v46 = vadd.f32 %v3634_v59, %v4774_v2  ;;  %v3637_v42 = vadd.f32 %v3636_v58, %v3635_v33  ;;  %v3700_v10 = vpop.f32.mrb[127].mxu1 }
 0x1f3   :  { %v3701_v43 = vadd.f32 %v3700_v10, %v3699_v38 }
 0x1f4   :  { %v2590_v1 = vadd.f32 %v3698_v34, %v2493_v46  ;;  %v2496_v5 = vadd.f32 %v3637_v42, %v4777_v25 }
 0x1f6   :  { %v2609_v47 = vadd.f32 %v2608_v50, %v2590_v1  ;;  %v2593_v48 = vadd.f32 %v3701_v43, %v2496_v5 }
 0x1f8   :  { %v2610_v56 = vadd.f32 %v2609_v47, %v2593_v48 }
 0x1fa   :  { %v2611_v6 = vrot.slane %v2610_v56, 4 }
 0x1fc   :  { %v2612_v53 = vadd.f32 %v2611_v6, %v2610_v56  ;;  %v2672_v6 = vld [vmem:[%s4964_s3] sm:$0x1] }
 0x1fe   :  { %v2613_v14 = vrot.slane %v2612_v53, 2 }
 0x200   :  { %v2614_v54 = vadd.f32 %v2613_v14, %v2612_v53 }
 0x202   :  { %v2615_v7 = vrot.slane %v2614_v54, 1 }
 0x204   :  { %v2616_v57 = vadd.f32 %v2615_v7, %v2614_v54 }
 0x206   :  { %v2617_v13 = vmul.f32 0.0078125, %v2616_v57 }
 0x208   :  { %v4826_v60 = vsub.f32 %v4780_v22, %v2617_v13  ;;  %v4829_v2 = vsub.f32 %v4783_v45, %v2617_v13  ;;  %v4832_v20 = vsub.f32 %v4788_v19, %v2617_v13  ;;  %v4835_v25 = vsub.f32 %v4792_v44, %v2617_v13 }
 0x209   :  { %v4838_v35 = vsub.f32 %v4796_v61, %v2617_v13  ;;  %v4841_v30 = vsub.f32 %v4800_v37, %v2617_v13  ;;  %v4844_v21 = vsub.f32 %v4804_v39, %v2617_v13  ;;  %v4847_v22 = vsub.f32 %v4808_v24, %v2617_v13 }
 0x20a   :  { %v4850_v45 = vsub.f32 %v4812_v0, %v2617_v13  ;;  %v4853_v19 = vsub.f32 %v4816_v12, %v2617_v13  ;;  %v4855_v44 = vsub.f32 %v2574_v62, %v2617_v13  ;;  %v4857_v3 = vsub.f32 %v2577_v4, %v2617_v13 }
 0x20b   :  { %v4859_v61 = vsub.f32 %v2582_v23, %v2617_v13  ;;  %v4861_v37 = vsub.f32 %v2585_v52, %v2617_v13  ;;  %v4863_v16 = vsub.f32 %v2590_v1, %v2617_v13  ;;  %v4865_v39 = vsub.f32 %v2593_v48, %v2617_v13 }
 0x20c   :  { %v2634_v24 = vmul.f32 %v4826_v60, %v4826_v60  ;;  %v2635_v0 = vmul.f32 %v4829_v2, %v4829_v2  ;;  %v2636_v12 = vmul.f32 %v4832_v20, %v4832_v20  ;;  %v2637_v4 = vmul.f32 %v4835_v25, %v4835_v25 }
 0x20d   :  { %v2638_v8 = vmul.f32 %v4838_v35, %v4838_v35  ;;  %v2639_v11 = vmul.f32 %v4841_v30, %v4841_v30  ;;  %v2640_v31 = vmul.f32 %v4844_v21, %v4844_v21  ;;  %v2641_v40 = vmul.f32 %v4847_v22, %v4847_v22 }
 0x20e   :  { %v2650_v62 = vadd.f32 %v2635_v0, %v2634_v24  ;;  %v2642_v27 = vmul.f32 %v4850_v45, %v4850_v45  ;;  %v2643_v55 = vmul.f32 %v4853_v19, %v4853_v19  ;;  %v2644_v23 = vmul.f32 %v4855_v44, %v4855_v44 }
 0x20f   :  { %v2645_v41 = vmul.f32 %v4857_v3, %v4857_v3  ;;  %v2646_v28 = vmul.f32 %v4859_v61, %v4859_v61  ;;  %v2647_v36 = vmul.f32 %v4861_v37, %v4861_v37  ;;  %v2648_v59 = vmul.f32 %v4863_v16, %v4863_v16 }
 0x210   :  { %v2651_v26 = vadd.f32 %v2650_v62, %v2636_v12  ;;  %v2649_v33 = vmul.f32 %v4865_v39, %v4865_v39  ;;  %v2677_v48 = vlaneseq }
 0x212   :  { %v2652_v9 = vadd.f32 %v2651_v26, %v2637_v4  ;;  %v2678_v56 = vshrl.u32 %v2677_v48, 7 }
 0x214   :  { %v2653_v32 = vadd.f32 %v2652_v9, %v2638_v8  ;;  %v2679_v53 = vsub.s32 0, %v2678_v56  ;;  %v3110_v8 = vld [vmem:[%s4965_s4] ss:$0 sm:$0xff] }
 0x216   :  { %v2654_v15 = vadd.f32 %v2653_v32, %v2639_v11 }
 0x218   :  { %v2655_v17 = vadd.f32 %v2654_v15, %v2640_v31 }
 0x21a   :  { %v2656_v18 = vadd.f32 %v2655_v17, %v2641_v40 }
 0x21c   :  { %v2657_v63 = vadd.f32 %v2656_v18, %v2642_v27 }
 0x21e   :  { %v2658_v49 = vadd.f32 %v2657_v63, %v2643_v55 }
 0x220   :  { %v2659_v52 = vadd.f32 %v2658_v49, %v2644_v23 }
 0x222   :  { %v2660_v29 = vadd.f32 %v2659_v52, %v2645_v41 }
 0x224   :  { %v2661_v50 = vadd.f32 %v2660_v29, %v2646_v28 }
 0x226   :  { %v2662_v51 = vadd.f32 %v2661_v50, %v2647_v36 }
 0x228   :  { %v2663_v34 = vadd.f32 %v2662_v51, %v2648_v59 }
 0x22a   :  { %v2664_v38 = vadd.f32 %v2663_v34, %v2649_v33 }
 0x22c   :  { %v2665_v58 = vrot.slane %v2664_v38, 4 }
 0x22e   :  { %v2666_v46 = vadd.f32 %v2665_v58, %v2664_v38 }
 0x230   :  { %v2667_v42 = vrot.slane %v2666_v46, 2 }
 0x232   :  { %v2668_v10 = vadd.f32 %v2667_v42, %v2666_v46 }
 0x234   :  { %v2669_v43 = vrot.slane %v2668_v10, 1 }
 0x236   :  { %v2670_v1 = vadd.f32 %v2669_v43, %v2668_v10 }
 0x238   :  { %v2671_v5 = vmul.f32 0.0078125, %v2670_v1 }
 0x23a   :  { %v2673_v47 = vadd.f32 1e-05, %v2671_v5 }
 0x23c   :  { %3830 = vrsqrt.f32 %v2673_v47 }
 0x246   :  { %v3831_v14 = vpop.eup %3830 }
 0x247   :  { %v2675_v54 = vmul.f32 %v3831_v14, %v2672_v6 }
 0x249   :  { %v2680_v7 = vrot.slane %v2675_v54, %v2679_v53 }
 0x24b   :  { %v2682_v57 = vmul.f32 %v2680_v7, %v4826_v60  ;;  %v2683_v13 = vmul.f32 %v2680_v7, %v4829_v2  ;;  %v2684_v24 = vmul.f32 %v2680_v7, %v4832_v20  ;;  %v2685_v0 = vmul.f32 %v2680_v7, %v4835_v25 }
 0x24c   :  { %v2686_v12 = vmul.f32 %v2680_v7, %v4838_v35  ;;  %v2687_v62 = vmul.f32 %v2680_v7, %v4841_v30  ;;  %v2688_v4 = vmul.f32 %v2680_v7, %v4844_v21  ;;  %v2689_v26 = vmul.f32 %v2680_v7, %v4847_v22 }
 0x24d   :  { %v2690_v60 = vmul.f32 %v2680_v7, %v4850_v45  ;;  %v2691_v2 = vmul.f32 %v2680_v7, %v4853_v19  ;;  %v2692_v20 = vmul.f32 %v2680_v7, %v4855_v44  ;;  %v2693_v25 = vmul.f32 %v2680_v7, %v4857_v3 }
 0x24e   :  { %v2694_v35 = vmul.f32 %v2680_v7, %v4859_v61  ;;  %v2695_v30 = vmul.f32 %v2680_v7, %v4861_v37  ;;  %v2696_v21 = vmul.f32 %v2680_v7, %v4863_v16  ;;  %v2697_v22 = vmul.f32 %v2680_v7, %v4865_v39 }
 0x24f   :  { %v2705_v9 = vadd.f32 %v3110_v8, %v2682_v57  ;;  %v2706_v11 = vadd.f32 %v3110_v8, %v2683_v13  ;;  %v2707_v32 = vadd.f32 %v3110_v8, %v2684_v24  ;;  %v2708_v31 = vadd.f32 %v3110_v8, %v2685_v0 }
 0x250   :  { %v2709_v15 = vadd.f32 %v3110_v8, %v2686_v12  ;;  %v2710_v45 = vadd.f32 %v3110_v8, %v2687_v62  ;;  %v2711_v40 = vadd.f32 %v3110_v8, %v2688_v4  ;;  %v2712_v19 = vadd.f32 %v3110_v8, %v2689_v26 }
 0x251   :  { %v2713_v17 = vadd.f32 %v3110_v8, %v2690_v60  ;;  %v2714_v44 = vadd.f32 %v3110_v8, %v2691_v2  ;;  %v2715_v27 = vadd.f32 %v3110_v8, %v2692_v20  ;;  %v2716_v3 = vadd.f32 %v3110_v8, %v2693_v25 }
 0x252   :  { %v2717_v18 = vadd.f32 %v3110_v8, %v2694_v35  ;;  %v2718_v61 = vadd.f32 %v3110_v8, %v2695_v30  ;;  %v2719_v55 = vadd.f32 %v3110_v8, %v2696_v21  ;;  %v2720_v37 = vadd.f32 %v3110_v8, %v2697_v22 }
 0x253   :  { %vm2721_vm0 = vcmp.ge.f32.partialorder %v2705_v9, 0.0  ;;  %vm2722_vm1 = vcmp.ge.f32.partialorder %v2706_v11, 0.0  ;;  %vm2723_vm2 = vcmp.ge.f32.partialorder %v2707_v32, 0.0  ;;  %vm2724_vm3 = vcmp.ge.f32.partialorder %v2708_v31, 0.0 }
 0x254   :  { %vm2725_vm4 = vcmp.ge.f32.partialorder %v2709_v15, 0.0  ;;  %vm2726_vm5 = vcmp.ge.f32.partialorder %v2710_v45, 0.0  ;;  %vm2727_vm6 = vcmp.ge.f32.partialorder %v2711_v40, 0.0  ;;  %vm2728_vm7 = vcmp.ge.f32.partialorder %v2712_v19, 0.0 }
 0x255   :  { %vm2729_vm8 = vcmp.ge.f32.partialorder %v2713_v17, 0.0  ;;  %vm2730_vm9 = vcmp.ge.f32.partialorder %v2714_v44, 0.0  ;;  %vm2731_vm10 = vcmp.ge.f32.partialorder %v2715_v27, 0.0  ;;  %vm2732_vm11 = vcmp.ge.f32.partialorder %v2716_v3, 0.0 }
 0x256   :  { %vm2733_vm12 = vcmp.ge.f32.partialorder %v2717_v18, 0.0  ;;  %vm2734_vm13 = vcmp.ge.f32.partialorder %v2718_v61, 0.0  ;;  %vm2735_vm14 = vcmp.ge.f32.partialorder %v2719_v55, 0.0  ;;  %vm2736_vm15 = vcmp.ge.f32.partialorder %v2720_v37, 0.0 }
 0x257   :  { %v2737_v16 = vmul.f32 0.2, %v2705_v9  ;;  %v2738_v39 = vmul.f32 0.2, %v2706_v11  ;;  %v2739_v63 = vmul.f32 0.2, %v2707_v32 }
 0x258   :  { %v2740_v23 = vmul.f32 0.2, %v2708_v31  ;;  %v2741_v49 = vmul.f32 0.2, %v2709_v15  ;;  %v2742_v41 = vmul.f32 0.2, %v2710_v45 }
 0x259   :  { %v2743_v52 = vmul.f32 0.2, %v2711_v40  ;;  %v2744_v28 = vmul.f32 0.2, %v2712_v19  ;;  %v2745_v29 = vmul.f32 0.2, %v2713_v17  ;;  %v2753_v36 = vsel %vm2721_vm0, %v2705_v9, %v2737_v16 }
 0x25a   :  { %v2746_v50 = vmul.f32 0.2, %v2714_v44  ;;  %v2747_v59 = vmul.f32 0.2, %v2715_v27  ;;  %v2748_v51 = vmul.f32 0.2, %v2716_v3  ;;  %v2754_v33 = vsel %vm2722_vm1, %v2706_v11, %v2738_v39 }
 0x25b   :  { %v2749_v34 = vmul.f32 0.2, %v2717_v18  ;;  %v2750_v38 = vmul.f32 0.2, %v2718_v61  ;;  %v2751_v58 = vmul.f32 0.2, %v2719_v55  ;;  %v2755_v46 = vsel %vm2723_vm2, %v2707_v32, %v2739_v63 }
 0x25c   :  { %v2752_v42 = vmul.f32 0.2, %v2720_v37  ;;  %v2756_v10 = vsel %vm2724_vm3, %v2708_v31, %v2740_v23  ;;  %v2757_v43 = vsel %vm2725_vm4, %v2709_v15, %v2741_v49  ;;  %v2758_v1 = vsel %vm2726_vm5, %v2710_v45, %v2742_v41 }
 0x25d   :  { %v2759_v5 = vsel %vm2727_vm6, %v2711_v40, %v2743_v52  ;;  %v2760_v47 = vsel %vm2728_vm7, %v2712_v19, %v2744_v28  ;;  %v2761_v48 = vsel %vm2729_vm8, %v2713_v17, %v2745_v29  ;;  %v2762_v56 = vsel %vm2730_vm9, %v2714_v44, %v2746_v50 }
 0x25e   :  { %v2763_v6 = vsel %vm2731_vm10, %v2715_v27, %v2747_v59  ;;  %v2764_v53 = vsel %vm2732_vm11, %v2716_v3, %v2748_v51  ;;  %v2765_v14 = vsel %vm2733_vm12, %v2717_v18, %v2749_v34  ;;  %v2766_v54 = vsel %vm2734_vm13, %v2718_v61, %v2750_v38 }
 0x25f   :  { %v2767_v7 = vsel %vm2735_vm14, %v2719_v55, %v2751_v58  ;;  %v2768_v57 = vsel %vm2736_vm15, %v2720_v37, %v2752_v42  ;;  %v3146_v13 = vpack.c.bf16 %v2754_v33, %v2753_v36  ;;  %v3151_v24 = vpack.c.bf16 %v2756_v10, %v2755_v46 }
 0x260   :  { %v3156_v0 = vpack.c.bf16 %v2758_v1, %v2757_v43  ;;  %v3161_v12 = vpack.c.bf16 %v2760_v47, %v2759_v5  ;;  %v3166_v62 = vpack.c.bf16 %v2762_v56, %v2761_v48  ;;  %v3171_v4 = vpack.c.bf16 %v2764_v53, %v2763_v6 }
 0x261   :  { %3147 = vst [vmem:[%s4966_s5] sm:$0xff] %v3146_v13   ;;  %3183 = vst [vmem:[%s4966_s5 + $0x8] sm:$0xff] %v3151_v24   ;;  %v3176_v26 = vpack.c.bf16 %v2766_v54, %v2765_v14  ;;  %v3181_v8 = vpack.c.bf16 %v2768_v57, %v2767_v7 }
 0x262   :  { %3184 = vst [vmem:[%s4966_s5 + $0x10] sm:$0xff] %v3156_v0   ;;  %3185 = vst [vmem:[%s4966_s5 + $0x18] sm:$0xff] %v3161_v12  }
 0x263   :  { %3186 = vst [vmem:[%s4966_s5 + $0x20] sm:$0xff] %v3166_v62   ;;  %3187 = vst [vmem:[%s4966_s5 + $0x28] sm:$0xff] %v3171_v4  }
 0x264   :  { %3188 = vst [vmem:[%s4966_s5 + $0x30] sm:$0xff] %v3176_v26   ;;  %3189 = vst [vmem:[%s4966_s5 + $0x38] sm:$0xff] %v3181_v8  }

// kernel: discriminator_forward.7
= control target key start
LH: loop header
LB: loop body
LE: loop exit
PB: predicated region body
PF: predicated region fallthrough
CT: control target
= control target key end

     0   :  { %s2785_s1 = inlined_call_operand.vmem [shape: bf16[2048,128], index: 1, kind: input, shape index: {}]   ;;  %s2786_s0 = inlined_call_operand.vmem [shape: bf16[32,2048], index: 0, kind: input, shape index: {}]   ;;  %s2787_s2 = inlined_call_operand.vmem [shape: f32[1,128], index: 2, kind: input, shape index: {}]   ;;  %s2788_s3 = inlined_call_operand.vmem [shape: f32[1,128], index: 3, kind: input, shape index: {}]   ;;  %s2789_s4 = inlined_call_operand.vmem [shape: f32[1,128], index: 4, kind: input, shape index: {}]   ;;  %s2790_s5 = inlined_call_operand.vmem [shape: bf16[32,128], index: 5, kind: output, shape index: {}]  }
   0x1   :  { %v2130_v0 = vld [vmem:[%s2785_s1 + $0x40] sm:$0xff]   ;;  %v2134_v4 = vld [vmem:[%s2785_s1 + $0x48] sm:$0xff]   ;;  %v2138_v8 = vld [vmem:[%s2785_s1 + $0x50] sm:$0xff]  }
   0x2   :  { %v2131_v1 = vld [vmem:[%s2785_s1 + $0xc0] sm:$0xff]   ;;  %1906 = vmatprep.subr.bf16.mxu0 %v2130_v0  ;;  %v2135_v5 = vld [vmem:[%s2785_s1 + $0xc8] sm:$0xff]   ;;  %v2139_v9 = vld [vmem:[%s2785_s1 + $0xd0] sm:$0xff]  }
   0x3   :  { %v2132_v2 = vld [vmem:[%s2785_s1] sm:$0xff]   ;;  %1934 = vmatprep.subr.bf16.mxu1 %v2131_v1  ;;  %v2136_v6 = vld [vmem:[%s2785_s1 + $0x8] sm:$0xff]   ;;  %v2140_v10 = vld [vmem:[%s2785_s1 + $0x10] sm:$0xff]  }
   0x4   :  { %v2133_v3 = vld [vmem:[%s2785_s1 + $0x80] sm:$0xff]   ;;  %1907 = vmatpush3.bf16.msra.mxu0 %v2132_v2  ;;  %v2137_v7 = vld [vmem:[%s2785_s1 + $0x88] sm:$0xff]   ;;  %v2141_v11 = vld [vmem:[%s2785_s1 + $0x90] sm:$0xff]  }
   0x5   :  { %1935 = vmatpush3.bf16.msra.mxu1 %v2133_v3  ;;  %1908 = vmatprep.subr.bf16.mxu0 %v2134_v4  ;;  %v2142_v12 = vld [vmem:[%s2785_s1 + $0x58] sm:$0xff]   ;;  %v2146_v16 = vld [vmem:[%s2785_s1 + $0x60] sm:$0xff]   ;;  %v2150_v20 = vld [vmem:[%s2785_s1 + $0x68] sm:$0xff]  }
   0x6   :  { %1936 = vmatprep.subr.bf16.mxu1 %v2135_v5  ;;  %v2143_v13 = vld [vmem:[%s2785_s1 + $0xd8] sm:$0xff]   ;;  %v2147_v17 = vld [vmem:[%s2785_s1 + $0xe0] sm:$0xff]   ;;  %v2151_v21 = vld [vmem:[%s2785_s1 + $0xe8] sm:$0xff]  }
   0x7   :  { %v2144_v14 = vld [vmem:[%s2785_s1 + $0x18] sm:$0xff]   ;;  %v2148_v18 = vld [vmem:[%s2785_s1 + $0x20] sm:$0xff]   ;;  %v2152_v22 = vld [vmem:[%s2785_s1 + $0x28] sm:$0xff]  }
   0x8   :  { %1909 = vmatpush3.bf16.msra.mxu0 %v2136_v6  ;;  %v2145_v15 = vld [vmem:[%s2785_s1 + $0x98] sm:$0xff]   ;;  %v2149_v19 = vld [vmem:[%s2785_s1 + $0xa0] sm:$0xff]   ;;  %v2153_v23 = vld [vmem:[%s2785_s1 + $0xa8] sm:$0xff]  }
   0x9   :  { %1937 = vmatpush3.bf16.msra.mxu1 %v2137_v7  ;;  %1910 = vmatprep.subr.bf16.mxu0 %v2138_v8  ;;  %v2154_v24 = vld [vmem:[%s2785_s1 + $0x70] sm:$0xff]   ;;  %v2158_v28 = vld [vmem:[%s2785_s1 + $0x78] sm:$0xff]   ;;  %v21_v32 = vld [vmem:[%s2786_s0] sm:$0xff] }
   0xa   :  { %1938 = vmatprep.subr.bf16.mxu1 %v2139_v9  ;;  %v2155_v25 = vld [vmem:[%s2785_s1 + $0xf0] sm:$0xff]   ;;  %v2159_v29 = vld [vmem:[%s2785_s1 + $0xf8] sm:$0xff]   ;;  %v29_v33 = vld [vmem:[%s2786_s0 + $0x40] sm:$0xff] }
   0xb   :  { %v2156_v26 = vld [vmem:[%s2785_s1 + $0x30] sm:$0xff]   ;;  %v2160_v30 = vld [vmem:[%s2785_s1 + $0x38] sm:$0xff]   ;;  %v22_v34 = vld [vmem:[%s2786_s0 + $0x8] sm:$0xff]  ;;  %v1726_v35 = vcombine.low %v21_v32, %v29_v33  ;;  %v1727_v36 = vcombine.high %v21_v32, %v29_v33 }
   0xc   :  { %1911 = vmatpush3.bf16.msra.mxu0 %v2140_v10  ;;  %v2157_v27 = vld [vmem:[%s2785_s1 + $0xb0] sm:$0xff]   ;;  %v2161_v31 = vld [vmem:[%s2785_s1 + $0xb8] sm:$0xff]   ;;  %v30_v37 = vld [vmem:[%s2786_s0 + $0x48] sm:$0xff] }
   0xd   :  { %1939 = vmatpush3.bf16.msra.mxu1 %v2141_v11  ;;  %1912 = vmatprep.subr.bf16.mxu0 %v2142_v12  ;;  %v1728_v38 = vcombine.low %v22_v34, %v30_v37  ;;  %v1729_v39 = vcombine.high %v22_v34, %v30_v37  ;;  %v2162_v40 = vld [vmem:[%s2785_s1 + $0x140] sm:$0xff]   ;;  %v2166_v44 = vld [vmem:[%s2785_s1 + $0x148] sm:$0xff]   ;;  %v2170_v48 = vld [vmem:[%s2785_s1 + $0x150] sm:$0xff]  }
   0xe   :  { %1940 = vmatprep.subr.bf16.mxu1 %v2143_v13  ;;  %1276 = vmatprep.mubr.bf16.mxu0 %v1727_v36  ;;  %v2163_v41 = vld [vmem:[%s2785_s1 + $0x1c0] sm:$0xff]   ;;  %v2167_v45 = vld [vmem:[%s2785_s1 + $0x1c8] sm:$0xff]   ;;  %v2171_v49 = vld [vmem:[%s2785_s1 + $0x1d0] sm:$0xff]  }
   0xf   :  { %1325 = vmatprep.mubr.bf16.mxu1 %v1729_v39  ;;  %v2164_v42 = vld [vmem:[%s2785_s1 + $0x100] sm:$0xff]   ;;  %v2168_v46 = vld [vmem:[%s2785_s1 + $0x108] sm:$0xff]   ;;  %v2172_v50 = vld [vmem:[%s2785_s1 + $0x110] sm:$0xff]  }
  0x10   :  { %1913 = vmatpush3.bf16.msra.mxu0 %v2144_v14  ;;  %v2165_v43 = vld [vmem:[%s2785_s1 + $0x180] sm:$0xff]   ;;  %v2169_v47 = vld [vmem:[%s2785_s1 + $0x188] sm:$0xff]   ;;  %v2173_v51 = vld [vmem:[%s2785_s1 + $0x190] sm:$0xff]  }
  0x11   :  { %1941 = vmatpush3.bf16.msra.mxu1 %v2145_v15  ;;  %1914 = vmatprep.subr.bf16.mxu0 %v2146_v16  ;;  %v2174_v52 = vld [vmem:[%s2785_s1 + $0x158] sm:$0xff]   ;;  %v2178_v56 = vld [vmem:[%s2785_s1 + $0x160] sm:$0xff]   ;;  %v2182_v60 = vld [vmem:[%s2785_s1 + $0x168] sm:$0xff]  }
  0x12   :  { %1942 = vmatprep.subr.bf16.mxu1 %v2147_v17  ;;  %v2175_v53 = vld [vmem:[%s2785_s1 + $0x1d8] sm:$0xff]   ;;  %v2179_v57 = vld [vmem:[%s2785_s1 + $0x1e0] sm:$0xff]   ;;  %v2183_v61 = vld [vmem:[%s2785_s1 + $0x1e8] sm:$0xff]  }
  0x13   :  { %v2176_v54 = vld [vmem:[%s2785_s1 + $0x118] sm:$0xff]   ;;  %v2180_v58 = vld [vmem:[%s2785_s1 + $0x120] sm:$0xff]   ;;  %v2184_v1 = vld [vmem:[%s2785_s1 + $0x128] sm:$0xff]  }
  0x14   :  { %1915 = vmatpush3.bf16.msra.mxu0 %v2148_v18  ;;  %v2177_v55 = vld [vmem:[%s2785_s1 + $0x198] sm:$0xff]   ;;  %v2181_v59 = vld [vmem:[%s2785_s1 + $0x1a0] sm:$0xff]   ;;  %v2185_v3 = vld [vmem:[%s2785_s1 + $0x1a8] sm:$0xff]  }
  0x15   :  { %1943 = vmatpush3.bf16.msra.mxu1 %v2149_v19  ;;  %1916 = vmatprep.subr.bf16.mxu0 %v2150_v20  ;;  %v37_v62 = vld [vmem:[%s2786_s0 + $0x80] sm:$0xff]  ;;  %v38_v4 = vld [vmem:[%s2786_s0 + $0x88] sm:$0xff]  ;;  %v2186_v8 = vld [vmem:[%s2785_s1 + $0x170] sm:$0xff]  }
  0x16   :  { %1944 = vmatprep.subr.bf16.mxu1 %v2151_v21  ;;  %v45_v63 = vld [vmem:[%s2786_s0 + $0xc0] sm:$0xff]  ;;  %v46_v5 = vld [vmem:[%s2786_s0 + $0xc8] sm:$0xff]  ;;  %v2187_v9 = vld [vmem:[%s2785_s1 + $0x1f0] sm:$0xff]  }
  0x17   :  { %v1743_v0 = vcombine.high %v37_v62, %v45_v63  ;;  %v1742_v2 = vcombine.low %v37_v62, %v45_v63  ;;  %v1745_v6 = vcombine.high %v38_v4, %v46_v5  ;;  %v1744_v7 = vcombine.low %v38_v4, %v46_v5  ;;  %v2188_v10 = vld [vmem:[%s2785_s1 + $0x130] sm:$0xff]   ;;  %v2190_v12 = vld [vmem:[%s2785_s1 + $0x178] sm:$0xff]   ;;  %v26_v4 = vld [vmem:[%s2786_s0 + $0x28] sm:$0xff] }
  0x18   :  { %1917 = vmatpush3.bf16.msra.mxu0 %v2152_v22  ;;  %v2189_v11 = vld [vmem:[%s2785_s1 + $0x1b0] sm:$0xff]   ;;  %v2191_v13 = vld [vmem:[%s2785_s1 + $0x1f8] sm:$0xff]   ;;  %v34_v5 = vld [vmem:[%s2786_s0 + $0x68] sm:$0xff] }
  0x19   :  { %1945 = vmatpush3.bf16.msra.mxu1 %v2153_v23  ;;  %1918 = vmatprep.subr.bf16.mxu0 %v2154_v24  ;;  %v2192_v14 = vld [vmem:[%s2785_s1 + $0x138] sm:$0xff]   ;;  %v23_v16 = vld [vmem:[%s2786_s0 + $0x10] sm:$0xff]  ;;  %v2194_v24 = vld [vmem:[%s2785_s1 + $0x240] sm:$0xff]  }
  0x1a   :  { %1946 = vmatprep.subr.bf16.mxu1 %v2155_v25  ;;  %v2193_v15 = vld [vmem:[%s2785_s1 + $0x1b8] sm:$0xff]   ;;  %v31_v17 = vld [vmem:[%s2786_s0 + $0x50] sm:$0xff]  ;;  %v2195_v25 = vld [vmem:[%s2785_s1 + $0x2c0] sm:$0xff]  }
  0x1b   :  { %v24_v18 = vld [vmem:[%s2786_s0 + $0x18] sm:$0xff]  ;;  %v1730_v20 = vcombine.low %v23_v16, %v31_v17  ;;  %v1731_v21 = vcombine.high %v23_v16, %v31_v17  ;;  %v39_v32 = vld [vmem:[%s2786_s0 + $0x90] sm:$0xff]  ;;  %v41_v16 = vld [vmem:[%s2786_s0 + $0xa0] sm:$0xff] }
  0x1c   :  { %1919 = vmatpush3.bf16.msra.mxu0 %v2156_v26  ;;  %v32_v19 = vld [vmem:[%s2786_s0 + $0x58] sm:$0xff]  ;;  %v2196_v26 = vld [vmem:[%s2785_s1 + $0x200] sm:$0xff]   ;;  %v47_v33 = vld [vmem:[%s2786_s0 + $0xd0] sm:$0xff] }
  0x1d   :  { %1947 = vmatpush3.bf16.msra.mxu1 %v2157_v27  ;;  %1920 = vmatprep.subr.bf16.mxu0 %v2158_v28  ;;  %v1732_v22 = vcombine.low %v24_v18, %v32_v19  ;;  %v1733_v23 = vcombine.high %v24_v18, %v32_v19  ;;  %v2197_v27 = vld [vmem:[%s2785_s1 + $0x280] sm:$0xff]   ;;  %v2198_v28 = vld [vmem:[%s2785_s1 + $0x248] sm:$0xff]   ;;  %v1747_v34 = vcombine.high %v39_v32, %v47_v33  ;;  %v2202_v36 = vld [vmem:[%s2785_s1 + $0x250] sm:$0xff]  }
  0x1e   :  { %1948 = vmatprep.subr.bf16.mxu1 %v2159_v29  ;;  %v2199_v29 = vld [vmem:[%s2785_s1 + $0x2c8] sm:$0xff]   ;;  %v2203_v37 = vld [vmem:[%s2785_s1 + $0x2d0] sm:$0xff]   ;;  %v48_v39 = vld [vmem:[%s2786_s0 + $0xd8] sm:$0xff] }
  0x1f   :  { %v2224_v62 = vld [vmem:[%s2785_s1 + $0x238] sm:$0xff]   ;;  %v49_v17 = vld [vmem:[%s2786_s0 + $0xe0] sm:$0xff] }
  0x20   :  { %1921 = vmatpush3.bf16.msra.mxu0 %v2160_v30  ;;  %v2200_v30 = vld [vmem:[%s2785_s1 + $0x208] sm:$0xff]   ;;  %v2225_v63 = vld [vmem:[%s2785_s1 + $0x2b8] sm:$0xff]   ;;  %v1751_v18 = vcombine.high %v41_v16, %v49_v17  ;;  %v1750_v19 = vcombine.low %v41_v16, %v49_v17 }
  0x21   :  { %1949 = vmatpush3.bf16.msra.mxu1 %v2161_v31  ;;  %1962 = vmatprep.subr.bf16.mxu0 %v2162_v40  ;;  %v2201_v31 = vld [vmem:[%s2785_s1 + $0x288] sm:$0xff]  }
  0x22   :  { %1990 = vmatprep.subr.bf16.mxu1 %v2163_v41  ;;  %v2204_v41 = vld [vmem:[%s2785_s1 + $0x210] sm:$0xff]  }
  0x23   :  { %1277 = vmatmul.mubr.bf16.vlgmr.msra.gmra.mrb[0].mxu0 %v1726_v35  ;;  %v1746_v35 = vcombine.low %v39_v32, %v47_v33  ;;  %v2242_v32 = vld [vmem:[%s2785_s1 + $0x360] sm:$0xff]  }
  0x24   :  { %1326 = vmatmul.mubr.bf16.vlgmr.msra.gmra.mrb[0].mxu1 %v1728_v38  ;;  %1963 = vmatpush3.bf16.msra.mxu0 %v2164_v42  ;;  %v40_v38 = vld [vmem:[%s2786_s0 + $0x98] sm:$0xff]  ;;  %v2243_v33 = vld [vmem:[%s2785_s1 + $0x3e0] sm:$0xff]  }
  0x25   :  { %1991 = vmatpush3.bf16.msra.mxu1 %v2165_v43  ;;  %1964 = vmatprep.subr.bf16.mxu0 %v2166_v44  ;;  %v1749_v40 = vcombine.high %v40_v38, %v48_v39  ;;  %v1748_v42 = vcombine.low %v40_v38, %v48_v39  ;;  %v2205_v43 = vld [vmem:[%s2785_s1 + $0x290] sm:$0xff]   ;;  %v2206_v44 = vld [vmem:[%s2785_s1 + $0x258] sm:$0xff]   ;;  %v2248_v38 = vld [vmem:[%s2785_s1 + $0x328] sm:$0xff]  }
  0x26   :  { %1992 = vmatprep.subr.bf16.mxu1 %v2167_v45  ;;  %1284 = vmatprep.mubr.bf16.mxu0 %v1743_v0  ;;  %v2207_v45 = vld [vmem:[%s2785_s1 + $0x2d8] sm:$0xff]   ;;  %v25_v0 = vld [vmem:[%s2786_s0 + $0x20] sm:$0xff]  ;;  %v2249_v39 = vld [vmem:[%s2785_s1 + $0x3a8] sm:$0xff]  }
  0x27   :  { %1333 = vmatprep.mubr.bf16.mxu1 %v1745_v6  ;;  %v1736_v6 = vcombine.low %v26_v4, %v34_v5 }
  0x28   :  { %1965 = vmatpush3.bf16.msra.mxu0 %v2168_v46  ;;  %v2208_v46 = vld [vmem:[%s2785_s1 + $0x218] sm:$0xff]  }
  0x29   :  { %1993 = vmatpush3.bf16.msra.mxu1 %v2169_v47  ;;  %1966 = vmatprep.subr.bf16.mxu0 %v2170_v48  ;;  %v2209_v47 = vld [vmem:[%s2785_s1 + $0x298] sm:$0xff]   ;;  %v2210_v48 = vld [vmem:[%s2785_s1 + $0x260] sm:$0xff]  }
  0x2a   :  { %1994 = vmatprep.subr.bf16.mxu1 %v2171_v49  ;;  %v2211_v49 = vld [vmem:[%s2785_s1 + $0x2e0] sm:$0xff]  }
  0x2b   :  { %1285 = vmatmul.mubr.bf16.gmra.mrb[4].mxu0 %v1742_v2 }
  0x2c   :  { %1967 = vmatpush3.bf16.msra.mxu0 %v2172_v50  ;;  %1334 = vmatmul.mubr.bf16.gmra.mrb[4].mxu1 %v1744_v7  ;;  %v2212_v50 = vld [vmem:[%s2785_s1 + $0x220] sm:$0xff]   ;;  %v1737_v7 = vcombine.high %v26_v4, %v34_v5 }
  0x2d   :  { %1995 = vmatpush3.bf16.msra.mxu1 %v2173_v51  ;;  %1968 = vmatprep.subr.bf16.mxu0 %v2174_v52  ;;  %v2213_v51 = vld [vmem:[%s2785_s1 + $0x2a0] sm:$0xff]   ;;  %v2214_v52 = vld [vmem:[%s2785_s1 + $0x268] sm:$0xff]  }
  0x2e   :  { %1996 = vmatprep.subr.bf16.mxu1 %v2175_v53  ;;  %1374 = vmatprep.mubr.bf16.mxu0 %v1731_v21  ;;  %v2215_v53 = vld [vmem:[%s2785_s1 + $0x2e8] sm:$0xff]   ;;  %v2235_v21 = vld [vmem:[%s2785_s1 + $0x3d0] sm:$0xff]  }
  0x2f   :  { %1423 = vmatprep.mubr.bf16.mxu1 %v1733_v23  ;;  %v50_v23 = vld [vmem:[%s2786_s0 + $0xe8] sm:$0xff] }
  0x30   :  { %1969 = vmatpush3.bf16.msra.mxu0 %v2176_v54  ;;  %v2216_v54 = vld [vmem:[%s2785_s1 + $0x228] sm:$0xff]  }
  0x31   :  { %1997 = vmatpush3.bf16.msra.mxu1 %v2177_v55  ;;  %1970 = vmatprep.subr.bf16.mxu0 %v2178_v56  ;;  %v2217_v55 = vld [vmem:[%s2785_s1 + $0x2a8] sm:$0xff]   ;;  %v2218_v56 = vld [vmem:[%s2785_s1 + $0x270] sm:$0xff]  }
  0x32   :  { %1998 = vmatprep.subr.bf16.mxu1 %v2179_v57  ;;  %v2219_v57 = vld [vmem:[%s2785_s1 + $0x2f0] sm:$0xff]  }
  0x34   :  { %1971 = vmatpush3.bf16.msra.mxu0 %v2180_v58  ;;  %v2220_v58 = vld [vmem:[%s2785_s1 + $0x230] sm:$0xff]  }
  0x35   :  { %1999 = vmatpush3.bf16.msra.mxu1 %v2181_v59  ;;  %1972 = vmatprep.subr.bf16.mxu0 %v2182_v60  ;;  %v2221_v59 = vld [vmem:[%s2785_s1 + $0x2b0] sm:$0xff]   ;;  %v2222_v60 = vld [vmem:[%s2785_s1 + $0x278] sm:$0xff]  }
  0x36   :  { %2000 = vmatprep.subr.bf16.mxu1 %v2183_v61  ;;  %v2223_v61 = vld [vmem:[%s2785_s1 + $0x2f8] sm:$0xff]  }
  0x38   :  { %1973 = vmatpush3.bf16.msra.mxu0 %v2184_v1  ;;  %v33_v1 = vld [vmem:[%s2786_s0 + $0x60] sm:$0xff] }
  0x39   :  { %2001 = vmatpush3.bf16.msra.mxu1 %v2185_v3  ;;  %1974 = vmatprep.subr.bf16.mxu0 %v2186_v8  ;;  %v1734_v2 = vcombine.low %v25_v0, %v33_v1  ;;  %v1735_v3 = vcombine.high %v25_v0, %v33_v1  ;;  %v2226_v8 = vld [vmem:[%s2785_s1 + $0x340] sm:$0xff]  }
  0x3a   :  { %2002 = vmatprep.subr.bf16.mxu1 %v2187_v9  ;;  %v2227_v9 = vld [vmem:[%s2785_s1 + $0x3c0] sm:$0xff]  }
  0x3c   :  { %1975 = vmatpush3.bf16.msra.mxu0 %v2188_v10  ;;  %v2228_v10 = vld [vmem:[%s2785_s1 + $0x300] sm:$0xff]  }
  0x3d   :  { %2003 = vmatpush3.bf16.msra.mxu1 %v2189_v11  ;;  %1976 = vmatprep.subr.bf16.mxu0 %v2190_v12  ;;  %v2229_v11 = vld [vmem:[%s2785_s1 + $0x380] sm:$0xff]   ;;  %v2230_v12 = vld [vmem:[%s2785_s1 + $0x348] sm:$0xff]  }
  0x3e   :  { %2004 = vmatprep.subr.bf16.mxu1 %v2191_v13  ;;  %v2231_v13 = vld [vmem:[%s2785_s1 + $0x3c8] sm:$0xff]  }
  0x40   :  { %1977 = vmatpush3.bf16.msra.mxu0 %v2192_v14  ;;  %v2232_v14 = vld [vmem:[%s2785_s1 + $0x308] sm:$0xff]  }
  0x41   :  { %2005 = vmatpush3.bf16.msra.mxu1 %v2193_v15  ;;  %2018 = vmatprep.subr.bf16.mxu0 %v2194_v24  ;;  %v2233_v15 = vld [vmem:[%s2785_s1 + $0x388] sm:$0xff]  }
  0x42   :  { %2046 = vmatprep.subr.bf16.mxu1 %v2195_v25  ;;  %v2236_v25 = vld [vmem:[%s2785_s1 + $0x310] sm:$0xff]  }
  0x43   :  { %1375 = vmatmul.mubr.bf16.vlgmr.msra.gmra.mrb[8].mxu0 %v1730_v20  ;;  %v2234_v20 = vld [vmem:[%s2785_s1 + $0x350] sm:$0xff]  }
  0x44   :  { %1424 = vmatmul.mubr.bf16.vlgmr.msra.gmra.mrb[8].mxu1 %v1732_v22  ;;  %2019 = vmatpush3.bf16.msra.mxu0 %v2196_v26  ;;  %v42_v22 = vld [vmem:[%s2786_s0 + $0xa8] sm:$0xff] }
  0x45   :  { %2047 = vmatpush3.bf16.msra.mxu1 %v2197_v27  ;;  %2020 = vmatprep.subr.bf16.mxu0 %v2198_v28  ;;  %v1753_v24 = vcombine.high %v42_v22, %v50_v23  ;;  %v1752_v26 = vcombine.low %v42_v22, %v50_v23  ;;  %v2237_v27 = vld [vmem:[%s2785_s1 + $0x390] sm:$0xff]   ;;  %v2238_v28 = vld [vmem:[%s2785_s1 + $0x358] sm:$0xff]  }
  0x46   :  { %2048 = vmatprep.subr.bf16.mxu1 %v2199_v29  ;;  %1382 = vmatprep.mubr.bf16.mxu0 %v1747_v34  ;;  %v2239_v29 = vld [vmem:[%s2785_s1 + $0x3d8] sm:$0xff]   ;;  %v2244_v34 = vld [vmem:[%s2785_s1 + $0x320] sm:$0xff]  }
  0x47   :  { %1431 = vmatprep.mubr.bf16.mxu1 %v1749_v40  ;;  %v2250_v40 = vld [vmem:[%s2785_s1 + $0x370] sm:$0xff]  }
  0x48   :  { %2021 = vmatpush3.bf16.msra.mxu0 %v2200_v30  ;;  %v2240_v30 = vld [vmem:[%s2785_s1 + $0x318] sm:$0xff]  }
  0x49   :  { %2049 = vmatpush3.bf16.msra.mxu1 %v2201_v31  ;;  %2022 = vmatprep.subr.bf16.mxu0 %v2202_v36  ;;  %v2241_v31 = vld [vmem:[%s2785_s1 + $0x398] sm:$0xff]   ;;  %v2246_v36 = vld [vmem:[%s2785_s1 + $0x368] sm:$0xff]  }
  0x4a   :  { %2050 = vmatprep.subr.bf16.mxu1 %v2203_v37  ;;  %v2247_v37 = vld [vmem:[%s2785_s1 + $0x3e8] sm:$0xff]  }
  0x4b   :  { %1383 = vmatmul.mubr.bf16.gmra.mrb[12].mxu0 %v1746_v35  ;;  %v2245_v35 = vld [vmem:[%s2785_s1 + $0x3a0] sm:$0xff]  }
  0x4c   :  { %2023 = vmatpush3.bf16.msra.mxu0 %v2204_v41  ;;  %1432 = vmatmul.mubr.bf16.gmra.mrb[12].mxu1 %v1748_v42  ;;  %v2251_v41 = vld [vmem:[%s2785_s1 + $0x3f0] sm:$0xff]  }
  0x4d   :  { %2051 = vmatpush3.bf16.msra.mxu1 %v2205_v43  ;;  %2024 = vmatprep.subr.bf16.mxu0 %v2206_v44  ;;  %v2252_v42 = vld [vmem:[%s2785_s1 + $0x330] sm:$0xff]   ;;  %v2254_v44 = vld [vmem:[%s2785_s1 + $0x378] sm:$0xff]  }
  0x4e   :  { %2052 = vmatprep.subr.bf16.mxu1 %v2207_v45  ;;  %1472 = vmatprep.mubr.bf16.mxu0 %v1735_v3  ;;  %v2253_v43 = vld [vmem:[%s2785_s1 + $0x3b0] sm:$0xff]   ;;  %v2255_v45 = vld [vmem:[%s2785_s1 + $0x3f8] sm:$0xff]  }
  0x4f   :  { %1521 = vmatprep.mubr.bf16.mxu1 %v1737_v7 }
  0x50   :  { %2025 = vmatpush3.bf16.msra.mxu0 %v2208_v46  ;;  %v2256_v46 = vld [vmem:[%s2785_s1 + $0x338] sm:$0xff]  }
  0x51   :  { %2053 = vmatpush3.bf16.msra.mxu1 %v2209_v47  ;;  %2026 = vmatprep.subr.bf16.mxu0 %v2210_v48  ;;  %v2257_v47 = vld [vmem:[%s2785_s1 + $0x3b8] sm:$0xff]   ;;  %v27_v48 = vld [vmem:[%s2786_s0 + $0x30] sm:$0xff] }
  0x52   :  { %2054 = vmatprep.subr.bf16.mxu1 %v2211_v49  ;;  %v35_v49 = vld [vmem:[%s2786_s0 + $0x70] sm:$0xff] }
  0x54   :  { %2027 = vmatpush3.bf16.msra.mxu0 %v2212_v50  ;;  %v28_v50 = vld [vmem:[%s2786_s0 + $0x38] sm:$0xff] }
  0x55   :  { %2055 = vmatpush3.bf16.msra.mxu1 %v2213_v51  ;;  %2028 = vmatprep.subr.bf16.mxu0 %v2214_v52  ;;  %v1738_v51 = vcombine.low %v27_v48, %v35_v49  ;;  %v1739_v52 = vcombine.high %v27_v48, %v35_v49 }
  0x56   :  { %2056 = vmatprep.subr.bf16.mxu1 %v2215_v53  ;;  %v36_v53 = vld [vmem:[%s2786_s0 + $0x78] sm:$0xff] }
  0x58   :  { %2029 = vmatpush3.bf16.msra.mxu0 %v2216_v54  ;;  %v43_v54 = vld [vmem:[%s2786_s0 + $0xb0] sm:$0xff] }
  0x59   :  { %2057 = vmatpush3.bf16.msra.mxu1 %v2217_v55  ;;  %2030 = vmatprep.subr.bf16.mxu0 %v2218_v56  ;;  %v51_v55 = vld [vmem:[%s2786_s0 + $0xf0] sm:$0xff]  ;;  %v1740_v56 = vcombine.low %v28_v50, %v36_v53 }
  0x5a   :  { %2058 = vmatprep.subr.bf16.mxu1 %v2219_v57  ;;  %v1741_v57 = vcombine.high %v28_v50, %v36_v53 }
  0x5c   :  { %2031 = vmatpush3.bf16.msra.mxu0 %v2220_v58  ;;  %v1755_v58 = vcombine.high %v43_v54, %v51_v55 }
  0x5d   :  { %2059 = vmatpush3.bf16.msra.mxu1 %v2221_v59  ;;  %2032 = vmatprep.subr.bf16.mxu0 %v2222_v60  ;;  %v44_v59 = vld [vmem:[%s2786_s0 + $0xb8] sm:$0xff] }
  0x5e   :  { %2060 = vmatprep.subr.bf16.mxu1 %v2223_v61  ;;  %v52_v60 = vld [vmem:[%s2786_s0 + $0xf8] sm:$0xff] }
  0x5f   :  { %v1757_v61 = vcombine.high %v44_v59, %v52_v60 }
  0x60   :  { %2033 = vmatpush3.bf16.msra.mxu0 %v2224_v62  ;;  %v1754_v62 = vcombine.low %v43_v54, %v51_v55 }
  0x61   :  { %2061 = vmatpush3.bf16.msra.mxu1 %v2225_v63  ;;  %2074 = vmatprep.subr.bf16.mxu0 %v2226_v8  ;;  %v1756_v63 = vcombine.low %v44_v59, %v52_v60 }
  0x62   :  { %2102 = vmatprep.subr.bf16.mxu1 %v2227_v9 }
  0x63   :  { %1473 = vmatmul.mubr.bf16.vlgmr.msra.gmra.mrb[16].mxu0 %v1734_v2  ;;  %v1725_v2 = vld [vmem:[%s2787_s2] ss:$0 sm:$0xff] }
  0x64   :  { %1522 = vmatmul.mubr.bf16.vlgmr.msra.gmra.mrb[16].mxu1 %v1736_v6  ;;  %2075 = vmatpush3.bf16.msra.mxu0 %v2228_v10 }
  0x65   :  { %2103 = vmatpush3.bf16.msra.mxu1 %v2229_v11  ;;  %2076 = vmatprep.subr.bf16.mxu0 %v2230_v12 }
  0x66   :  { %2104 = vmatprep.subr.bf16.mxu1 %v2231_v13  ;;  %1480 = vmatprep.mubr.bf16.mxu0 %v1751_v18 }
  0x67   :  { %1529 = vmatprep.mubr.bf16.mxu1 %v1753_v24 }
  0x68   :  { %2077 = vmatpush3.bf16.msra.mxu0 %v2232_v14 }
  0x69   :  { %2105 = vmatpush3.bf16.msra.mxu1 %v2233_v15  ;;  %2078 = vmatprep.subr.bf16.mxu0 %v2234_v20 }
  0x6a   :  { %2106 = vmatprep.subr.bf16.mxu1 %v2235_v21 }
  0x6b   :  { %1481 = vmatmul.mubr.bf16.gmra.mrb[20].mxu0 %v1750_v19 }
  0x6c   :  { %2079 = vmatpush3.bf16.msra.mxu0 %v2236_v25  ;;  %1530 = vmatmul.mubr.bf16.gmra.mrb[20].mxu1 %v1752_v26 }
  0x6d   :  { %2107 = vmatpush3.bf16.msra.mxu1 %v2237_v27  ;;  %2080 = vmatprep.subr.bf16.mxu0 %v2238_v28 }
  0x6e   :  { %2108 = vmatprep.subr.bf16.mxu1 %v2239_v29  ;;  %1570 = vmatprep.mubr.bf16.mxu0 %v1739_v52 }
  0x6f   :  { %1619 = vmatprep.mubr.bf16.mxu1 %v1741_v57 }
  0x70   :  { %2081 = vmatpush3.bf16.msra.mxu0 %v2240_v30 }
  0x71   :  { %2109 = vmatpush3.bf16.msra.mxu1 %v2241_v31  ;;  %2082 = vmatprep.subr.bf16.mxu0 %v2242_v32 }
  0x72   :  { %2110 = vmatprep.subr.bf16.mxu1 %v2243_v33 }
  0x74   :  { %2083 = vmatpush3.bf16.msra.mxu0 %v2244_v34 }
  0x75   :  { %2111 = vmatpush3.bf16.msra.mxu1 %v2245_v35  ;;  %2084 = vmatprep.subr.bf16.mxu0 %v2246_v36 }
  0x76   :  { %2112 = vmatprep.subr.bf16.mxu1 %v2247_v37 }
  0x78   :  { %2085 = vmatpush3.bf16.msra.mxu0 %v2248_v38 }
  0x79   :  { %2113 = vmatpush3.bf16.msra.mxu1 %v2249_v39  ;;  %2086 = vmatprep.subr.bf16.mxu0 %v2250_v40 }
  0x7a   :  { %2114 = vmatprep.subr.bf16.mxu1 %v2251_v41 }
  0x7c   :  { %2087 = vmatpush3.bf16.msra.mxu0 %v2252_v42 }
  0x7d   :  { %2115 = vmatpush3.bf16.msra.mxu1 %v2253_v43  ;;  %2088 = vmatprep.subr.bf16.mxu0 %v2254_v44 }
  0x7e   :  { %2116 = vmatprep.subr.bf16.mxu1 %v2255_v45 }
  0x80   :  { %2089 = vmatpush3.bf16.msra.mxu0 %v2256_v46 }
  0x81   :  { %2117 = vmatpush3.bf16.msra.mxu1 %v2257_v47 }
  0x83   :  { %1571 = vmatmul.mubr.bf16.vlgmr.msra.gmra.mrb[24].mxu0 %v1738_v51 }
  0x84   :  { %1620 = vmatmul.mubr.bf16.vlgmr.msra.gmra.mrb[24].mxu1 %v1740_v56  ;;  %1578 = vmatprep.mubr.bf16.mxu0 %v1755_v58 }
  0x85   :  { %1627 = vmatprep.mubr.bf16.mxu1 %v1757_v61 }
  0x8b   :  { %1579 = vmatmul.mubr.bf16.gmra.mrb[28].mxu0 %v1754_v62 }
  0x8c   :  { %1628 = vmatmul.mubr.bf16.gmra.mrb[28].mxu1 %v1756_v63 }
  0xf6   :  { %v1922_v0 = vpop.f32.mrb[0].mxu0 }
  0xf7   :  { %v1950_v1 = vpop.f32.mrb[0].mxu1  ;;  %v1923_v3 = vpop.f32.mrb[1].mxu0 }
  0xf8   :  { %v1924_v4 = vadd.f32 %v1923_v3, %v1922_v0  ;;  %v1951_v5 = vpop.f32.mrb[1].mxu1  ;;  %v1925_v6 = vpop.f32.mrb[2].mxu0 }
  0xf9   :  { %v1952_v7 = vadd.f32 %v1951_v5, %v1950_v1  ;;  %v1953_v8 = vpop.f32.mrb[2].mxu1  ;;  %v1926_v9 = vpop.f32.mrb[3].mxu0 }
  0xfa   :  { %v1279_v10 = vadd.f32 %v1924_v4, %v1725_v2  ;;  %v1927_v11 = vadd.f32 %v1926_v9, %v1925_v6  ;;  %v1954_v12 = vpop.f32.mrb[3].mxu1 }
  0xfb   :  { %v1955_v13 = vadd.f32 %v1954_v12, %v1953_v8 }
  0xfc   :  { %v1328_v14 = vadd.f32 %v1952_v7, %v1279_v10  ;;  %v1282_v15 = vadd.f32 %v1927_v11, %v1725_v2 }
  0xfe   :  { %v1331_v16 = vadd.f32 %v1955_v13, %v1282_v15  ;;  %v1928_v17 = vpop.f32.mrb[4].mxu0 }
  0xff   :  { %v1929_v18 = vpop.f32.mrb[5].mxu0  ;;  %v1956_v21 = vpop.f32.mrb[4].mxu1 }
 0x100   :  { %v1930_v19 = vadd.f32 %v1929_v18, %v1928_v17  ;;  %v1931_v20 = vpop.f32.mrb[6].mxu0  ;;  %v1957_v25 = vpop.f32.mrb[5].mxu1 }
 0x101   :  { %v1932_v22 = vpop.f32.mrb[7].mxu0  ;;  %v1958_v26 = vadd.f32 %v1957_v25, %v1956_v21  ;;  %v1959_v27 = vpop.f32.mrb[6].mxu1 }
 0x102   :  { %v1287_v23 = vadd.f32 %v1930_v19, %v1725_v2  ;;  %v1933_v24 = vadd.f32 %v1932_v22, %v1931_v20  ;;  %v1960_v29 = vpop.f32.mrb[7].mxu1 }
 0x103   :  { %v1961_v31 = vadd.f32 %v1960_v29, %v1959_v27 }
 0x104   :  { %v1290_v28 = vadd.f32 %v1933_v24, %v1725_v2  ;;  %v1336_v30 = vadd.f32 %v1958_v26, %v1287_v23 }
 0x106   :  { %v1339_v32 = vadd.f32 %v1961_v31, %v1290_v28 }
 0x116   :  { %v1978_v33 = vpop.f32.mrb[8].mxu0 }
 0x117   :  { %v2006_v34 = vpop.f32.mrb[8].mxu1  ;;  %v1979_v35 = vpop.f32.mrb[9].mxu0 }
 0x118   :  { %v2007_v36 = vpop.f32.mrb[9].mxu1  ;;  %v1980_v37 = vadd.f32 %v1979_v35, %v1978_v33  ;;  %v1981_v39 = vpop.f32.mrb[10].mxu0 }
 0x119   :  { %v2008_v38 = vadd.f32 %v2007_v36, %v2006_v34  ;;  %v2009_v40 = vpop.f32.mrb[10].mxu1  ;;  %v1982_v41 = vpop.f32.mrb[11].mxu0 }
 0x11a   :  { %v2010_v42 = vpop.f32.mrb[11].mxu1  ;;  %v1377_v43 = vadd.f32 %v1980_v37, %v1328_v14  ;;  %v1983_v44 = vadd.f32 %v1982_v41, %v1981_v39 }
 0x11b   :  { %v2011_v45 = vadd.f32 %v2010_v42, %v2009_v40 }
 0x11c   :  { %v1426_v46 = vadd.f32 %v2008_v38, %v1377_v43  ;;  %v1380_v47 = vadd.f32 %v1983_v44, %v1331_v16 }
 0x11e   :  { %v1429_v48 = vadd.f32 %v2011_v45, %v1380_v47  ;;  %v1984_v49 = vpop.f32.mrb[12].mxu0 }
 0x11f   :  { %v1985_v50 = vpop.f32.mrb[13].mxu0  ;;  %v2012_v55 = vpop.f32.mrb[12].mxu1 }
 0x120   :  { %v1986_v51 = vadd.f32 %v1985_v50, %v1984_v49  ;;  %v1987_v52 = vpop.f32.mrb[14].mxu0  ;;  %v2013_v57 = vpop.f32.mrb[13].mxu1 }
 0x121   :  { %v1988_v53 = vpop.f32.mrb[15].mxu0  ;;  %v2014_v59 = vadd.f32 %v2013_v57, %v2012_v55  ;;  %v2015_v60 = vpop.f32.mrb[14].mxu1 }
 0x122   :  { %v1385_v54 = vadd.f32 %v1986_v51, %v1336_v30  ;;  %v1989_v56 = vadd.f32 %v1988_v53, %v1987_v52  ;;  %v2016_v61 = vpop.f32.mrb[15].mxu1 }
 0x123   :  { %v2017_v63 = vadd.f32 %v2016_v61, %v2015_v60 }
 0x124   :  { %v1388_v58 = vadd.f32 %v1989_v56, %v1339_v32  ;;  %v1434_v62 = vadd.f32 %v2014_v59, %v1385_v54 }
 0x126   :  { %v1437_v0 = vadd.f32 %v2017_v63, %v1388_v58 }
 0x136   :  { %v2034_v1 = vpop.f32.mrb[16].mxu0 }
 0x137   :  { %v2062_v2 = vpop.f32.mrb[16].mxu1  ;;  %v2035_v3 = vpop.f32.mrb[17].mxu0 }
 0x138   :  { %v2036_v4 = vadd.f32 %v2035_v3, %v2034_v1  ;;  %v2063_v5 = vpop.f32.mrb[17].mxu1  ;;  %v2037_v6 = vpop.f32.mrb[18].mxu0 }
 0x139   :  { %v2064_v7 = vadd.f32 %v2063_v5, %v2062_v2  ;;  %v2065_v8 = vpop.f32.mrb[18].mxu1  ;;  %v2038_v9 = vpop.f32.mrb[19].mxu0 }
 0x13a   :  { %v1475_v10 = vadd.f32 %v2036_v4, %v1426_v46  ;;  %v2039_v11 = vadd.f32 %v2038_v9, %v2037_v6  ;;  %v2066_v12 = vpop.f32.mrb[19].mxu1 }
 0x13b   :  { %v2067_v13 = vadd.f32 %v2066_v12, %v2065_v8 }
 0x13c   :  { %v1524_v14 = vadd.f32 %v2064_v7, %v1475_v10  ;;  %v1478_v15 = vadd.f32 %v2039_v11, %v1429_v48 }
 0x13e   :  { %v1527_v16 = vadd.f32 %v2067_v13, %v1478_v15  ;;  %v2040_v17 = vpop.f32.mrb[20].mxu0 }
 0x13f   :  { %v2041_v18 = vpop.f32.mrb[21].mxu0  ;;  %v2068_v21 = vpop.f32.mrb[20].mxu1 }
 0x140   :  { %v2042_v19 = vadd.f32 %v2041_v18, %v2040_v17  ;;  %v2043_v20 = vpop.f32.mrb[22].mxu0  ;;  %v2069_v25 = vpop.f32.mrb[21].mxu1 }
 0x141   :  { %v2044_v22 = vpop.f32.mrb[23].mxu0  ;;  %v2070_v26 = vadd.f32 %v2069_v25, %v2068_v21  ;;  %v2071_v27 = vpop.f32.mrb[22].mxu1 }
 0x142   :  { %v1483_v23 = vadd.f32 %v2042_v19, %v1434_v62  ;;  %v2045_v24 = vadd.f32 %v2044_v22, %v2043_v20  ;;  %v2072_v29 = vpop.f32.mrb[23].mxu1 }
 0x143   :  { %v2073_v31 = vadd.f32 %v2072_v29, %v2071_v27 }
 0x144   :  { %v1486_v28 = vadd.f32 %v2045_v24, %v1437_v0  ;;  %v1532_v30 = vadd.f32 %v2070_v26, %v1483_v23 }
 0x146   :  { %v1535_v32 = vadd.f32 %v2073_v31, %v1486_v28 }
 0x156   :  { %v2090_v33 = vpop.f32.mrb[24].mxu0 }
 0x157   :  { %v2118_v34 = vpop.f32.mrb[24].mxu1  ;;  %v2091_v35 = vpop.f32.mrb[25].mxu0 }
 0x158   :  { %v2092_v36 = vadd.f32 %v2091_v35, %v2090_v33  ;;  %v2119_v37 = vpop.f32.mrb[25].mxu1  ;;  %v2093_v38 = vpop.f32.mrb[26].mxu0 }
 0x159   :  { %v2120_v39 = vadd.f32 %v2119_v37, %v2118_v34  ;;  %v2121_v40 = vpop.f32.mrb[26].mxu1  ;;  %v2094_v41 = vpop.f32.mrb[27].mxu0  ;;  %v1886_v37 = vld [vmem:[%s2789_s4] ss:$0 sm:$0xff] }
 0x15a   :  { %v1573_v42 = vadd.f32 %v2092_v36, %v1524_v14  ;;  %v2095_v43 = vadd.f32 %v2094_v41, %v2093_v38  ;;  %v2122_v44 = vpop.f32.mrb[27].mxu1 }
 0x15b   :  { %v2123_v45 = vadd.f32 %v2122_v44, %v2121_v40 }
 0x15c   :  { %v1622_v46 = vadd.f32 %v2120_v39, %v1573_v42  ;;  %v1576_v47 = vadd.f32 %v2095_v43, %v1527_v16 }
 0x15e   :  { %v1625_v48 = vadd.f32 %v2123_v45, %v1576_v47  ;;  %v2096_v49 = vpop.f32.mrb[28].mxu0 }
 0x15f   :  { %v2124_v50 = vpop.f32.mrb[28].mxu1  ;;  %v2097_v51 = vpop.f32.mrb[29].mxu0 }
 0x160   :  { %v1636_v52 = vadd.f32 %v1625_v48, %v1622_v46  ;;  %v2098_v53 = vadd.f32 %v2097_v51, %v2096_v49  ;;  %v2125_v54 = vpop.f32.mrb[29].mxu1  ;;  %v2099_v55 = vpop.f32.mrb[30].mxu0 }
 0x161   :  { %v2126_v56 = vadd.f32 %v2125_v54, %v2124_v50  ;;  %v2127_v57 = vpop.f32.mrb[30].mxu1  ;;  %v2100_v58 = vpop.f32.mrb[31].mxu0 }
 0x162   :  { %v1581_v59 = vadd.f32 %v2098_v53, %v1532_v30  ;;  %v2101_v60 = vadd.f32 %v2100_v58, %v2099_v55  ;;  %v2128_v61 = vpop.f32.mrb[31].mxu1  ;;  %v1669_v30 = vlaneseq }
 0x163   :  { %v2129_v62 = vadd.f32 %v2128_v61, %v2127_v57 }
 0x164   :  { %v1630_v63 = vadd.f32 %v2126_v56, %v1581_v59  ;;  %v1584_v0 = vadd.f32 %v2101_v60, %v1535_v32  ;;  %v1670_v31 = vshrl.u32 %v1669_v30, 7  ;;  %v1664_v32 = vld [vmem:[%s2788_s3] sm:$0x1] }
 0x166   :  { %v1637_v1 = vadd.f32 %v1636_v52, %v1630_v63  ;;  %v1633_v2 = vadd.f32 %v2129_v62, %v1584_v0  ;;  %v1671_v33 = vsub.s32 0, %v1670_v31 }
 0x168   :  { %v1638_v3 = vadd.f32 %v1637_v1, %v1633_v2 }
 0x16a   :  { %v1639_v4 = vrot.slane %v1638_v3, 4 }
 0x16c   :  { %v1640_v5 = vadd.f32 %v1639_v4, %v1638_v3 }
 0x16e   :  { %v1641_v6 = vrot.slane %v1640_v5, 2 }
 0x170   :  { %v1642_v7 = vadd.f32 %v1641_v6, %v1640_v5 }
 0x172   :  { %v1643_v8 = vrot.slane %v1642_v7, 1 }
 0x174   :  { %v1644_v9 = vadd.f32 %v1643_v8, %v1642_v7 }
 0x176   :  { %v1645_v10 = vmul.f32 0.03125, %v1644_v9 }
 0x178   :  { %v1646_v11 = vsub.f32 %v1622_v46, %v1645_v10  ;;  %v1647_v12 = vsub.f32 %v1625_v48, %v1645_v10  ;;  %v1648_v13 = vsub.f32 %v1630_v63, %v1645_v10  ;;  %v1649_v14 = vsub.f32 %v1633_v2, %v1645_v10 }
 0x17a   :  { %v1650_v15 = vmul.f32 %v1646_v11, %v1646_v11  ;;  %v1651_v16 = vmul.f32 %v1647_v12, %v1647_v12  ;;  %v1652_v17 = vmul.f32 %v1648_v13, %v1648_v13  ;;  %v1653_v19 = vmul.f32 %v1649_v14, %v1649_v14 }
 0x17c   :  { %v1654_v18 = vadd.f32 %v1651_v16, %v1650_v15 }
 0x17e   :  { %v1655_v20 = vadd.f32 %v1654_v18, %v1652_v17 }
 0x180   :  { %v1656_v21 = vadd.f32 %v1655_v20, %v1653_v19 }
 0x182   :  { %v1657_v22 = vrot.slane %v1656_v21, 4 }
 0x184   :  { %v1658_v23 = vadd.f32 %v1657_v22, %v1656_v21 }
 0x186   :  { %v1659_v24 = vrot.slane %v1658_v23, 2 }
 0x188   :  { %v1660_v25 = vadd.f32 %v1659_v24, %v1658_v23 }
 0x18a   :  { %v1661_v26 = vrot.slane %v1660_v25, 1 }
 0x18c   :  { %v1662_v27 = vadd.f32 %v1661_v26, %v1660_v25 }
 0x18e   :  { %v1663_v28 = vmul.f32 0.03125, %v1662_v27 }
 0x190   :  { %v1665_v29 = vadd.f32 1e-05, %v1663_v28 }
 0x192   :  { %2258 = vrsqrt.f32 %v1665_v29 }
 0x19c   :  { %v2259_v34 = vpop.eup %2258 }
 0x19d   :  { %v1667_v35 = vmul.f32 %v2259_v34, %v1664_v32 }
 0x19f   :  { %v1672_v36 = vrot.slane %v1667_v35, %v1671_v33 }
 0x1a1   :  { %v1674_v38 = vmul.f32 %v1672_v36, %v1646_v11  ;;  %v1675_v39 = vmul.f32 %v1672_v36, %v1647_v12  ;;  %v1676_v40 = vmul.f32 %v1672_v36, %v1648_v13  ;;  %v1677_v41 = vmul.f32 %v1672_v36, %v1649_v14 }
 0x1a3   :  { %v1685_v42 = vadd.f32 %v1886_v37, %v1674_v38  ;;  %v1686_v43 = vadd.f32 %v1886_v37, %v1675_v39  ;;  %v1687_v44 = vadd.f32 %v1886_v37, %v1676_v40  ;;  %v1688_v45 = vadd.f32 %v1886_v37, %v1677_v41 }
 0x1a5   :  { %vm1689_vm0 = vcmp.ge.f32.partialorder %v1685_v42, 0.0  ;;  %vm1690_vm1 = vcmp.ge.f32.partialorder %v1686_v43, 0.0  ;;  %vm1691_vm2 = vcmp.ge.f32.partialorder %v1687_v44, 0.0  ;;  %vm1692_vm3 = vcmp.ge.f32.partialorder %v1688_v45, 0.0 }
 0x1a6   :  { %v1693_v46 = vmul.f32 0.2, %v1685_v42  ;;  %v1694_v47 = vmul.f32 0.2, %v1686_v43  ;;  %v1695_v48 = vmul.f32 0.2, %v1687_v44 }
 0x1a7   :  { %v1696_v49 = vmul.f32 0.2, %v1688_v45 }
 0x1a8   :  { %v1697_v50 = vsel %vm1689_vm0, %v1685_v42, %v1693_v46  ;;  %v1698_v51 = vsel %vm1690_vm1, %v1686_v43, %v1694_v47  ;;  %v1699_v52 = vsel %vm1691_vm2, %v1687_v44, %v1695_v48 }
 0x1a9   :  { %v1700_v53 = vsel %vm1692_vm3, %v1688_v45, %v1696_v49  ;;  %v1898_v54 = vpack.c.bf16 %v1698_v51, %v1697_v50 }
 0x1aa   :  { %v1903_v55 = vpack.c.bf16 %v1700_v53, %v1699_v52 }
 0x1ab   :  { %1899 = vst [vmem:[%s2790_s5] sm:$0xff] %v1898_v54  }
 0x1ac   :  { %1905 = vst [vmem:[%s2790_s5 + $0x8] sm:$0xff] %v1903_v55  }

// kernel: discriminator_forward.8
= control target key start
LH: loop header
LB: loop body
LE: loop exit
PB: predicated region body
PF: predicated region fallthrough
CT: control target
= control target key end

     0   :  { %s3650_s1 = inlined_call_operand.vmem [shape: bf16[2048,256], index: 1, kind: input, shape index: {}]   ;;  %s3651_s0 = inlined_call_operand.vmem [shape: bf16[8,2048], index: 0, kind: input, shape index: {}]   ;;  %s3652_s2 = inlined_call_operand.vmem [shape: f32[1,256], index: 2, kind: input, shape index: {}]   ;;  %s3653_s3 = inlined_call_operand.vmem [shape: f32[1,256], index: 3, kind: input, shape index: {}]   ;;  %s3654_s4 = inlined_call_operand.vmem [shape: f32[1,256], index: 4, kind: input, shape index: {}]   ;;  %s3655_s5 = inlined_call_operand.vmem [shape: bf16[8,256], index: 5, kind: output, shape index: {}]  }
   0x1   :  { %v2365_v0 = vld [vmem:[%s3650_s1 + $0x4] ss:$8 sps:$4 sm:$0xff]   ;;  %v2369_v2 = vld [vmem:[%s3650_s1] ss:$8 sps:$4 sm:$0xff]   ;;  %v2371_v4 = vld [vmem:[%s3650_s1 + $0x14] ss:$8 sps:$4 sm:$0xff]  }
   0x2   :  { %v2367_v1 = vld [vmem:[%s3650_s1 + $0x404] ss:$8 sps:$4 sm:$0xff]   ;;  %1632 = vmatprep.subr.bf16.mxu1 %v2365_v0  ;;  %v2370_v3 = vld [vmem:[%s3650_s1 + $0x400] ss:$8 sps:$4 sm:$0xff]   ;;  %v2373_v5 = vld [vmem:[%s3650_s1 + $0x414] ss:$8 sps:$4 sm:$0xff]  }
   0x3   :  { %1796 = vmatprep.subr.bf16.mxu0 %v2367_v1  ;;  %1633 = vmatpush1.bf16.msra.mxu1 %v2369_v2  ;;  %v2375_v6 = vld [vmem:[%s3650_s1 + $0x10] ss:$8 sps:$4 sm:$0xff]   ;;  %v2377_v8 = vld [vmem:[%s3650_s1 + $0x24] ss:$8 sps:$4 sm:$0xff]   ;;  %v2381_v10 = vld [vmem:[%s3650_s1 + $0x20] ss:$8 sps:$4 sm:$0xff]  }
   0x4   :  { %1797 = vmatpush1.bf16.msra.mxu0 %v2370_v3  ;;  %1634 = vmatprep.subr.bf16.mxu1 %v2371_v4  ;;  %v2376_v7 = vld [vmem:[%s3650_s1 + $0x410] ss:$8 sps:$4 sm:$0xff]   ;;  %v2379_v9 = vld [vmem:[%s3650_s1 + $0x424] ss:$8 sps:$4 sm:$0xff]   ;;  %v2382_v11 = vld [vmem:[%s3650_s1 + $0x420] ss:$8 sps:$4 sm:$0xff]  }
   0x5   :  { %1798 = vmatprep.subr.bf16.mxu0 %v2373_v5  ;;  %v2383_v12 = vld [vmem:[%s3650_s1 + $0x34] ss:$8 sps:$4 sm:$0xff]   ;;  %v2387_v14 = vld [vmem:[%s3650_s1 + $0x30] ss:$8 sps:$4 sm:$0xff]   ;;  %v2389_v16 = vld [vmem:[%s3650_s1 + $0x44] ss:$8 sps:$4 sm:$0xff]  }
   0x6   :  { %v2385_v13 = vld [vmem:[%s3650_s1 + $0x434] ss:$8 sps:$4 sm:$0xff]   ;;  %v2388_v15 = vld [vmem:[%s3650_s1 + $0x430] ss:$8 sps:$4 sm:$0xff]   ;;  %v2391_v17 = vld [vmem:[%s3650_s1 + $0x444] ss:$8 sps:$4 sm:$0xff]  }
   0x7   :  { %1635 = vmatpush1.bf16.msra.mxu1 %v2375_v6  ;;  %v2393_v18 = vld [vmem:[%s3650_s1 + $0x40] ss:$8 sps:$4 sm:$0xff]   ;;  %v2395_v20 = vld [vmem:[%s3650_s1 + $0x54] ss:$8 sps:$4 sm:$0xff]   ;;  %v2399_v22 = vld [vmem:[%s3650_s1 + $0x50] ss:$8 sps:$4 sm:$0xff]  }
   0x8   :  { %1799 = vmatpush1.bf16.msra.mxu0 %v2376_v7  ;;  %1636 = vmatprep.subr.bf16.mxu1 %v2377_v8  ;;  %v2394_v19 = vld [vmem:[%s3650_s1 + $0x440] ss:$8 sps:$4 sm:$0xff]   ;;  %v2397_v21 = vld [vmem:[%s3650_s1 + $0x454] ss:$8 sps:$4 sm:$0xff]   ;;  %v2400_v23 = vld [vmem:[%s3650_s1 + $0x450] ss:$8 sps:$4 sm:$0xff]  }
   0x9   :  { %1800 = vmatprep.subr.bf16.mxu0 %v2379_v9  ;;  %v2401_v24 = vld [vmem:[%s3650_s1 + $0x64] ss:$8 sps:$4 sm:$0xff]   ;;  %v2405_v26 = vld [vmem:[%s3650_s1 + $0x60] ss:$8 sps:$4 sm:$0xff]   ;;  %v2407_v28 = vld [vmem:[%s3650_s1 + $0x74] ss:$8 sps:$4 sm:$0xff]  }
   0xa   :  { %v2403_v25 = vld [vmem:[%s3650_s1 + $0x464] ss:$8 sps:$4 sm:$0xff]   ;;  %v2406_v27 = vld [vmem:[%s3650_s1 + $0x460] ss:$8 sps:$4 sm:$0xff]   ;;  %v2409_v29 = vld [vmem:[%s3650_s1 + $0x474] ss:$8 sps:$4 sm:$0xff]  }
   0xb   :  { %1637 = vmatpush1.bf16.msra.mxu1 %v2381_v10  ;;  %v2411_v30 = vld [vmem:[%s3650_s1 + $0x70] ss:$8 sps:$4 sm:$0xff]   ;;  %v2413_v32 = vld [vmem:[%s3650_s1 + $0x84] ss:$8 sps:$4 sm:$0xff]   ;;  %v2417_v34 = vld [vmem:[%s3650_s1 + $0x80] ss:$8 sps:$4 sm:$0xff]  }
   0xc   :  { %1801 = vmatpush1.bf16.msra.mxu0 %v2382_v11  ;;  %1638 = vmatprep.subr.bf16.mxu1 %v2383_v12  ;;  %v2412_v31 = vld [vmem:[%s3650_s1 + $0x470] ss:$8 sps:$4 sm:$0xff]   ;;  %v2415_v33 = vld [vmem:[%s3650_s1 + $0x484] ss:$8 sps:$4 sm:$0xff]   ;;  %v2418_v35 = vld [vmem:[%s3650_s1 + $0x480] ss:$8 sps:$4 sm:$0xff]  }
   0xd   :  { %1802 = vmatprep.subr.bf16.mxu0 %v2385_v13  ;;  %v2419_v36 = vld [vmem:[%s3650_s1 + $0x94] ss:$8 sps:$4 sm:$0xff]   ;;  %v2423_v38 = vld [vmem:[%s3650_s1 + $0x90] ss:$8 sps:$4 sm:$0xff]   ;;  %v2425_v40 = vld [vmem:[%s3650_s1 + $0xa4] ss:$8 sps:$4 sm:$0xff]  }
   0xe   :  { %v2421_v37 = vld [vmem:[%s3650_s1 + $0x494] ss:$8 sps:$4 sm:$0xff]   ;;  %v2424_v39 = vld [vmem:[%s3650_s1 + $0x490] ss:$8 sps:$4 sm:$0xff]   ;;  %v2427_v41 = vld [vmem:[%s3650_s1 + $0x4a4] ss:$8 sps:$4 sm:$0xff]  }
   0xf   :  { %1639 = vmatpush1.bf16.msra.mxu1 %v2387_v14  ;;  %v2429_v42 = vld [vmem:[%s3650_s1 + $0xa0] ss:$8 sps:$4 sm:$0xff]   ;;  %v2431_v44 = vld [vmem:[%s3650_s1 + $0xb4] ss:$8 sps:$4 sm:$0xff]   ;;  %v2435_v47 = vld [vmem:[%s3650_s1 + $0xb0] ss:$8 sps:$4 sm:$0xff]  }
  0x10   :  { %1803 = vmatpush1.bf16.msra.mxu0 %v2388_v15  ;;  %1640 = vmatprep.subr.bf16.mxu1 %v2389_v16  ;;  %v2430_v43 = vld [vmem:[%s3650_s1 + $0x4a0] ss:$8 sps:$4 sm:$0xff]   ;;  %v2433_v45 = vld [vmem:[%s3650_s1 + $0x4b4] ss:$8 sps:$4 sm:$0xff]   ;;  %v2436_v49 = vld [vmem:[%s3650_s1 + $0x4b0] ss:$8 sps:$4 sm:$0xff]  }
  0x11   :  { %1804 = vmatprep.subr.bf16.mxu0 %v2391_v17  ;;  %v20_v46 = vld [vmem:[%s3651_s0] sm:$0xff]  ;;  %v2443_v56 = vld [vmem:[%s3650_s1 + $0xd4] ss:$8 sps:$4 sm:$0xff]   ;;  %v2447_v58 = vld [vmem:[%s3650_s1 + $0xd0] ss:$8 sps:$4 sm:$0xff]  }
  0x12   :  { %v2063_v48 = vcombine.high %v20_v46, %v20_v46  ;;  %v24_v50 = vld [vmem:[%s3651_s0 + $0x20] sm:$0xff]  ;;  %v2445_v57 = vld [vmem:[%s3650_s1 + $0x4d4] ss:$8 sps:$4 sm:$0xff]   ;;  %v2448_v59 = vld [vmem:[%s3650_s1 + $0x4d0] ss:$8 sps:$4 sm:$0xff]   ;;  %v2062_v6 = vcombine.low %v20_v46, %v20_v46 }
  0x13   :  { %1641 = vmatpush1.bf16.msra.mxu1 %v2393_v18  ;;  %v2437_v51 = vld [vmem:[%s3650_s1 + $0xc4] ss:$8 sps:$4 sm:$0xff]   ;;  %v2071_v53 = vcombine.high %v24_v50, %v24_v50  ;;  %v2441_v54 = vld [vmem:[%s3650_s1 + $0xc0] ss:$8 sps:$4 sm:$0xff]   ;;  %v2455_v0 = vld [vmem:[%s3650_s1 + $0xf4] ss:$8 sps:$4 sm:$0xff]   ;;  %v2070_v7 = vcombine.low %v24_v50, %v24_v50 }
  0x14   :  { %1805 = vmatpush1.bf16.msra.mxu0 %v2394_v19  ;;  %1642 = vmatprep.subr.bf16.mxu1 %v2395_v20  ;;  %v2439_v52 = vld [vmem:[%s3650_s1 + $0x4c4] ss:$8 sps:$4 sm:$0xff]   ;;  %v2442_v55 = vld [vmem:[%s3650_s1 + $0x4c0] ss:$8 sps:$4 sm:$0xff]   ;;  %v2457_v1 = vld [vmem:[%s3650_s1 + $0x4f4] ss:$8 sps:$4 sm:$0xff]  }
  0x15   :  { %1806 = vmatprep.subr.bf16.mxu0 %v2397_v21  ;;  %1664 = vmatprep.mubr.bf16.mxu1 %v2063_v48  ;;  %v2449_v60 = vld [vmem:[%s3650_s1 + $0xe4] ss:$8 sps:$4 sm:$0xff]   ;;  %v2453_v62 = vld [vmem:[%s3650_s1 + $0xe0] ss:$8 sps:$4 sm:$0xff]   ;;  %v2459_v2 = vld [vmem:[%s3650_s1 + $0xf0] ss:$8 sps:$4 sm:$0xff]  }
  0x16   :  { %1828 = vmatprep.mubr.bf16.mxu0 %v2071_v53  ;;  %v2451_v61 = vld [vmem:[%s3650_s1 + $0x4e4] ss:$8 sps:$4 sm:$0xff]   ;;  %v2454_v63 = vld [vmem:[%s3650_s1 + $0x4e0] ss:$8 sps:$4 sm:$0xff]   ;;  %v2460_v3 = vld [vmem:[%s3650_s1 + $0x4f0] ss:$8 sps:$4 sm:$0xff]  }
  0x17   :  { %1643 = vmatpush1.bf16.msra.mxu1 %v2399_v22  ;;  %v2465_v4 = vld [vmem:[%s3650_s1 + $0x104] ss:$8 sps:$4 sm:$0xff]   ;;  %v2463_v8 = vld [vmem:[%s3650_s1 + $0x100] ss:$8 sps:$4 sm:$0xff]   ;;  %v2473_v10 = vld [vmem:[%s3650_s1 + $0x114] ss:$8 sps:$4 sm:$0xff]  }
  0x18   :  { %1807 = vmatpush1.bf16.msra.mxu0 %v2400_v23  ;;  %1644 = vmatprep.subr.bf16.mxu1 %v2401_v24  ;;  %v2470_v5 = vld [vmem:[%s3650_s1 + $0x504] ss:$8 sps:$4 sm:$0xff]   ;;  %v2468_v9 = vld [vmem:[%s3650_s1 + $0x500] ss:$8 sps:$4 sm:$0xff]   ;;  %v2476_v11 = vld [vmem:[%s3650_s1 + $0x514] ss:$8 sps:$4 sm:$0xff]  }
  0x19   :  { %1808 = vmatprep.subr.bf16.mxu0 %v2403_v25  ;;  %v2471_v12 = vld [vmem:[%s3650_s1 + $0x110] ss:$8 sps:$4 sm:$0xff]   ;;  %v2479_v14 = vld [vmem:[%s3650_s1 + $0x124] ss:$8 sps:$4 sm:$0xff]   ;;  %v2477_v16 = vld [vmem:[%s3650_s1 + $0x120] ss:$8 sps:$4 sm:$0xff]  }
  0x1a   :  { %v2474_v13 = vld [vmem:[%s3650_s1 + $0x510] ss:$8 sps:$4 sm:$0xff]   ;;  %v2482_v15 = vld [vmem:[%s3650_s1 + $0x524] ss:$8 sps:$4 sm:$0xff]   ;;  %v2480_v17 = vld [vmem:[%s3650_s1 + $0x520] ss:$8 sps:$4 sm:$0xff]  }
  0x1b   :  { %1645 = vmatpush1.bf16.msra.mxu1 %v2405_v26  ;;  %v2485_v18 = vld [vmem:[%s3650_s1 + $0x134] ss:$8 sps:$4 sm:$0xff]   ;;  %v2483_v20 = vld [vmem:[%s3650_s1 + $0x130] ss:$8 sps:$4 sm:$0xff]   ;;  %v2491_v22 = vld [vmem:[%s3650_s1 + $0x144] ss:$8 sps:$4 sm:$0xff]  }
  0x1c   :  { %1809 = vmatpush1.bf16.msra.mxu0 %v2406_v27  ;;  %1646 = vmatprep.subr.bf16.mxu1 %v2407_v28  ;;  %v2488_v19 = vld [vmem:[%s3650_s1 + $0x534] ss:$8 sps:$4 sm:$0xff]   ;;  %v2486_v21 = vld [vmem:[%s3650_s1 + $0x530] ss:$8 sps:$4 sm:$0xff]   ;;  %v2494_v23 = vld [vmem:[%s3650_s1 + $0x544] ss:$8 sps:$4 sm:$0xff]  }
  0x1d   :  { %1810 = vmatprep.subr.bf16.mxu0 %v2409_v29  ;;  %v2489_v24 = vld [vmem:[%s3650_s1 + $0x140] ss:$8 sps:$4 sm:$0xff]   ;;  %v2497_v26 = vld [vmem:[%s3650_s1 + $0x154] ss:$8 sps:$4 sm:$0xff]   ;;  %v2495_v28 = vld [vmem:[%s3650_s1 + $0x150] ss:$8 sps:$4 sm:$0xff]  }
  0x1e   :  { %v2492_v25 = vld [vmem:[%s3650_s1 + $0x540] ss:$8 sps:$4 sm:$0xff]   ;;  %v2500_v27 = vld [vmem:[%s3650_s1 + $0x554] ss:$8 sps:$4 sm:$0xff]   ;;  %v2498_v29 = vld [vmem:[%s3650_s1 + $0x550] ss:$8 sps:$4 sm:$0xff]  }
  0x1f   :  { %1647 = vmatpush1.bf16.msra.mxu1 %v2411_v30  ;;  %v2503_v30 = vld [vmem:[%s3650_s1 + $0x164] ss:$8 sps:$4 sm:$0xff]   ;;  %v2521_v46 = vld [vmem:[%s3650_s1 + $0x194] ss:$8 sps:$4 sm:$0xff]   ;;  %v2519_v48 = vld [vmem:[%s3650_s1 + $0x190] ss:$8 sps:$4 sm:$0xff]  }
  0x20   :  { %1811 = vmatpush1.bf16.msra.mxu0 %v2412_v31  ;;  %1648 = vmatprep.subr.bf16.mxu1 %v2413_v32  ;;  %v2506_v31 = vld [vmem:[%s3650_s1 + $0x564] ss:$8 sps:$4 sm:$0xff]   ;;  %v2528_v53 = vld [vmem:[%s3650_s1 + $0x5a0] ss:$8 sps:$4 sm:$0xff]  }
  0x21   :  { %1812 = vmatprep.subr.bf16.mxu0 %v2415_v33  ;;  %v3079_v32 = vld [vmem:[%s3651_s0 + $0x8] sm:$0xff] }
  0x22   :  { %v2501_v33 = vld [vmem:[%s3650_s1 + $0x160] ss:$8 sps:$4 sm:$0xff]   ;;  %v2527_v50 = vld [vmem:[%s3650_s1 + $0x1a4] ss:$8 sps:$4 sm:$0xff]  }
  0x23   :  { %1649 = vmatpush1.bf16.msra.mxu1 %v2417_v34  ;;  %v2504_v34 = vld [vmem:[%s3650_s1 + $0x560] ss:$8 sps:$4 sm:$0xff]  }
  0x24   :  { %1813 = vmatpush1.bf16.msra.mxu0 %v2418_v35  ;;  %1650 = vmatprep.subr.bf16.mxu1 %v2419_v36  ;;  %v2065_v35 = vcombine.high %v3079_v32, %v3079_v32  ;;  %v3092_v36 = vld [vmem:[%s3651_s0 + $0x28] sm:$0xff] }
  0x25   :  { %1814 = vmatprep.subr.bf16.mxu0 %v2421_v37  ;;  %v2509_v37 = vld [vmem:[%s3650_s1 + $0x174] ss:$8 sps:$4 sm:$0xff]  }
  0x27   :  { %1651 = vmatpush1.bf16.msra.mxu1 %v2423_v38  ;;  %v2073_v38 = vcombine.high %v3092_v36, %v3092_v36 }
  0x28   :  { %1815 = vmatpush1.bf16.msra.mxu0 %v2424_v39  ;;  %1652 = vmatprep.subr.bf16.mxu1 %v2425_v40  ;;  %v2512_v39 = vld [vmem:[%s3650_s1 + $0x574] ss:$8 sps:$4 sm:$0xff]   ;;  %v2507_v40 = vld [vmem:[%s3650_s1 + $0x170] ss:$8 sps:$4 sm:$0xff]  }
  0x29   :  { %1816 = vmatprep.subr.bf16.mxu0 %v2427_v41  ;;  %v2510_v41 = vld [vmem:[%s3650_s1 + $0x570] ss:$8 sps:$4 sm:$0xff]  }
  0x2b   :  { %1653 = vmatpush1.bf16.msra.mxu1 %v2429_v42  ;;  %v2515_v42 = vld [vmem:[%s3650_s1 + $0x184] ss:$8 sps:$4 sm:$0xff]  }
  0x2c   :  { %1817 = vmatpush1.bf16.msra.mxu0 %v2430_v43  ;;  %1654 = vmatprep.subr.bf16.mxu1 %v2431_v44  ;;  %v2518_v43 = vld [vmem:[%s3650_s1 + $0x584] ss:$8 sps:$4 sm:$0xff]   ;;  %v2513_v44 = vld [vmem:[%s3650_s1 + $0x180] ss:$8 sps:$4 sm:$0xff]  }
  0x2d   :  { %1818 = vmatprep.subr.bf16.mxu0 %v2433_v45  ;;  %v2516_v45 = vld [vmem:[%s3650_s1 + $0x580] ss:$8 sps:$4 sm:$0xff]  }
  0x2f   :  { %1655 = vmatpush1.bf16.msra.mxu1 %v2435_v47  ;;  %v2524_v47 = vld [vmem:[%s3650_s1 + $0x594] ss:$8 sps:$4 sm:$0xff]  }
  0x30   :  { %1819 = vmatpush1.bf16.msra.mxu0 %v2436_v49  ;;  %1656 = vmatprep.subr.bf16.mxu1 %v2437_v51  ;;  %v2522_v49 = vld [vmem:[%s3650_s1 + $0x590] ss:$8 sps:$4 sm:$0xff]   ;;  %v2530_v51 = vld [vmem:[%s3650_s1 + $0x5a4] ss:$8 sps:$4 sm:$0xff]  }
  0x31   :  { %1820 = vmatprep.subr.bf16.mxu0 %v2439_v52  ;;  %v2525_v52 = vld [vmem:[%s3650_s1 + $0x1a0] ss:$8 sps:$4 sm:$0xff]  }
  0x33   :  { %1657 = vmatpush1.bf16.msra.mxu1 %v2441_v54  ;;  %v2533_v54 = vld [vmem:[%s3650_s1 + $0x1b4] ss:$8 sps:$4 sm:$0xff]  }
  0x34   :  { %1821 = vmatpush1.bf16.msra.mxu0 %v2442_v55  ;;  %1658 = vmatprep.subr.bf16.mxu1 %v2443_v56  ;;  %v2536_v55 = vld [vmem:[%s3650_s1 + $0x5b4] ss:$8 sps:$4 sm:$0xff]   ;;  %v2531_v56 = vld [vmem:[%s3650_s1 + $0x1b0] ss:$8 sps:$4 sm:$0xff]  }
  0x35   :  { %1822 = vmatprep.subr.bf16.mxu0 %v2445_v57  ;;  %v2534_v57 = vld [vmem:[%s3650_s1 + $0x5b0] ss:$8 sps:$4 sm:$0xff]  }
  0x37   :  { %1659 = vmatpush1.bf16.msra.mxu1 %v2447_v58  ;;  %v2539_v58 = vld [vmem:[%s3650_s1 + $0x1c4] ss:$8 sps:$4 sm:$0xff]  }
  0x38   :  { %1823 = vmatpush1.bf16.msra.mxu0 %v2448_v59  ;;  %1660 = vmatprep.subr.bf16.mxu1 %v2449_v60  ;;  %v2542_v59 = vld [vmem:[%s3650_s1 + $0x5c4] ss:$8 sps:$4 sm:$0xff]   ;;  %v2537_v60 = vld [vmem:[%s3650_s1 + $0x1c0] ss:$8 sps:$4 sm:$0xff]  }
  0x39   :  { %1824 = vmatprep.subr.bf16.mxu0 %v2451_v61  ;;  %v2540_v61 = vld [vmem:[%s3650_s1 + $0x5c0] ss:$8 sps:$4 sm:$0xff]  }
  0x3b   :  { %1661 = vmatpush1.bf16.msra.mxu1 %v2453_v62  ;;  %v2545_v62 = vld [vmem:[%s3650_s1 + $0x1d4] ss:$8 sps:$4 sm:$0xff]  }
  0x3c   :  { %1825 = vmatpush1.bf16.msra.mxu0 %v2454_v63  ;;  %1662 = vmatprep.subr.bf16.mxu1 %v2455_v0  ;;  %v2548_v63 = vld [vmem:[%s3650_s1 + $0x5d4] ss:$8 sps:$4 sm:$0xff]   ;;  %v2543_v0 = vld [vmem:[%s3650_s1 + $0x1d0] ss:$8 sps:$4 sm:$0xff]  }
  0x3d   :  { %1826 = vmatprep.subr.bf16.mxu0 %v2457_v1  ;;  %v2546_v1 = vld [vmem:[%s3650_s1 + $0x5d0] ss:$8 sps:$4 sm:$0xff]  }
  0x3f   :  { %1663 = vmatpush1.bf16.msra.mxu1 %v2459_v2  ;;  %v2551_v2 = vld [vmem:[%s3650_s1 + $0x1e4] ss:$8 sps:$4 sm:$0xff]  }
  0x40   :  { %1827 = vmatpush1.bf16.msra.mxu0 %v2460_v3  ;;  %1673 = vmatprep.subr.bf16.mxu1 %v2465_v4  ;;  %v2554_v3 = vld [vmem:[%s3650_s1 + $0x5e4] ss:$8 sps:$4 sm:$0xff]   ;;  %v2549_v4 = vld [vmem:[%s3650_s1 + $0x1e0] ss:$8 sps:$4 sm:$0xff]  }
  0x41   :  { %1837 = vmatprep.subr.bf16.mxu0 %v2470_v5  ;;  %v2552_v5 = vld [vmem:[%s3650_s1 + $0x5e0] ss:$8 sps:$4 sm:$0xff]  }
  0x42   :  { %1665 = vmatmul.mubr.bf16.vlgmr.msra.gmra.mrb[0].mxu1 %v2062_v6  ;;  %v2557_v6 = vld [vmem:[%s3650_s1 + $0x1f4] ss:$8 sps:$4 sm:$0xff]  }
  0x43   :  { %1829 = vmatmul.mubr.bf16.vlgmr.msra.gmra.mrb[0].mxu0 %v2070_v7  ;;  %1674 = vmatpush1.bf16.msra.mxu1 %v2463_v8  ;;  %v2560_v7 = vld [vmem:[%s3650_s1 + $0x5f4] ss:$8 sps:$4 sm:$0xff]   ;;  %v2555_v8 = vld [vmem:[%s3650_s1 + $0x1f0] ss:$8 sps:$4 sm:$0xff]  }
  0x44   :  { %1838 = vmatpush1.bf16.msra.mxu0 %v2468_v9  ;;  %1675 = vmatprep.subr.bf16.mxu1 %v2473_v10  ;;  %v2558_v9 = vld [vmem:[%s3650_s1 + $0x5f0] ss:$8 sps:$4 sm:$0xff]   ;;  %v2565_v10 = vld [vmem:[%s3650_s1 + $0x204] ss:$8 sps:$4 sm:$0xff]  }
  0x45   :  { %1839 = vmatprep.subr.bf16.mxu0 %v2476_v11  ;;  %1705 = vmatprep.mubr.bf16.mxu1 %v2065_v35  ;;  %v2570_v11 = vld [vmem:[%s3650_s1 + $0x604] ss:$8 sps:$4 sm:$0xff]   ;;  %v2592_v35 = vld [vmem:[%s3650_s1 + $0x640] ss:$8 sps:$4 sm:$0xff]  }
  0x46   :  { %1869 = vmatprep.mubr.bf16.mxu0 %v2073_v38  ;;  %v2595_v38 = vld [vmem:[%s3650_s1 + $0x250] ss:$8 sps:$4 sm:$0xff]  }
  0x47   :  { %1676 = vmatpush1.bf16.msra.mxu1 %v2471_v12  ;;  %v2064_v12 = vcombine.low %v3079_v32, %v3079_v32  ;;  %v2591_v32 = vld [vmem:[%s3650_s1 + $0x244] ss:$8 sps:$4 sm:$0xff]  }
  0x48   :  { %1840 = vmatpush1.bf16.msra.mxu0 %v2474_v13  ;;  %1677 = vmatprep.subr.bf16.mxu1 %v2479_v14  ;;  %v2563_v13 = vld [vmem:[%s3650_s1 + $0x200] ss:$8 sps:$4 sm:$0xff]   ;;  %v2072_v14 = vcombine.low %v3092_v36, %v3092_v36  ;;  %v2597_v36 = vld [vmem:[%s3650_s1 + $0x254] ss:$8 sps:$4 sm:$0xff]  }
  0x49   :  { %1841 = vmatprep.subr.bf16.mxu0 %v2482_v15  ;;  %v2568_v15 = vld [vmem:[%s3650_s1 + $0x600] ss:$8 sps:$4 sm:$0xff]  }
  0x4b   :  { %1678 = vmatpush1.bf16.msra.mxu1 %v2477_v16  ;;  %v2573_v16 = vld [vmem:[%s3650_s1 + $0x214] ss:$8 sps:$4 sm:$0xff]  }
  0x4c   :  { %1842 = vmatpush1.bf16.msra.mxu0 %v2480_v17  ;;  %1679 = vmatprep.subr.bf16.mxu1 %v2485_v18  ;;  %v2576_v17 = vld [vmem:[%s3650_s1 + $0x614] ss:$8 sps:$4 sm:$0xff]  }
  0x4d   :  { %1843 = vmatprep.subr.bf16.mxu0 %v2488_v19  ;;  %v3229_v18 = vld [vmem:[%s3651_s0 + $0x10] sm:$0xff] }
  0x4e   :  { %v2067_v19 = vcombine.high %v3229_v18, %v3229_v18 }
  0x4f   :  { %1680 = vmatpush1.bf16.msra.mxu1 %v2483_v20  ;;  %v3236_v20 = vld [vmem:[%s3651_s0 + $0x30] sm:$0xff] }
  0x50   :  { %1844 = vmatpush1.bf16.msra.mxu0 %v2486_v21  ;;  %1681 = vmatprep.subr.bf16.mxu1 %v2491_v22  ;;  %v2571_v21 = vld [vmem:[%s3650_s1 + $0x210] ss:$8 sps:$4 sm:$0xff]  }
  0x51   :  { %1845 = vmatprep.subr.bf16.mxu0 %v2494_v23  ;;  %v2574_v22 = vld [vmem:[%s3650_s1 + $0x610] ss:$8 sps:$4 sm:$0xff]   ;;  %v2075_v23 = vcombine.high %v3236_v20, %v3236_v20 }
  0x53   :  { %1682 = vmatpush1.bf16.msra.mxu1 %v2489_v24  ;;  %v2579_v24 = vld [vmem:[%s3650_s1 + $0x224] ss:$8 sps:$4 sm:$0xff]  }
  0x54   :  { %1846 = vmatpush1.bf16.msra.mxu0 %v2492_v25  ;;  %1683 = vmatprep.subr.bf16.mxu1 %v2497_v26  ;;  %v2582_v25 = vld [vmem:[%s3650_s1 + $0x624] ss:$8 sps:$4 sm:$0xff]   ;;  %v2577_v26 = vld [vmem:[%s3650_s1 + $0x220] ss:$8 sps:$4 sm:$0xff]  }
  0x55   :  { %1847 = vmatprep.subr.bf16.mxu0 %v2500_v27  ;;  %v2580_v27 = vld [vmem:[%s3650_s1 + $0x620] ss:$8 sps:$4 sm:$0xff]  }
  0x57   :  { %1684 = vmatpush1.bf16.msra.mxu1 %v2495_v28  ;;  %v2585_v28 = vld [vmem:[%s3650_s1 + $0x234] ss:$8 sps:$4 sm:$0xff]  }
  0x58   :  { %1848 = vmatpush1.bf16.msra.mxu0 %v2498_v29  ;;  %1685 = vmatprep.subr.bf16.mxu1 %v2503_v30  ;;  %v2588_v29 = vld [vmem:[%s3650_s1 + $0x634] ss:$8 sps:$4 sm:$0xff]   ;;  %v2583_v30 = vld [vmem:[%s3650_s1 + $0x230] ss:$8 sps:$4 sm:$0xff]  }
  0x59   :  { %1849 = vmatprep.subr.bf16.mxu0 %v2506_v31  ;;  %v2586_v31 = vld [vmem:[%s3650_s1 + $0x630] ss:$8 sps:$4 sm:$0xff]  }
  0x5b   :  { %1686 = vmatpush1.bf16.msra.mxu1 %v2501_v33  ;;  %v2594_v33 = vld [vmem:[%s3650_s1 + $0x644] ss:$8 sps:$4 sm:$0xff]  }
  0x5c   :  { %1850 = vmatpush1.bf16.msra.mxu0 %v2504_v34  ;;  %1687 = vmatprep.subr.bf16.mxu1 %v2509_v37  ;;  %v2589_v34 = vld [vmem:[%s3650_s1 + $0x240] ss:$8 sps:$4 sm:$0xff]   ;;  %v2600_v37 = vld [vmem:[%s3650_s1 + $0x654] ss:$8 sps:$4 sm:$0xff]  }
  0x5d   :  { %1851 = vmatprep.subr.bf16.mxu0 %v2512_v39  ;;  %v2598_v39 = vld [vmem:[%s3650_s1 + $0x650] ss:$8 sps:$4 sm:$0xff]  }
  0x5f   :  { %1688 = vmatpush1.bf16.msra.mxu1 %v2507_v40  ;;  %v2603_v40 = vld [vmem:[%s3650_s1 + $0x264] ss:$8 sps:$4 sm:$0xff]  }
  0x60   :  { %1852 = vmatpush1.bf16.msra.mxu0 %v2510_v41  ;;  %1689 = vmatprep.subr.bf16.mxu1 %v2515_v42  ;;  %v2606_v41 = vld [vmem:[%s3650_s1 + $0x664] ss:$8 sps:$4 sm:$0xff]   ;;  %v2601_v42 = vld [vmem:[%s3650_s1 + $0x260] ss:$8 sps:$4 sm:$0xff]  }
  0x61   :  { %1853 = vmatprep.subr.bf16.mxu0 %v2518_v43  ;;  %v2604_v43 = vld [vmem:[%s3650_s1 + $0x660] ss:$8 sps:$4 sm:$0xff]  }
  0x63   :  { %1690 = vmatpush1.bf16.msra.mxu1 %v2513_v44  ;;  %v2609_v44 = vld [vmem:[%s3650_s1 + $0x274] ss:$8 sps:$4 sm:$0xff]  }
  0x64   :  { %1854 = vmatpush1.bf16.msra.mxu0 %v2516_v45  ;;  %1691 = vmatprep.subr.bf16.mxu1 %v2521_v46  ;;  %v2612_v45 = vld [vmem:[%s3650_s1 + $0x674] ss:$8 sps:$4 sm:$0xff]   ;;  %v2607_v46 = vld [vmem:[%s3650_s1 + $0x270] ss:$8 sps:$4 sm:$0xff]  }
  0x65   :  { %1855 = vmatprep.subr.bf16.mxu0 %v2524_v47  ;;  %v2610_v47 = vld [vmem:[%s3650_s1 + $0x670] ss:$8 sps:$4 sm:$0xff]  }
  0x67   :  { %1692 = vmatpush1.bf16.msra.mxu1 %v2519_v48  ;;  %v2615_v48 = vld [vmem:[%s3650_s1 + $0x284] ss:$8 sps:$4 sm:$0xff]  }
  0x68   :  { %1856 = vmatpush1.bf16.msra.mxu0 %v2522_v49  ;;  %1693 = vmatprep.subr.bf16.mxu1 %v2527_v50  ;;  %v2618_v49 = vld [vmem:[%s3650_s1 + $0x684] ss:$8 sps:$4 sm:$0xff]   ;;  %v2613_v50 = vld [vmem:[%s3650_s1 + $0x280] ss:$8 sps:$4 sm:$0xff]  }
  0x69   :  { %1857 = vmatprep.subr.bf16.mxu0 %v2530_v51  ;;  %v2616_v51 = vld [vmem:[%s3650_s1 + $0x680] ss:$8 sps:$4 sm:$0xff]  }
  0x6b   :  { %1694 = vmatpush1.bf16.msra.mxu1 %v2525_v52  ;;  %v2621_v52 = vld [vmem:[%s3650_s1 + $0x294] ss:$8 sps:$4 sm:$0xff]  }
  0x6c   :  { %1858 = vmatpush1.bf16.msra.mxu0 %v2528_v53  ;;  %1695 = vmatprep.subr.bf16.mxu1 %v2533_v54  ;;  %v2624_v53 = vld [vmem:[%s3650_s1 + $0x694] ss:$8 sps:$4 sm:$0xff]   ;;  %v2619_v54 = vld [vmem:[%s3650_s1 + $0x290] ss:$8 sps:$4 sm:$0xff]  }
  0x6d   :  { %1859 = vmatprep.subr.bf16.mxu0 %v2536_v55  ;;  %v2622_v55 = vld [vmem:[%s3650_s1 + $0x690] ss:$8 sps:$4 sm:$0xff]  }
  0x6f   :  { %1696 = vmatpush1.bf16.msra.mxu1 %v2531_v56  ;;  %v2627_v56 = vld [vmem:[%s3650_s1 + $0x2a4] ss:$8 sps:$4 sm:$0xff]  }
  0x70   :  { %1860 = vmatpush1.bf16.msra.mxu0 %v2534_v57  ;;  %1697 = vmatprep.subr.bf16.mxu1 %v2539_v58  ;;  %v2630_v57 = vld [vmem:[%s3650_s1 + $0x6a4] ss:$8 sps:$4 sm:$0xff]   ;;  %v2625_v58 = vld [vmem:[%s3650_s1 + $0x2a0] ss:$8 sps:$4 sm:$0xff]  }
  0x71   :  { %1861 = vmatprep.subr.bf16.mxu0 %v2542_v59  ;;  %v2628_v59 = vld [vmem:[%s3650_s1 + $0x6a0] ss:$8 sps:$4 sm:$0xff]  }
  0x73   :  { %1698 = vmatpush1.bf16.msra.mxu1 %v2537_v60  ;;  %v2633_v60 = vld [vmem:[%s3650_s1 + $0x2b4] ss:$8 sps:$4 sm:$0xff]  }
  0x74   :  { %1862 = vmatpush1.bf16.msra.mxu0 %v2540_v61  ;;  %1699 = vmatprep.subr.bf16.mxu1 %v2545_v62  ;;  %v2636_v61 = vld [vmem:[%s3650_s1 + $0x6b4] ss:$8 sps:$4 sm:$0xff]   ;;  %v2631_v62 = vld [vmem:[%s3650_s1 + $0x2b0] ss:$8 sps:$4 sm:$0xff]  }
  0x75   :  { %1863 = vmatprep.subr.bf16.mxu0 %v2548_v63  ;;  %v2634_v63 = vld [vmem:[%s3650_s1 + $0x6b0] ss:$8 sps:$4 sm:$0xff]  }
  0x77   :  { %1700 = vmatpush1.bf16.msra.mxu1 %v2543_v0  ;;  %v2639_v0 = vld [vmem:[%s3650_s1 + $0x2c4] ss:$8 sps:$4 sm:$0xff]  }
  0x78   :  { %1864 = vmatpush1.bf16.msra.mxu0 %v2546_v1  ;;  %1701 = vmatprep.subr.bf16.mxu1 %v2551_v2  ;;  %v2642_v1 = vld [vmem:[%s3650_s1 + $0x6c4] ss:$8 sps:$4 sm:$0xff]   ;;  %v2637_v2 = vld [vmem:[%s3650_s1 + $0x2c0] ss:$8 sps:$4 sm:$0xff]  }
  0x79   :  { %1865 = vmatprep.subr.bf16.mxu0 %v2554_v3  ;;  %v2640_v3 = vld [vmem:[%s3650_s1 + $0x6c0] ss:$8 sps:$4 sm:$0xff]  }
  0x7b   :  { %1702 = vmatpush1.bf16.msra.mxu1 %v2549_v4  ;;  %v2645_v4 = vld [vmem:[%s3650_s1 + $0x2d4] ss:$8 sps:$4 sm:$0xff]  }
  0x7c   :  { %1866 = vmatpush1.bf16.msra.mxu0 %v2552_v5  ;;  %1703 = vmatprep.subr.bf16.mxu1 %v2557_v6  ;;  %v2648_v5 = vld [vmem:[%s3650_s1 + $0x6d4] ss:$8 sps:$4 sm:$0xff]   ;;  %v2643_v6 = vld [vmem:[%s3650_s1 + $0x2d0] ss:$8 sps:$4 sm:$0xff]  }
  0x7d   :  { %1867 = vmatprep.subr.bf16.mxu0 %v2560_v7  ;;  %v2646_v7 = vld [vmem:[%s3650_s1 + $0x6d0] ss:$8 sps:$4 sm:$0xff]  }
  0x7f   :  { %1704 = vmatpush1.bf16.msra.mxu1 %v2555_v8  ;;  %v2651_v8 = vld [vmem:[%s3650_s1 + $0x2e4] ss:$8 sps:$4 sm:$0xff]  }
  0x80   :  { %1868 = vmatpush1.bf16.msra.mxu0 %v2558_v9  ;;  %1714 = vmatprep.subr.bf16.mxu1 %v2565_v10  ;;  %v2654_v9 = vld [vmem:[%s3650_s1 + $0x6e4] ss:$8 sps:$4 sm:$0xff]   ;;  %v2649_v10 = vld [vmem:[%s3650_s1 + $0x2e0] ss:$8 sps:$4 sm:$0xff]  }
  0x81   :  { %1878 = vmatprep.subr.bf16.mxu0 %v2570_v11  ;;  %v2652_v11 = vld [vmem:[%s3650_s1 + $0x6e0] ss:$8 sps:$4 sm:$0xff]  }
  0x82   :  { %1706 = vmatmul.mubr.bf16.vlgmr.msra.gmra.mrb[0].mxu1 %v2064_v12  ;;  %v2657_v12 = vld [vmem:[%s3650_s1 + $0x2f4] ss:$8 sps:$4 sm:$0xff]  }
  0x83   :  { %1870 = vmatmul.mubr.bf16.vlgmr.msra.gmra.mrb[0].mxu0 %v2072_v14  ;;  %1715 = vmatpush1.bf16.msra.mxu1 %v2563_v13  ;;  %v2660_v13 = vld [vmem:[%s3650_s1 + $0x6f4] ss:$8 sps:$4 sm:$0xff]   ;;  %v2655_v14 = vld [vmem:[%s3650_s1 + $0x2f0] ss:$8 sps:$4 sm:$0xff]  }
  0x84   :  { %1879 = vmatpush1.bf16.msra.mxu0 %v2568_v15  ;;  %1716 = vmatprep.subr.bf16.mxu1 %v2573_v16  ;;  %v2658_v15 = vld [vmem:[%s3650_s1 + $0x6f0] ss:$8 sps:$4 sm:$0xff]   ;;  %v2665_v16 = vld [vmem:[%s3650_s1 + $0x304] ss:$8 sps:$4 sm:$0xff]  }
  0x85   :  { %1880 = vmatprep.subr.bf16.mxu0 %v2576_v17  ;;  %1746 = vmatprep.mubr.bf16.mxu1 %v2067_v19  ;;  %v2670_v17 = vld [vmem:[%s3650_s1 + $0x704] ss:$8 sps:$4 sm:$0xff]   ;;  %v2066_v19 = vcombine.low %v3229_v18, %v3229_v18  ;;  %v2668_v18 = vld [vmem:[%s3650_s1 + $0x700] ss:$8 sps:$4 sm:$0xff]  }
  0x86   :  { %1910 = vmatprep.mubr.bf16.mxu0 %v2075_v23  ;;  %v3432_v23 = vld [vmem:[%s3651_s0 + $0x38] sm:$0xff] }
  0x87   :  { %1717 = vmatpush1.bf16.msra.mxu1 %v2571_v21  ;;  %v2074_v21 = vcombine.low %v3236_v20, %v3236_v20  ;;  %v2673_v20 = vld [vmem:[%s3650_s1 + $0x314] ss:$8 sps:$4 sm:$0xff]  }
  0x88   :  { %1881 = vmatpush1.bf16.msra.mxu0 %v2574_v22  ;;  %1718 = vmatprep.subr.bf16.mxu1 %v2579_v24  ;;  %v3427_v22 = vld [vmem:[%s3651_s0 + $0x18] sm:$0xff]  ;;  %v2663_v24 = vld [vmem:[%s3650_s1 + $0x300] ss:$8 sps:$4 sm:$0xff]  }
  0x89   :  { %1882 = vmatprep.subr.bf16.mxu0 %v2582_v25  ;;  %v2676_v25 = vld [vmem:[%s3650_s1 + $0x714] ss:$8 sps:$4 sm:$0xff]  }
  0x8b   :  { %1719 = vmatpush1.bf16.msra.mxu1 %v2577_v26  ;;  %v2069_v26 = vcombine.high %v3427_v22, %v3427_v22 }
  0x8c   :  { %1883 = vmatpush1.bf16.msra.mxu0 %v2580_v27  ;;  %1720 = vmatprep.subr.bf16.mxu1 %v2585_v28  ;;  %v2077_v27 = vcombine.high %v3432_v23, %v3432_v23  ;;  %v2671_v28 = vld [vmem:[%s3650_s1 + $0x310] ss:$8 sps:$4 sm:$0xff]  }
  0x8d   :  { %1884 = vmatprep.subr.bf16.mxu0 %v2588_v29  ;;  %v2674_v29 = vld [vmem:[%s3650_s1 + $0x710] ss:$8 sps:$4 sm:$0xff]  }
  0x8f   :  { %1721 = vmatpush1.bf16.msra.mxu1 %v2583_v30  ;;  %v2679_v30 = vld [vmem:[%s3650_s1 + $0x324] ss:$8 sps:$4 sm:$0xff]  }
  0x90   :  { %1885 = vmatpush1.bf16.msra.mxu0 %v2586_v31  ;;  %1722 = vmatprep.subr.bf16.mxu1 %v2591_v32  ;;  %v2682_v31 = vld [vmem:[%s3650_s1 + $0x724] ss:$8 sps:$4 sm:$0xff]   ;;  %v2677_v32 = vld [vmem:[%s3650_s1 + $0x320] ss:$8 sps:$4 sm:$0xff]  }
  0x91   :  { %1886 = vmatprep.subr.bf16.mxu0 %v2594_v33  ;;  %v2680_v33 = vld [vmem:[%s3650_s1 + $0x720] ss:$8 sps:$4 sm:$0xff]  }
  0x93   :  { %1723 = vmatpush1.bf16.msra.mxu1 %v2589_v34  ;;  %v2685_v34 = vld [vmem:[%s3650_s1 + $0x334] ss:$8 sps:$4 sm:$0xff]  }
  0x94   :  { %1887 = vmatpush1.bf16.msra.mxu0 %v2592_v35  ;;  %1724 = vmatprep.subr.bf16.mxu1 %v2597_v36  ;;  %v2688_v35 = vld [vmem:[%s3650_s1 + $0x734] ss:$8 sps:$4 sm:$0xff]   ;;  %v2683_v36 = vld [vmem:[%s3650_s1 + $0x330] ss:$8 sps:$4 sm:$0xff]  }
  0x95   :  { %1888 = vmatprep.subr.bf16.mxu0 %v2600_v37  ;;  %v2686_v37 = vld [vmem:[%s3650_s1 + $0x730] ss:$8 sps:$4 sm:$0xff]  }
  0x97   :  { %1725 = vmatpush1.bf16.msra.mxu1 %v2595_v38  ;;  %v2691_v38 = vld [vmem:[%s3650_s1 + $0x344] ss:$8 sps:$4 sm:$0xff]  }
  0x98   :  { %1889 = vmatpush1.bf16.msra.mxu0 %v2598_v39  ;;  %1726 = vmatprep.subr.bf16.mxu1 %v2603_v40  ;;  %v2694_v39 = vld [vmem:[%s3650_s1 + $0x744] ss:$8 sps:$4 sm:$0xff]   ;;  %v2689_v40 = vld [vmem:[%s3650_s1 + $0x340] ss:$8 sps:$4 sm:$0xff]  }
  0x99   :  { %1890 = vmatprep.subr.bf16.mxu0 %v2606_v41  ;;  %v2692_v41 = vld [vmem:[%s3650_s1 + $0x740] ss:$8 sps:$4 sm:$0xff]  }
  0x9b   :  { %1727 = vmatpush1.bf16.msra.mxu1 %v2601_v42  ;;  %v2697_v42 = vld [vmem:[%s3650_s1 + $0x354] ss:$8 sps:$4 sm:$0xff]  }
  0x9c   :  { %1891 = vmatpush1.bf16.msra.mxu0 %v2604_v43  ;;  %1728 = vmatprep.subr.bf16.mxu1 %v2609_v44  ;;  %v2700_v43 = vld [vmem:[%s3650_s1 + $0x754] ss:$8 sps:$4 sm:$0xff]   ;;  %v2695_v44 = vld [vmem:[%s3650_s1 + $0x350] ss:$8 sps:$4 sm:$0xff]  }
  0x9d   :  { %1892 = vmatprep.subr.bf16.mxu0 %v2612_v45  ;;  %v2698_v45 = vld [vmem:[%s3650_s1 + $0x750] ss:$8 sps:$4 sm:$0xff]  }
  0x9f   :  { %1729 = vmatpush1.bf16.msra.mxu1 %v2607_v46  ;;  %v2703_v46 = vld [vmem:[%s3650_s1 + $0x364] ss:$8 sps:$4 sm:$0xff]  }
  0xa0   :  { %1893 = vmatpush1.bf16.msra.mxu0 %v2610_v47  ;;  %1730 = vmatprep.subr.bf16.mxu1 %v2615_v48  ;;  %v2706_v47 = vld [vmem:[%s3650_s1 + $0x764] ss:$8 sps:$4 sm:$0xff]   ;;  %v2701_v48 = vld [vmem:[%s3650_s1 + $0x360] ss:$8 sps:$4 sm:$0xff]  }
  0xa1   :  { %1894 = vmatprep.subr.bf16.mxu0 %v2618_v49  ;;  %v2704_v49 = vld [vmem:[%s3650_s1 + $0x760] ss:$8 sps:$4 sm:$0xff]  }
  0xa3   :  { %1731 = vmatpush1.bf16.msra.mxu1 %v2613_v50  ;;  %v2709_v50 = vld [vmem:[%s3650_s1 + $0x374] ss:$8 sps:$4 sm:$0xff]  }
  0xa4   :  { %1895 = vmatpush1.bf16.msra.mxu0 %v2616_v51  ;;  %1732 = vmatprep.subr.bf16.mxu1 %v2621_v52  ;;  %v2712_v51 = vld [vmem:[%s3650_s1 + $0x774] ss:$8 sps:$4 sm:$0xff]   ;;  %v2707_v52 = vld [vmem:[%s3650_s1 + $0x370] ss:$8 sps:$4 sm:$0xff]  }
  0xa5   :  { %1896 = vmatprep.subr.bf16.mxu0 %v2624_v53  ;;  %v2710_v53 = vld [vmem:[%s3650_s1 + $0x770] ss:$8 sps:$4 sm:$0xff]  }
  0xa7   :  { %1733 = vmatpush1.bf16.msra.mxu1 %v2619_v54  ;;  %v2715_v54 = vld [vmem:[%s3650_s1 + $0x384] ss:$8 sps:$4 sm:$0xff]  }
  0xa8   :  { %1897 = vmatpush1.bf16.msra.mxu0 %v2622_v55  ;;  %1734 = vmatprep.subr.bf16.mxu1 %v2627_v56  ;;  %v2718_v55 = vld [vmem:[%s3650_s1 + $0x784] ss:$8 sps:$4 sm:$0xff]   ;;  %v2713_v56 = vld [vmem:[%s3650_s1 + $0x380] ss:$8 sps:$4 sm:$0xff]  }
  0xa9   :  { %1898 = vmatprep.subr.bf16.mxu0 %v2630_v57  ;;  %v2716_v57 = vld [vmem:[%s3650_s1 + $0x780] ss:$8 sps:$4 sm:$0xff]  }
  0xab   :  { %1735 = vmatpush1.bf16.msra.mxu1 %v2625_v58  ;;  %v2721_v58 = vld [vmem:[%s3650_s1 + $0x394] ss:$8 sps:$4 sm:$0xff]  }
  0xac   :  { %1899 = vmatpush1.bf16.msra.mxu0 %v2628_v59  ;;  %1736 = vmatprep.subr.bf16.mxu1 %v2633_v60  ;;  %v2724_v59 = vld [vmem:[%s3650_s1 + $0x794] ss:$8 sps:$4 sm:$0xff]   ;;  %v2719_v60 = vld [vmem:[%s3650_s1 + $0x390] ss:$8 sps:$4 sm:$0xff]  }
  0xad   :  { %1900 = vmatprep.subr.bf16.mxu0 %v2636_v61  ;;  %v2722_v61 = vld [vmem:[%s3650_s1 + $0x790] ss:$8 sps:$4 sm:$0xff]  }
  0xaf   :  { %1737 = vmatpush1.bf16.msra.mxu1 %v2631_v62  ;;  %v2727_v62 = vld [vmem:[%s3650_s1 + $0x3a4] ss:$8 sps:$4 sm:$0xff]  }
  0xb0   :  { %1901 = vmatpush1.bf16.msra.mxu0 %v2634_v63  ;;  %1738 = vmatprep.subr.bf16.mxu1 %v2639_v0  ;;  %v2730_v63 = vld [vmem:[%s3650_s1 + $0x7a4] ss:$8 sps:$4 sm:$0xff]   ;;  %v2725_v0 = vld [vmem:[%s3650_s1 + $0x3a0] ss:$8 sps:$4 sm:$0xff]  }
  0xb1   :  { %1902 = vmatprep.subr.bf16.mxu0 %v2642_v1  ;;  %v2728_v1 = vld [vmem:[%s3650_s1 + $0x7a0] ss:$8 sps:$4 sm:$0xff]  }
  0xb3   :  { %1739 = vmatpush1.bf16.msra.mxu1 %v2637_v2  ;;  %v2733_v2 = vld [vmem:[%s3650_s1 + $0x3b4] ss:$8 sps:$4 sm:$0xff]  }
  0xb4   :  { %1903 = vmatpush1.bf16.msra.mxu0 %v2640_v3  ;;  %1740 = vmatprep.subr.bf16.mxu1 %v2645_v4  ;;  %v2736_v3 = vld [vmem:[%s3650_s1 + $0x7b4] ss:$8 sps:$4 sm:$0xff]   ;;  %v2731_v4 = vld [vmem:[%s3650_s1 + $0x3b0] ss:$8 sps:$4 sm:$0xff]  }
  0xb5   :  { %1904 = vmatprep.subr.bf16.mxu0 %v2648_v5  ;;  %v2734_v5 = vld [vmem:[%s3650_s1 + $0x7b0] ss:$8 sps:$4 sm:$0xff]  }
  0xb7   :  { %1741 = vmatpush1.bf16.msra.mxu1 %v2643_v6  ;;  %v2739_v6 = vld [vmem:[%s3650_s1 + $0x3c4] ss:$8 sps:$4 sm:$0xff]  }
  0xb8   :  { %1905 = vmatpush1.bf16.msra.mxu0 %v2646_v7  ;;  %1742 = vmatprep.subr.bf16.mxu1 %v2651_v8  ;;  %v2742_v7 = vld [vmem:[%s3650_s1 + $0x7c4] ss:$8 sps:$4 sm:$0xff]   ;;  %v2737_v8 = vld [vmem:[%s3650_s1 + $0x3c0] ss:$8 sps:$4 sm:$0xff]  }
  0xb9   :  { %1906 = vmatprep.subr.bf16.mxu0 %v2654_v9  ;;  %v2740_v9 = vld [vmem:[%s3650_s1 + $0x7c0] ss:$8 sps:$4 sm:$0xff]  }
  0xbb   :  { %1743 = vmatpush1.bf16.msra.mxu1 %v2649_v10  ;;  %v2745_v10 = vld [vmem:[%s3650_s1 + $0x3d4] ss:$8 sps:$4 sm:$0xff]  }
  0xbc   :  { %1907 = vmatpush1.bf16.msra.mxu0 %v2652_v11  ;;  %1744 = vmatprep.subr.bf16.mxu1 %v2657_v12  ;;  %v2748_v11 = vld [vmem:[%s3650_s1 + $0x7d4] ss:$8 sps:$4 sm:$0xff]   ;;  %v2743_v12 = vld [vmem:[%s3650_s1 + $0x3d0] ss:$8 sps:$4 sm:$0xff]  }
  0xbd   :  { %1908 = vmatprep.subr.bf16.mxu0 %v2660_v13  ;;  %v2746_v13 = vld [vmem:[%s3650_s1 + $0x7d0] ss:$8 sps:$4 sm:$0xff]  }
  0xbf   :  { %1745 = vmatpush1.bf16.msra.mxu1 %v2655_v14  ;;  %v2751_v14 = vld [vmem:[%s3650_s1 + $0x3e4] ss:$8 sps:$4 sm:$0xff]  }
  0xc0   :  { %1909 = vmatpush1.bf16.msra.mxu0 %v2658_v15  ;;  %1755 = vmatprep.subr.bf16.mxu1 %v2665_v16  ;;  %v2754_v15 = vld [vmem:[%s3650_s1 + $0x7e4] ss:$8 sps:$4 sm:$0xff]   ;;  %v2749_v16 = vld [vmem:[%s3650_s1 + $0x3e0] ss:$8 sps:$4 sm:$0xff]  }
  0xc1   :  { %1919 = vmatprep.subr.bf16.mxu0 %v2670_v17  ;;  %v2752_v17 = vld [vmem:[%s3650_s1 + $0x7e0] ss:$8 sps:$4 sm:$0xff]  }
  0xc2   :  { %1747 = vmatmul.mubr.bf16.vlgmr.msra.gmra.mrb[0].mxu1 %v2066_v19  ;;  %v2757_v19 = vld [vmem:[%s3650_s1 + $0x3f4] ss:$8 sps:$4 sm:$0xff]  }
  0xc3   :  { %1911 = vmatmul.mubr.bf16.vlgmr.msra.gmra.mrb[0].mxu0 %v2074_v21  ;;  %1756 = vmatpush1.bf16.msra.mxu1 %v2663_v24  ;;  %v2760_v21 = vld [vmem:[%s3650_s1 + $0x7f4] ss:$8 sps:$4 sm:$0xff]   ;;  %v2755_v24 = vld [vmem:[%s3650_s1 + $0x3f0] ss:$8 sps:$4 sm:$0xff]  }
  0xc4   :  { %1920 = vmatpush1.bf16.msra.mxu0 %v2668_v18  ;;  %1757 = vmatprep.subr.bf16.mxu1 %v2673_v20  ;;  %v2758_v18 = vld [vmem:[%s3650_s1 + $0x7f0] ss:$8 sps:$4 sm:$0xff]   ;;  %v2068_v20 = vcombine.low %v3427_v22, %v3427_v22 }
  0xc5   :  { %1921 = vmatprep.subr.bf16.mxu0 %v2676_v25  ;;  %1787 = vmatprep.mubr.bf16.mxu1 %v2069_v26  ;;  %v2076_v25 = vcombine.low %v3432_v23, %v3432_v23  ;;  %v286_v26 = vlaneseq }
  0xc6   :  { %1951 = vmatprep.mubr.bf16.mxu0 %v2077_v27 }
  0xc7   :  { %1758 = vmatpush1.bf16.msra.mxu1 %v2671_v28  ;;  %v287_v27 = vshrl.u32 %v286_v26, 7 }
  0xc8   :  { %1922 = vmatpush1.bf16.msra.mxu0 %v2674_v29  ;;  %1759 = vmatprep.subr.bf16.mxu1 %v2679_v30  ;;  %v284_v29 = vld [vmem:[%s3652_s2] sm:$0x3] }
  0xc9   :  { %1923 = vmatprep.subr.bf16.mxu0 %v2682_v31  ;;  %v3628_v28 = vsub.s32 0, %v287_v27  ;;  %v3633_v30 = vsub.s32 1, %v287_v27 }
  0xcb   :  { %1760 = vmatpush1.bf16.msra.mxu1 %v2677_v32  ;;  %v289_v31 = vrot.slane %v284_v29, %v3628_v28  ;;  %v293_v22 = vrot.slane %v284_v29, %v3633_v30 }
  0xcc   :  { %1924 = vmatpush1.bf16.msra.mxu0 %v2680_v33  ;;  %1761 = vmatprep.subr.bf16.mxu1 %v2685_v34 }
  0xcd   :  { %1925 = vmatprep.subr.bf16.mxu0 %v2688_v35 }
  0xcf   :  { %1762 = vmatpush1.bf16.msra.mxu1 %v2683_v36 }
  0xd0   :  { %1926 = vmatpush1.bf16.msra.mxu0 %v2686_v37  ;;  %1763 = vmatprep.subr.bf16.mxu1 %v2691_v38 }
  0xd1   :  { %1927 = vmatprep.subr.bf16.mxu0 %v2694_v39 }
  0xd3   :  { %1764 = vmatpush1.bf16.msra.mxu1 %v2689_v40 }
  0xd4   :  { %1928 = vmatpush1.bf16.msra.mxu0 %v2692_v41  ;;  %1765 = vmatprep.subr.bf16.mxu1 %v2697_v42 }
  0xd5   :  { %1929 = vmatprep.subr.bf16.mxu0 %v2700_v43 }
  0xd7   :  { %1766 = vmatpush1.bf16.msra.mxu1 %v2695_v44 }
  0xd8   :  { %1930 = vmatpush1.bf16.msra.mxu0 %v2698_v45  ;;  %1767 = vmatprep.subr.bf16.mxu1 %v2703_v46 }
  0xd9   :  { %1931 = vmatprep.subr.bf16.mxu0 %v2706_v47 }
  0xdb   :  { %1768 = vmatpush1.bf16.msra.mxu1 %v2701_v48 }
  0xdc   :  { %1932 = vmatpush1.bf16.msra.mxu0 %v2704_v49  ;;  %1769 = vmatprep.subr.bf16.mxu1 %v2709_v50 }
  0xdd   :  { %1933 = vmatprep.subr.bf16.mxu0 %v2712_v51 }
  0xdf   :  { %1770 = vmatpush1.bf16.msra.mxu1 %v2707_v52 }
  0xe0   :  { %1934 = vmatpush1.bf16.msra.mxu0 %v2710_v53  ;;  %1771 = vmatprep.subr.bf16.mxu1 %v2715_v54 }
  0xe1   :  { %1935 = vmatprep.subr.bf16.mxu0 %v2718_v55 }
  0xe3   :  { %1772 = vmatpush1.bf16.msra.mxu1 %v2713_v56 }
  0xe4   :  { %1936 = vmatpush1.bf16.msra.mxu0 %v2716_v57  ;;  %1773 = vmatprep.subr.bf16.mxu1 %v2721_v58 }
  0xe5   :  { %1937 = vmatprep.subr.bf16.mxu0 %v2724_v59 }
  0xe7   :  { %1774 = vmatpush1.bf16.msra.mxu1 %v2719_v60 }
  0xe8   :  { %1938 = vmatpush1.bf16.msra.mxu0 %v2722_v61  ;;  %1775 = vmatprep.subr.bf16.mxu1 %v2727_v62 }
  0xe9   :  { %1939 = vmatprep.subr.bf16.mxu0 %v2730_v63 }
  0xeb   :  { %1776 = vmatpush1.bf16.msra.mxu1 %v2725_v0 }
  0xec   :  { %1940 = vmatpush1.bf16.msra.mxu0 %v2728_v1  ;;  %1777 = vmatprep.subr.bf16.mxu1 %v2733_v2 }
  0xed   :  { %1941 = vmatprep.subr.bf16.mxu0 %v2736_v3 }
  0xef   :  { %1778 = vmatpush1.bf16.msra.mxu1 %v2731_v4 }
  0xf0   :  { %1942 = vmatpush1.bf16.msra.mxu0 %v2734_v5  ;;  %1779 = vmatprep.subr.bf16.mxu1 %v2739_v6 }
  0xf1   :  { %1943 = vmatprep.subr.bf16.mxu0 %v2742_v7 }
  0xf3   :  { %1780 = vmatpush1.bf16.msra.mxu1 %v2737_v8 }
  0xf4   :  { %1944 = vmatpush1.bf16.msra.mxu0 %v2740_v9  ;;  %1781 = vmatprep.subr.bf16.mxu1 %v2745_v10 }
  0xf5   :  { %1945 = vmatprep.subr.bf16.mxu0 %v2748_v11 }
  0xf7   :  { %1782 = vmatpush1.bf16.msra.mxu1 %v2743_v12 }
  0xf8   :  { %1946 = vmatpush1.bf16.msra.mxu0 %v2746_v13  ;;  %1783 = vmatprep.subr.bf16.mxu1 %v2751_v14  ;;  %v2769_v13 = vmov 1966171168  }
  0xf9   :  { %1947 = vmatprep.subr.bf16.mxu0 %v2754_v15  ;;  %v2001_v14 = vunpack.c.l.s4 %v2769_v13 }
  0xfb   :  { %1784 = vmatpush1.bf16.msra.mxu1 %v2749_v16  ;;  %v2002_v15 = vunpack.c.0.s8 %v2001_v14 }
  0xfc   :  { %1948 = vmatpush1.bf16.msra.mxu0 %v2752_v17  ;;  %1785 = vmatprep.subr.bf16.mxu1 %v2757_v19 }
  0xfd   :  { %1949 = vmatprep.subr.bf16.mxu0 %v2760_v21  ;;  %v2005_v17 = vsub.s32 %v2002_v15, %v287_v27 }
  0xff   :  { %1786 = vmatpush1.bf16.msra.mxu1 %v2755_v24 }
 0x100   :  { %1950 = vmatpush1.bf16.msra.mxu0 %v2758_v18  ;;  %v1992_v18 = vld [vmem:[%s3653_s3] sm:$0x3] }
 0x102   :  { %1788 = vmatmul.mubr.bf16.vlgmr.msra.gmra.mrb[0].mxu1 %v2068_v20 }
 0x103   :  { %1952 = vmatmul.mubr.bf16.vlgmr.msra.gmra.mrb[0].mxu0 %v2076_v25  ;;  %v2029_v25 = vld [vmem:[%s3654_s4] sm:$0x3] }
 0x104   :  { %v2034_v29 = vrot.slane %v2029_v25, %v3628_v28  ;;  %v2038_v27 = vrot.slane %v2029_v25, %v3633_v30 }
 0x1d5   :  { %v1789_v32 = vpop.f32.mrb[0].mxu1 }
 0x1d6   :  { %v1953_v23 = vpop.f32.mrb[0].mxu0  ;;  %v2336_v33 = vadd.f32 %v1789_v32, %v289_v31  ;;  %v1791_v34 = vpop.f32.mrb[1].mxu1 }
 0x1d7   :  { %v1955_v35 = vpop.f32.mrb[1].mxu0  ;;  %v2338_v36 = vadd.f32 %v1791_v34, %v293_v22  ;;  %v1793_v37 = vpop.f32.mrb[2].mxu1 }
 0x1d8   :  { %v1957_v38 = vpop.f32.mrb[2].mxu0  ;;  %v2337_v39 = vadd.f32 %v2336_v33, %v1953_v23  ;;  %v1794_v40 = vpop.f32.mrb[3].mxu1 }
 0x1d9   :  { %v1958_v41 = vpop.f32.mrb[3].mxu0  ;;  %v2339_v42 = vadd.f32 %v2338_v36, %v1955_v35 }
 0x1da   :  { %v1960_v43 = vrot.slane %v2337_v39, 4 }
 0x1db   :  { %v1966_v44 = vrot.slane %v2339_v42, 4 }
 0x1dc   :  { %v1961_v45 = vadd.f32 %v2337_v39, %v1960_v43 }
 0x1dd   :  { %v1967_v46 = vadd.f32 %v2339_v42, %v1966_v44 }
 0x1de   :  { %v1962_v47 = vrot.slane %v1961_v45, 2 }
 0x1df   :  { %v1968_v48 = vrot.slane %v1967_v46, 2 }
 0x1e0   :  { %v1963_v49 = vadd.f32 %v1962_v47, %v1961_v45 }
 0x1e1   :  { %v1969_v50 = vadd.f32 %v1968_v48, %v1967_v46 }
 0x1e2   :  { %v1964_v51 = vrot.slane %v1963_v49, 1 }
 0x1e3   :  { %v1970_v52 = vrot.slane %v1969_v50, 1 }
 0x1e4   :  { %v1965_v53 = vadd.f32 %v1964_v51, %v1963_v49 }
 0x1e5   :  { %v1971_v54 = vadd.f32 %v1970_v52, %v1969_v50 }
 0x1e6   :  { %v1972_v55 = vmul.f32 0.125, %v1965_v53 }
 0x1e7   :  { %v1973_v56 = vmul.f32 0.125, %v1971_v54 }
 0x1e8   :  { %v1974_v57 = vsub.f32 %v2337_v39, %v1972_v55 }
 0x1e9   :  { %v1975_v58 = vsub.f32 %v2339_v42, %v1973_v56 }
 0x1ea   :  { %v1976_v59 = vmul.f32 %v1974_v57, %v1974_v57 }
 0x1eb   :  { %v1977_v60 = vmul.f32 %v1975_v58, %v1975_v58 }
 0x1ec   :  { %v1978_v61 = vrot.slane %v1976_v59, 4 }
 0x1ed   :  { %v1984_v62 = vrot.slane %v1977_v60, 4 }
 0x1ee   :  { %v1979_v63 = vadd.f32 %v1978_v61, %v1976_v59 }
 0x1ef   :  { %v1985_v0 = vadd.f32 %v1984_v62, %v1977_v60 }
 0x1f0   :  { %v1980_v1 = vrot.slane %v1979_v63, 2 }
 0x1f1   :  { %v1986_v2 = vrot.slane %v1985_v0, 2 }
 0x1f2   :  { %v1981_v3 = vadd.f32 %v1980_v1, %v1979_v63 }
 0x1f3   :  { %v1987_v4 = vadd.f32 %v1986_v2, %v1985_v0 }
 0x1f4   :  { %v1982_v5 = vrot.slane %v1981_v3, 1 }
 0x1f5   :  { %v1988_v6 = vrot.slane %v1987_v4, 1 }
 0x1f6   :  { %v1983_v7 = vadd.f32 %v1982_v5, %v1981_v3 }
 0x1f7   :  { %v1989_v8 = vadd.f32 %v1988_v6, %v1987_v4 }
 0x1f8   :  { %v1990_v9 = vmul.f32 0.125, %v1983_v7 }
 0x1f9   :  { %v1991_v10 = vmul.f32 0.125, %v1989_v8 }
 0x1fa   :  { %v1993_v11 = vadd.f32 1e-05, %v1990_v9 }
 0x1fb   :  { %v1994_v12 = vadd.f32 1e-05, %v1991_v10 }
 0x1fc   :  { %2765 = vrsqrt.f32 %v1993_v11 }
 0x1fd   :  { %2767 = vrsqrt.f32 %v1994_v12 }
 0x206   :  { %v2766_v16 = vpop.eup %2765 }
 0x207   :  { %v2768_v19 = vpop.eup %2767 }
 0x208   :  { %v1999_v21 = vcombine.low %v2766_v16, %v2768_v19 }
 0x20a   :  { %v2006_v24 = vrot.slane %v1999_v21, %v2005_v17 }
 0x20c   :  { %v2013_v20 = vrot.slane %v2006_v24, %v2005_v17 }
 0x20e   :  { %v2015_v26 = vmul.f32 %v2013_v20, %v1992_v18 }
 0x210   :  { %v2020_v31 = vrot.slane %v2015_v26, %v3628_v28  ;;  %v2024_v22 = vrot.slane %v2015_v26, %v3633_v30 }
 0x212   :  { %v2027_v32 = vmul.f32 %v2020_v31, %v1974_v57  ;;  %v2028_v23 = vmul.f32 %v2024_v22, %v1975_v58 }
 0x214   :  { %v2041_v33 = vadd.f32 %v2034_v29, %v2027_v32  ;;  %v2042_v34 = vadd.f32 %v2038_v27, %v2028_v23 }
 0x216   :  { %vm2043_vm0 = vcmp.ge.f32.partialorder %v2041_v33, 0.0  ;;  %vm2044_vm1 = vcmp.ge.f32.partialorder %v2042_v34, 0.0  ;;  %v2045_v35 = vmul.f32 0.2, %v2041_v33  ;;  %v2046_v36 = vmul.f32 0.2, %v2042_v34 }
 0x218   :  { %v2047_v37 = vsel %vm2043_vm0, %v2041_v33, %v2045_v35  ;;  %v2048_v38 = vsel %vm2044_vm1, %v2042_v34, %v2046_v36 }
 0x219   :  { %v2335_v39 = vpack.c.bf16 %v2048_v38, %v2047_v37 }
 0x21b   :  { %2057 = vst [vmem:[%s3655_s5] sm:$0xff] %v2335_v39 }

// kernel: discriminator_forward.9
= control target key start
LH: loop header
LB: loop body
LE: loop exit
PB: predicated region body
PF: predicated region fallthrough
CT: control target
= control target key end

     0   :  { %v3832_v22 = vmov 1966171168   ;;  %v546_v24 = vlaneseq  ;;  %s4685_s1 = inlined_call_operand.vmem [shape: bf16[4096,128], index: 1, kind: input, shape index: {}]   ;;  %s4686_s0 = inlined_call_operand.vmem [shape: bf16[2,4096], index: 0, kind: input, shape index: {}]   ;;  %s4687_s2 = inlined_call_operand.vmem [shape: f32[1,128], index: 2, kind: input, shape index: {}]   ;;  %s4688_s3 = inlined_call_operand.vmem [shape: f32[2,128], index: 3, kind: output, shape index: {}]  }
   0x1   :  { %v3568_v0 = vld [vmem:[%s4685_s1 + $0x40] sm:$0xff]   ;;  %v3572_v4 = vld [vmem:[%s4685_s1 + $0x48] sm:$0xff]   ;;  %v3576_v8 = vld [vmem:[%s4685_s1 + $0x50] sm:$0xff]   ;;  %v544_v23 = vunpack.c.l.s4 %v3832_v22 }
   0x2   :  { %v3569_v1 = vld [vmem:[%s4685_s1 + $0xc0] sm:$0xff]   ;;  %3215 = vmatprep.subr.bf16.mxu0 %v3568_v0  ;;  %v3573_v5 = vld [vmem:[%s4685_s1 + $0xc8] sm:$0xff]   ;;  %v3577_v9 = vld [vmem:[%s4685_s1 + $0xd0] sm:$0xff]   ;;  %v547_v30 = vshrl.u32 %v546_v24, 7 }
   0x3   :  { %v3570_v2 = vld [vmem:[%s4685_s1] sm:$0xff]   ;;  %3237 = vmatprep.subr.bf16.mxu1 %v3569_v1  ;;  %v3574_v6 = vld [vmem:[%s4685_s1 + $0x8] sm:$0xff]   ;;  %v3578_v10 = vld [vmem:[%s4685_s1 + $0x10] sm:$0xff]   ;;  %v545_v29 = vunpack.c.0.s8 %v544_v23 }
   0x4   :  { %v3571_v3 = vld [vmem:[%s4685_s1 + $0x80] sm:$0xff]   ;;  %3216 = vmatpush3.bf16.msra.mxu0 %v3570_v2  ;;  %v3575_v7 = vld [vmem:[%s4685_s1 + $0x88] sm:$0xff]   ;;  %v3579_v11 = vld [vmem:[%s4685_s1 + $0x90] sm:$0xff]  }
   0x5   :  { %3238 = vmatpush3.bf16.msra.mxu1 %v3571_v3  ;;  %3217 = vmatprep.subr.bf16.mxu0 %v3572_v4  ;;  %v3580_v12 = vld [vmem:[%s4685_s1 + $0x58] sm:$0xff]   ;;  %v3584_v16 = vld [vmem:[%s4685_s1 + $0x60] sm:$0xff]   ;;  %v3588_v20 = vld [vmem:[%s4685_s1 + $0x68] sm:$0xff]   ;;  %v3943_v35 = vsub.s32 %v545_v29, %v547_v30 }
   0x6   :  { %3239 = vmatprep.subr.bf16.mxu1 %v3573_v5  ;;  %v3581_v13 = vld [vmem:[%s4685_s1 + $0xd8] sm:$0xff]   ;;  %v3585_v17 = vld [vmem:[%s4685_s1 + $0xe0] sm:$0xff]   ;;  %v3589_v21 = vld [vmem:[%s4685_s1 + $0xe8] sm:$0xff]  }
   0x7   :  { %v3582_v14 = vld [vmem:[%s4685_s1 + $0x18] sm:$0xff]   ;;  %v3586_v18 = vld [vmem:[%s4685_s1 + $0x20] sm:$0xff]   ;;  %v3590_v25 = vld [vmem:[%s4685_s1 + $0x28] sm:$0xff]  }
   0x8   :  { %3218 = vmatpush3.bf16.msra.mxu0 %v3574_v6  ;;  %v3583_v15 = vld [vmem:[%s4685_s1 + $0x98] sm:$0xff]   ;;  %v3587_v19 = vld [vmem:[%s4685_s1 + $0xa0] sm:$0xff]   ;;  %v3591_v26 = vld [vmem:[%s4685_s1 + $0xa8] sm:$0xff]  }
   0x9   :  { %3240 = vmatpush3.bf16.msra.mxu1 %v3575_v7  ;;  %3219 = vmatprep.subr.bf16.mxu0 %v3576_v8  ;;  %v3592_v27 = vld [vmem:[%s4685_s1 + $0x70] sm:$0xff]   ;;  %v3596_v33 = vld [vmem:[%s4685_s1 + $0x78] sm:$0xff]   ;;  %v15_v38 = vld [vmem:[%s4686_s0] sm:$0xff] }
   0xa   :  { %3241 = vmatprep.subr.bf16.mxu1 %v3577_v9  ;;  %v3593_v28 = vld [vmem:[%s4685_s1 + $0xf0] sm:$0xff]   ;;  %v3597_v34 = vld [vmem:[%s4685_s1 + $0xf8] sm:$0xff]   ;;  %v542_v39 = vcombine.high %v15_v38, %v15_v38  ;;  %v549_v40 = vrot.slane %v15_v38, %v3943_v35  ;;  %v3601_v41 = vld [vmem:[%s4685_s1 + $0x140] sm:$0xff]  }
   0xb   :  { %v3594_v31 = vld [vmem:[%s4685_s1 + $0x30] sm:$0xff]   ;;  %v3598_v36 = vld [vmem:[%s4685_s1 + $0x38] sm:$0xff]   ;;  %v3602_v42 = vld [vmem:[%s4685_s1 + $0x1c0] sm:$0xff]  }
   0xc   :  { %3220 = vmatpush3.bf16.msra.mxu0 %v3578_v10  ;;  %v3595_v32 = vld [vmem:[%s4685_s1 + $0xb0] sm:$0xff]   ;;  %v3599_v37 = vld [vmem:[%s4685_s1 + $0xb8] sm:$0xff]   ;;  %v557_v43 = vcombine.high %v549_v40, %v549_v40  ;;  %v565_v44 = vrot.slane %v549_v40, %v3943_v35  ;;  %v3963_v45 = vrot.slane %v542_v39, %v3943_v35  ;;  %v3603_v46 = vld [vmem:[%s4685_s1 + $0x100] sm:$0xff]  }
   0xd   :  { %3242 = vmatpush3.bf16.msra.mxu1 %v3579_v11  ;;  %3221 = vmatprep.subr.bf16.mxu0 %v3580_v12  ;;  %v3604_v48 = vld [vmem:[%s4685_s1 + $0x180] sm:$0xff]   ;;  %v3605_v51 = vld [vmem:[%s4685_s1 + $0x148] sm:$0xff]   ;;  %v3609_v58 = vld [vmem:[%s4685_s1 + $0x150] sm:$0xff]  }
   0xe   :  { %3243 = vmatprep.subr.bf16.mxu1 %v3581_v13  ;;  %v579_v47 = vrot.slane %v557_v43, %v3943_v35  ;;  %v558_v49 = vcombine.high %v3963_v45, %v3963_v45  ;;  %v587_v50 = vcombine.high %v565_v44, %v565_v44  ;;  %v3606_v53 = vld [vmem:[%s4685_s1 + $0x1c8] sm:$0xff]   ;;  %v3610_v59 = vld [vmem:[%s4685_s1 + $0x1d0] sm:$0xff]   ;;  %v3613_v62 = vld [vmem:[%s4685_s1 + $0x158] sm:$0xff]  }
   0xf   :  { %v3607_v55 = vld [vmem:[%s4685_s1 + $0x108] sm:$0xff]   ;;  %v3611_v60 = vld [vmem:[%s4685_s1 + $0x110] sm:$0xff]   ;;  %v3614_v63 = vld [vmem:[%s4685_s1 + $0x1d8] sm:$0xff]  }
  0x10   :  { %3222 = vmatpush3.bf16.msra.mxu0 %v3582_v14  ;;  %2338 = vmatprep.mubr.bf16.mxu0 %v579_v47  ;;  %v589_v52 = vcombine.high %v579_v47, %v579_v47  ;;  %v586_v54 = vrot.slane %v558_v49, %v3943_v35  ;;  %v3608_v56 = vld [vmem:[%s4685_s1 + $0x188] sm:$0xff]   ;;  %v3612_v61 = vld [vmem:[%s4685_s1 + $0x190] sm:$0xff]   ;;  %v3615_v0 = vld [vmem:[%s4685_s1 + $0x118] sm:$0xff]  }
  0x11   :  { %3244 = vmatpush3.bf16.msra.mxu1 %v3583_v15  ;;  %3223 = vmatprep.subr.bf16.mxu0 %v3584_v16  ;;  %v3616_v1 = vld [vmem:[%s4685_s1 + $0x198] sm:$0xff]   ;;  %v3617_v2 = vld [vmem:[%s4685_s1 + $0x160] sm:$0xff]   ;;  %v3621_v6 = vld [vmem:[%s4685_s1 + $0x168] sm:$0xff]  }
  0x12   :  { %3245 = vmatprep.subr.bf16.mxu1 %v3585_v17  ;;  %2378 = vmatprep.mubr.bf16.mxu1 %v589_v52  ;;  %v590_v57 = vcombine.high %v586_v54, %v586_v54  ;;  %v3618_v3 = vld [vmem:[%s4685_s1 + $0x1e0] sm:$0xff]   ;;  %v3622_v7 = vld [vmem:[%s4685_s1 + $0x1e8] sm:$0xff]   ;;  %v3625_v10 = vld [vmem:[%s4685_s1 + $0x170] sm:$0xff]  }
  0x13   :  { %v3619_v4 = vld [vmem:[%s4685_s1 + $0x120] sm:$0xff]   ;;  %v3623_v8 = vld [vmem:[%s4685_s1 + $0x128] sm:$0xff]   ;;  %v3626_v11 = vld [vmem:[%s4685_s1 + $0x1f0] sm:$0xff]  }
  0x14   :  { %3224 = vmatpush3.bf16.msra.mxu0 %v3586_v18  ;;  %v3620_v5 = vld [vmem:[%s4685_s1 + $0x1a0] sm:$0xff]   ;;  %v3624_v9 = vld [vmem:[%s4685_s1 + $0x1a8] sm:$0xff]   ;;  %v3627_v12 = vld [vmem:[%s4685_s1 + $0x130] sm:$0xff]   ;;  %v572_v18 = vrot.slane %v3963_v45, %v3943_v35 }
  0x15   :  { %3246 = vmatpush3.bf16.msra.mxu1 %v3587_v19  ;;  %3225 = vmatprep.subr.bf16.mxu0 %v3588_v20  ;;  %v3628_v13 = vld [vmem:[%s4685_s1 + $0x1b0] sm:$0xff]   ;;  %v3629_v14 = vld [vmem:[%s4685_s1 + $0x178] sm:$0xff]   ;;  %v3633_v19 = vld [vmem:[%s4685_s1 + $0x240] sm:$0xff]  }
  0x16   :  { %3247 = vmatprep.subr.bf16.mxu1 %v3589_v21  ;;  %v3630_v15 = vld [vmem:[%s4685_s1 + $0x1f8] sm:$0xff]   ;;  %v3634_v20 = vld [vmem:[%s4685_s1 + $0x2c0] sm:$0xff]   ;;  %v588_v23 = vcombine.high %v572_v18, %v572_v18  ;;  %v3637_v24 = vld [vmem:[%s4685_s1 + $0x248] sm:$0xff]  }
  0x17   :  { %v3631_v16 = vld [vmem:[%s4685_s1 + $0x138] sm:$0xff]   ;;  %v3635_v21 = vld [vmem:[%s4685_s1 + $0x200] sm:$0xff]   ;;  %v3642_v29 = vld [vmem:[%s4685_s1 + $0x2d0] sm:$0xff]  }
  0x18   :  { %3226 = vmatpush3.bf16.msra.mxu0 %v3590_v25  ;;  %v3632_v17 = vld [vmem:[%s4685_s1 + $0x1b8] sm:$0xff]   ;;  %v3636_v22 = vld [vmem:[%s4685_s1 + $0x280] sm:$0xff]   ;;  %v3638_v25 = vld [vmem:[%s4685_s1 + $0x2c8] sm:$0xff]  }
  0x19   :  { %3248 = vmatpush3.bf16.msra.mxu1 %v3591_v26  ;;  %3227 = vmatprep.subr.bf16.mxu0 %v3592_v27  ;;  %v3639_v26 = vld [vmem:[%s4685_s1 + $0x208] sm:$0xff]   ;;  %v3643_v30 = vld [vmem:[%s4685_s1 + $0x210] sm:$0xff]   ;;  %v3650_v38 = vld [vmem:[%s4685_s1 + $0x2e0] sm:$0xff]  }
  0x1a   :  { %3249 = vmatprep.subr.bf16.mxu1 %v3593_v28  ;;  %v3640_v27 = vld [vmem:[%s4685_s1 + $0x288] sm:$0xff]   ;;  %v3641_v28 = vld [vmem:[%s4685_s1 + $0x250] sm:$0xff]   ;;  %v3651_v39 = vld [vmem:[%s4685_s1 + $0x220] sm:$0xff]  }
  0x1b   :  { %v3652_v40 = vld [vmem:[%s4685_s1 + $0x2a0] sm:$0xff]   ;;  %v3655_v43 = vld [vmem:[%s4685_s1 + $0x228] sm:$0xff]   ;;  %v3657_v45 = vld [vmem:[%s4685_s1 + $0x270] sm:$0xff]  }
  0x1c   :  { %3228 = vmatpush3.bf16.msra.mxu0 %v3594_v31  ;;  %v3644_v31 = vld [vmem:[%s4685_s1 + $0x290] sm:$0xff]   ;;  %v3661_v49 = vld [vmem:[%s4685_s1 + $0x278] sm:$0xff]   ;;  %v16_v52 = vld [vmem:[%s4686_s0 + $0x8] sm:$0xff] }
  0x1d   :  { %3250 = vmatpush3.bf16.msra.mxu1 %v3595_v32  ;;  %3229 = vmatprep.subr.bf16.mxu0 %v3596_v33  ;;  %v3645_v32 = vld [vmem:[%s4685_s1 + $0x258] sm:$0xff]   ;;  %v3659_v47 = vld [vmem:[%s4685_s1 + $0x230] sm:$0xff]  }
  0x1e   :  { %3251 = vmatprep.subr.bf16.mxu1 %v3597_v34  ;;  %v3646_v33 = vld [vmem:[%s4685_s1 + $0x2d8] sm:$0xff]  }
  0x1f   :  { %v3647_v34 = vld [vmem:[%s4685_s1 + $0x218] sm:$0xff]  }
  0x20   :  { %3230 = vmatpush3.bf16.msra.mxu0 %v3598_v36  ;;  %v3648_v36 = vld [vmem:[%s4685_s1 + $0x298] sm:$0xff]  }
  0x21   :  { %3252 = vmatpush3.bf16.msra.mxu1 %v3599_v37  ;;  %3259 = vmatprep.subr.bf16.mxu0 %v3601_v41  ;;  %v3649_v37 = vld [vmem:[%s4685_s1 + $0x260] sm:$0xff]   ;;  %v3653_v41 = vld [vmem:[%s4685_s1 + $0x268] sm:$0xff]  }
  0x22   :  { %3281 = vmatprep.subr.bf16.mxu1 %v3602_v42  ;;  %v3654_v42 = vld [vmem:[%s4685_s1 + $0x2e8] sm:$0xff]  }
  0x23   :  { %2339 = vmatmul.mubr.bf16.vlgmr.msra.gmra.mrb[0].mxu0 %v565_v44  ;;  %v3656_v44 = vld [vmem:[%s4685_s1 + $0x2a8] sm:$0xff]  }
  0x24   :  { %3260 = vmatpush3.bf16.msra.mxu0 %v3603_v46  ;;  %2379 = vmatmul.mubr.bf16.vlgmr.msra.gmra.mrb[0].mxu1 %v587_v50  ;;  %v3658_v46 = vld [vmem:[%s4685_s1 + $0x2f0] sm:$0xff]   ;;  %v3662_v50 = vld [vmem:[%s4685_s1 + $0x2f8] sm:$0xff]  }
  0x25   :  { %3261 = vmatprep.subr.bf16.mxu0 %v3605_v51  ;;  %3282 = vmatpush3.bf16.msra.mxu1 %v3604_v48  ;;  %v3660_v48 = vld [vmem:[%s4685_s1 + $0x2b0] sm:$0xff]   ;;  %v3663_v51 = vld [vmem:[%s4685_s1 + $0x238] sm:$0xff]  }
  0x26   :  { %2418 = vmatprep.mubr.bf16.mxu0 %v586_v54  ;;  %3283 = vmatprep.subr.bf16.mxu1 %v3606_v53  ;;  %v3664_v53 = vld [vmem:[%s4685_s1 + $0x2b8] sm:$0xff]   ;;  %v598_v54 = vrot.slane %v16_v52, %v3943_v35 }
  0x27   :  { %2458 = vmatprep.mubr.bf16.mxu1 %v590_v57 }
  0x28   :  { %3262 = vmatpush3.bf16.msra.mxu0 %v3607_v55  ;;  %v591_v55 = vcombine.high %v16_v52, %v16_v52  ;;  %v606_v57 = vcombine.high %v598_v54, %v598_v54  ;;  %v3714_v52 = vld [vmem:[%s4685_s1 + $0x460] sm:$0xff]  }
  0x29   :  { %3263 = vmatprep.subr.bf16.mxu0 %v3609_v58  ;;  %3284 = vmatpush3.bf16.msra.mxu1 %v3608_v56  ;;  %v3665_v56 = vld [vmem:[%s4685_s1 + $0x340] sm:$0xff]   ;;  %v614_v58 = vrot.slane %v598_v54, %v3943_v35 }
  0x2a   :  { %3285 = vmatprep.subr.bf16.mxu1 %v3610_v59  ;;  %v3666_v59 = vld [vmem:[%s4685_s1 + $0x3c0] sm:$0xff]  }
  0x2b   :  { %v3716_v54 = vld [vmem:[%s4685_s1 + $0x420] sm:$0xff]  }
  0x2c   :  { %3264 = vmatpush3.bf16.msra.mxu0 %v3611_v60  ;;  %v4169_v60 = vrot.slane %v591_v55, %v3943_v35  ;;  %v3717_v55 = vld [vmem:[%s4685_s1 + $0x4a0] sm:$0xff]  }
  0x2d   :  { %3265 = vmatprep.subr.bf16.mxu0 %v3613_v62  ;;  %3286 = vmatpush3.bf16.msra.mxu1 %v3612_v61  ;;  %v3667_v61 = vld [vmem:[%s4685_s1 + $0x300] sm:$0xff]   ;;  %v628_v62 = vrot.slane %v606_v57, %v3943_v35  ;;  %v3719_v57 = vld [vmem:[%s4685_s1 + $0x4e8] sm:$0xff]  }
  0x2e   :  { %3287 = vmatprep.subr.bf16.mxu1 %v3614_v63  ;;  %v3668_v63 = vld [vmem:[%s4685_s1 + $0x380] sm:$0xff]  }
  0x30   :  { %3266 = vmatpush3.bf16.msra.mxu0 %v3615_v0  ;;  %v607_v0 = vcombine.high %v4169_v60, %v4169_v60 }
  0x31   :  { %3267 = vmatprep.subr.bf16.mxu0 %v3617_v2  ;;  %3288 = vmatpush3.bf16.msra.mxu1 %v3616_v1  ;;  %v636_v1 = vcombine.high %v614_v58, %v614_v58  ;;  %v3669_v2 = vld [vmem:[%s4685_s1 + $0x348] sm:$0xff]  }
  0x32   :  { %3289 = vmatprep.subr.bf16.mxu1 %v3618_v3  ;;  %v638_v3 = vcombine.high %v628_v62, %v628_v62 }
  0x34   :  { %3268 = vmatpush3.bf16.msra.mxu0 %v3619_v4  ;;  %v3670_v4 = vld [vmem:[%s4685_s1 + $0x3c8] sm:$0xff]  }
  0x35   :  { %3269 = vmatprep.subr.bf16.mxu0 %v3621_v6  ;;  %3290 = vmatpush3.bf16.msra.mxu1 %v3620_v5  ;;  %v635_v5 = vrot.slane %v607_v0, %v3943_v35  ;;  %v3671_v6 = vld [vmem:[%s4685_s1 + $0x308] sm:$0xff]   ;;  %v3726_v0 = vld [vmem:[%s4685_s1 + $0x478] sm:$0xff]  }
  0x36   :  { %3291 = vmatprep.subr.bf16.mxu1 %v3622_v7  ;;  %v3672_v7 = vld [vmem:[%s4685_s1 + $0x388] sm:$0xff]  }
  0x38   :  { %3270 = vmatpush3.bf16.msra.mxu0 %v3623_v8  ;;  %v639_v8 = vcombine.high %v635_v5, %v635_v5 }
  0x39   :  { %3271 = vmatprep.subr.bf16.mxu0 %v3625_v10  ;;  %3292 = vmatpush3.bf16.msra.mxu1 %v3624_v9  ;;  %v3673_v9 = vld [vmem:[%s4685_s1 + $0x350] sm:$0xff]  }
  0x3a   :  { %3293 = vmatprep.subr.bf16.mxu1 %v3626_v11  ;;  %v3674_v10 = vld [vmem:[%s4685_s1 + $0x3d0] sm:$0xff]  }
  0x3b   :  { %v3675_v11 = vld [vmem:[%s4685_s1 + $0x310] sm:$0xff]  }
  0x3c   :  { %3272 = vmatpush3.bf16.msra.mxu0 %v3627_v12  ;;  %v3676_v12 = vld [vmem:[%s4685_s1 + $0x390] sm:$0xff]  }
  0x3d   :  { %3273 = vmatprep.subr.bf16.mxu0 %v3629_v14  ;;  %3294 = vmatpush3.bf16.msra.mxu1 %v3628_v13  ;;  %v3677_v13 = vld [vmem:[%s4685_s1 + $0x358] sm:$0xff]  }
  0x3e   :  { %3295 = vmatprep.subr.bf16.mxu1 %v3630_v15  ;;  %v3678_v14 = vld [vmem:[%s4685_s1 + $0x3d8] sm:$0xff]  }
  0x3f   :  { %v3679_v15 = vld [vmem:[%s4685_s1 + $0x318] sm:$0xff]  }
  0x40   :  { %3274 = vmatpush3.bf16.msra.mxu0 %v3631_v16  ;;  %v3680_v16 = vld [vmem:[%s4685_s1 + $0x398] sm:$0xff]  }
  0x41   :  { %3303 = vmatprep.subr.bf16.mxu0 %v3633_v19  ;;  %3296 = vmatpush3.bf16.msra.mxu1 %v3632_v17  ;;  %v3681_v17 = vld [vmem:[%s4685_s1 + $0x360] sm:$0xff]  }
  0x42   :  { %3325 = vmatprep.subr.bf16.mxu1 %v3634_v20  ;;  %v3683_v19 = vld [vmem:[%s4685_s1 + $0x320] sm:$0xff]  }
  0x43   :  { %2419 = vmatmul.mubr.bf16.vlgmr.msra.gmra.mrb[4].mxu0 %v572_v18  ;;  %v3682_v18 = vld [vmem:[%s4685_s1 + $0x3e0] sm:$0xff]  }
  0x44   :  { %3304 = vmatpush3.bf16.msra.mxu0 %v3635_v21  ;;  %2459 = vmatmul.mubr.bf16.vlgmr.msra.gmra.mrb[4].mxu1 %v588_v23  ;;  %v3684_v20 = vld [vmem:[%s4685_s1 + $0x3a0] sm:$0xff]   ;;  %v3685_v21 = vld [vmem:[%s4685_s1 + $0x368] sm:$0xff]  }
  0x45   :  { %3305 = vmatprep.subr.bf16.mxu0 %v3637_v24  ;;  %3326 = vmatpush3.bf16.msra.mxu1 %v3636_v22  ;;  %v3686_v22 = vld [vmem:[%s4685_s1 + $0x3e8] sm:$0xff]  }
  0x46   :  { %3327 = vmatprep.subr.bf16.mxu1 %v3638_v25  ;;  %2498 = vmatprep.mubr.bf16.mxu0 %v628_v62  ;;  %v3687_v23 = vld [vmem:[%s4685_s1 + $0x328] sm:$0xff]   ;;  %v3689_v25 = vld [vmem:[%s4685_s1 + $0x370] sm:$0xff]  }
  0x47   :  { %2538 = vmatprep.mubr.bf16.mxu1 %v638_v3  ;;  %v3688_v24 = vld [vmem:[%s4685_s1 + $0x3a8] sm:$0xff]   ;;  %v3724_v62 = vld [vmem:[%s4685_s1 + $0x430] sm:$0xff]  }
  0x48   :  { %3306 = vmatpush3.bf16.msra.mxu0 %v3639_v26  ;;  %v3690_v26 = vld [vmem:[%s4685_s1 + $0x3f0] sm:$0xff]  }
  0x49   :  { %3307 = vmatprep.subr.bf16.mxu0 %v3641_v28  ;;  %3328 = vmatpush3.bf16.msra.mxu1 %v3640_v27  ;;  %v3691_v27 = vld [vmem:[%s4685_s1 + $0x330] sm:$0xff]  }
  0x4a   :  { %3329 = vmatprep.subr.bf16.mxu1 %v3642_v29  ;;  %v3692_v28 = vld [vmem:[%s4685_s1 + $0x3b0] sm:$0xff]   ;;  %v3693_v29 = vld [vmem:[%s4685_s1 + $0x378] sm:$0xff]  }
  0x4b   :  { %v17_v3 = vld [vmem:[%s4686_s0 + $0x10] sm:$0xff] }
  0x4c   :  { %3308 = vmatpush3.bf16.msra.mxu0 %v3643_v30  ;;  %v3694_v30 = vld [vmem:[%s4685_s1 + $0x3f8] sm:$0xff]  }
  0x4d   :  { %3309 = vmatprep.subr.bf16.mxu0 %v3645_v32  ;;  %3330 = vmatpush3.bf16.msra.mxu1 %v3644_v31  ;;  %v3695_v31 = vld [vmem:[%s4685_s1 + $0x338] sm:$0xff]  }
  0x4e   :  { %3331 = vmatprep.subr.bf16.mxu1 %v3646_v33  ;;  %v3696_v32 = vld [vmem:[%s4685_s1 + $0x3b8] sm:$0xff]   ;;  %v621_v33 = vrot.slane %v4169_v60, %v3943_v35  ;;  %v3722_v60 = vld [vmem:[%s4685_s1 + $0x470] sm:$0xff]  }
  0x50   :  { %3310 = vmatpush3.bf16.msra.mxu0 %v3647_v34  ;;  %v3698_v34 = vld [vmem:[%s4685_s1 + $0x440] sm:$0xff]  }
  0x51   :  { %3311 = vmatprep.subr.bf16.mxu0 %v3649_v37  ;;  %3332 = vmatpush3.bf16.msra.mxu1 %v3648_v36  ;;  %v3699_v36 = vld [vmem:[%s4685_s1 + $0x4c0] sm:$0xff]  }
  0x52   :  { %3333 = vmatprep.subr.bf16.mxu1 %v3650_v38  ;;  %v3700_v37 = vld [vmem:[%s4685_s1 + $0x400] sm:$0xff]  }
  0x53   :  { %v3701_v38 = vld [vmem:[%s4685_s1 + $0x480] sm:$0xff]  }
  0x54   :  { %3312 = vmatpush3.bf16.msra.mxu0 %v3651_v39  ;;  %v637_v39 = vcombine.high %v621_v33, %v621_v33 }
  0x55   :  { %3313 = vmatprep.subr.bf16.mxu0 %v3653_v41  ;;  %3334 = vmatpush3.bf16.msra.mxu1 %v3652_v40  ;;  %v3702_v40 = vld [vmem:[%s4685_s1 + $0x448] sm:$0xff]  }
  0x56   :  { %3335 = vmatprep.subr.bf16.mxu1 %v3654_v42  ;;  %v3703_v41 = vld [vmem:[%s4685_s1 + $0x4c8] sm:$0xff]  }
  0x57   :  { %v3704_v42 = vld [vmem:[%s4685_s1 + $0x408] sm:$0xff]  }
  0x58   :  { %3314 = vmatpush3.bf16.msra.mxu0 %v3655_v43  ;;  %v3705_v43 = vld [vmem:[%s4685_s1 + $0x488] sm:$0xff]  }
  0x59   :  { %3315 = vmatprep.subr.bf16.mxu0 %v3657_v45  ;;  %3336 = vmatpush3.bf16.msra.mxu1 %v3656_v44  ;;  %v3706_v44 = vld [vmem:[%s4685_s1 + $0x450] sm:$0xff]  }
  0x5a   :  { %3337 = vmatprep.subr.bf16.mxu1 %v3658_v46  ;;  %v3707_v45 = vld [vmem:[%s4685_s1 + $0x4d0] sm:$0xff]  }
  0x5b   :  { %v3708_v46 = vld [vmem:[%s4685_s1 + $0x410] sm:$0xff]  }
  0x5c   :  { %3316 = vmatpush3.bf16.msra.mxu0 %v3659_v47  ;;  %v3709_v47 = vld [vmem:[%s4685_s1 + $0x490] sm:$0xff]  }
  0x5d   :  { %3317 = vmatprep.subr.bf16.mxu0 %v3661_v49  ;;  %3338 = vmatpush3.bf16.msra.mxu1 %v3660_v48  ;;  %v3710_v48 = vld [vmem:[%s4685_s1 + $0x458] sm:$0xff]  }
  0x5e   :  { %3339 = vmatprep.subr.bf16.mxu1 %v3662_v50  ;;  %v3711_v49 = vld [vmem:[%s4685_s1 + $0x4d8] sm:$0xff]  }
  0x5f   :  { %v3712_v50 = vld [vmem:[%s4685_s1 + $0x418] sm:$0xff]  }
  0x60   :  { %3318 = vmatpush3.bf16.msra.mxu0 %v3663_v51  ;;  %v3713_v51 = vld [vmem:[%s4685_s1 + $0x498] sm:$0xff]  }
  0x61   :  { %3347 = vmatprep.subr.bf16.mxu0 %v3665_v56  ;;  %3340 = vmatpush3.bf16.msra.mxu1 %v3664_v53  ;;  %v3715_v53 = vld [vmem:[%s4685_s1 + $0x4e0] sm:$0xff]   ;;  %v3718_v56 = vld [vmem:[%s4685_s1 + $0x468] sm:$0xff]  }
  0x62   :  { %3369 = vmatprep.subr.bf16.mxu1 %v3666_v59  ;;  %v3721_v59 = vld [vmem:[%s4685_s1 + $0x4a8] sm:$0xff]  }
  0x63   :  { %2499 = vmatmul.mubr.bf16.vlgmr.msra.gmra.mrb[8].mxu0 %v614_v58  ;;  %v3720_v58 = vld [vmem:[%s4685_s1 + $0x428] sm:$0xff]  }
  0x64   :  { %3348 = vmatpush3.bf16.msra.mxu0 %v3667_v61  ;;  %2539 = vmatmul.mubr.bf16.vlgmr.msra.gmra.mrb[8].mxu1 %v636_v1  ;;  %v3723_v61 = vld [vmem:[%s4685_s1 + $0x4f0] sm:$0xff]   ;;  %v3727_v1 = vld [vmem:[%s4685_s1 + $0x4f8] sm:$0xff]  }
  0x65   :  { %3349 = vmatprep.subr.bf16.mxu0 %v3669_v2  ;;  %3370 = vmatpush3.bf16.msra.mxu1 %v3668_v63  ;;  %v3725_v63 = vld [vmem:[%s4685_s1 + $0x4b0] sm:$0xff]   ;;  %v3728_v2 = vld [vmem:[%s4685_s1 + $0x438] sm:$0xff]  }
  0x66   :  { %2578 = vmatprep.mubr.bf16.mxu0 %v635_v5  ;;  %3371 = vmatprep.subr.bf16.mxu1 %v3670_v4  ;;  %v3729_v4 = vld [vmem:[%s4685_s1 + $0x4b8] sm:$0xff]   ;;  %v647_v5 = vrot.slane %v17_v3, %v3943_v35 }
  0x67   :  { %2618 = vmatprep.mubr.bf16.mxu1 %v639_v8 }
  0x68   :  { %3350 = vmatpush3.bf16.msra.mxu0 %v3671_v6  ;;  %v640_v6 = vcombine.high %v17_v3, %v17_v3  ;;  %v655_v8 = vcombine.high %v647_v5, %v647_v5  ;;  %v3779_v3 = vld [vmem:[%s4685_s1 + $0x660] sm:$0xff]  }
  0x69   :  { %3351 = vmatprep.subr.bf16.mxu0 %v3673_v9  ;;  %3372 = vmatpush3.bf16.msra.mxu1 %v3672_v7  ;;  %v3730_v7 = vld [vmem:[%s4685_s1 + $0x540] sm:$0xff]   ;;  %v663_v9 = vrot.slane %v647_v5, %v3943_v35 }
  0x6a   :  { %3373 = vmatprep.subr.bf16.mxu1 %v3674_v10  ;;  %v3731_v10 = vld [vmem:[%s4685_s1 + $0x5c0] sm:$0xff]  }
  0x6b   :  { %v3781_v5 = vld [vmem:[%s4685_s1 + $0x620] sm:$0xff]  }
  0x6c   :  { %3352 = vmatpush3.bf16.msra.mxu0 %v3675_v11  ;;  %v4375_v11 = vrot.slane %v640_v6, %v3943_v35  ;;  %v3782_v6 = vld [vmem:[%s4685_s1 + $0x6a0] sm:$0xff]  }
  0x6d   :  { %3353 = vmatprep.subr.bf16.mxu0 %v3677_v13  ;;  %3374 = vmatpush3.bf16.msra.mxu1 %v3676_v12  ;;  %v3732_v12 = vld [vmem:[%s4685_s1 + $0x500] sm:$0xff]   ;;  %v677_v13 = vrot.slane %v655_v8, %v3943_v35  ;;  %v3784_v8 = vld [vmem:[%s4685_s1 + $0x6e8] sm:$0xff]  }
  0x6e   :  { %3375 = vmatprep.subr.bf16.mxu1 %v3678_v14  ;;  %v3733_v14 = vld [vmem:[%s4685_s1 + $0x580] sm:$0xff]  }
  0x70   :  { %3354 = vmatpush3.bf16.msra.mxu0 %v3679_v15  ;;  %v656_v15 = vcombine.high %v4375_v11, %v4375_v11 }
  0x71   :  { %3355 = vmatprep.subr.bf16.mxu0 %v3681_v17  ;;  %3376 = vmatpush3.bf16.msra.mxu1 %v3680_v16  ;;  %v685_v16 = vcombine.high %v663_v9, %v663_v9  ;;  %v3734_v17 = vld [vmem:[%s4685_s1 + $0x548] sm:$0xff]  }
  0x72   :  { %3377 = vmatprep.subr.bf16.mxu1 %v3682_v18  ;;  %v687_v18 = vcombine.high %v677_v13, %v677_v13 }
  0x74   :  { %3356 = vmatpush3.bf16.msra.mxu0 %v3683_v19  ;;  %v3735_v19 = vld [vmem:[%s4685_s1 + $0x5c8] sm:$0xff]  }
  0x75   :  { %3357 = vmatprep.subr.bf16.mxu0 %v3685_v21  ;;  %3378 = vmatpush3.bf16.msra.mxu1 %v3684_v20  ;;  %v684_v20 = vrot.slane %v656_v15, %v3943_v35  ;;  %v3736_v21 = vld [vmem:[%s4685_s1 + $0x508] sm:$0xff]   ;;  %v3791_v15 = vld [vmem:[%s4685_s1 + $0x678] sm:$0xff]  }
  0x76   :  { %3379 = vmatprep.subr.bf16.mxu1 %v3686_v22  ;;  %v3737_v22 = vld [vmem:[%s4685_s1 + $0x588] sm:$0xff]  }
  0x78   :  { %3358 = vmatpush3.bf16.msra.mxu0 %v3687_v23  ;;  %v688_v23 = vcombine.high %v684_v20, %v684_v20 }
  0x79   :  { %3359 = vmatprep.subr.bf16.mxu0 %v3689_v25  ;;  %3380 = vmatpush3.bf16.msra.mxu1 %v3688_v24  ;;  %v3738_v24 = vld [vmem:[%s4685_s1 + $0x550] sm:$0xff]  }
  0x7a   :  { %3381 = vmatprep.subr.bf16.mxu1 %v3690_v26  ;;  %v3739_v25 = vld [vmem:[%s4685_s1 + $0x5d0] sm:$0xff]  }
  0x7b   :  { %v3740_v26 = vld [vmem:[%s4685_s1 + $0x510] sm:$0xff]  }
  0x7c   :  { %3360 = vmatpush3.bf16.msra.mxu0 %v3691_v27  ;;  %v3741_v27 = vld [vmem:[%s4685_s1 + $0x590] sm:$0xff]  }
  0x7d   :  { %3361 = vmatprep.subr.bf16.mxu0 %v3693_v29  ;;  %3382 = vmatpush3.bf16.msra.mxu1 %v3692_v28  ;;  %v3742_v28 = vld [vmem:[%s4685_s1 + $0x558] sm:$0xff]  }
  0x7e   :  { %3383 = vmatprep.subr.bf16.mxu1 %v3694_v30  ;;  %v3743_v29 = vld [vmem:[%s4685_s1 + $0x5d8] sm:$0xff]  }
  0x7f   :  { %v3744_v30 = vld [vmem:[%s4685_s1 + $0x518] sm:$0xff]  }
  0x80   :  { %3362 = vmatpush3.bf16.msra.mxu0 %v3695_v31  ;;  %v3745_v31 = vld [vmem:[%s4685_s1 + $0x598] sm:$0xff]  }
  0x81   :  { %3391 = vmatprep.subr.bf16.mxu0 %v3698_v34  ;;  %3384 = vmatpush3.bf16.msra.mxu1 %v3696_v32  ;;  %v3746_v32 = vld [vmem:[%s4685_s1 + $0x560] sm:$0xff]  }
  0x82   :  { %3413 = vmatprep.subr.bf16.mxu1 %v3699_v36  ;;  %v3748_v34 = vld [vmem:[%s4685_s1 + $0x520] sm:$0xff]  }
  0x83   :  { %2579 = vmatmul.mubr.bf16.vlgmr.msra.gmra.mrb[12].mxu0 %v621_v33  ;;  %v3747_v33 = vld [vmem:[%s4685_s1 + $0x5e0] sm:$0xff]  }
  0x84   :  { %3392 = vmatpush3.bf16.msra.mxu0 %v3700_v37  ;;  %2619 = vmatmul.mubr.bf16.vlgmr.msra.gmra.mrb[12].mxu1 %v637_v39  ;;  %v3749_v36 = vld [vmem:[%s4685_s1 + $0x5a0] sm:$0xff]   ;;  %v3750_v37 = vld [vmem:[%s4685_s1 + $0x568] sm:$0xff]  }
  0x85   :  { %3393 = vmatprep.subr.bf16.mxu0 %v3702_v40  ;;  %3414 = vmatpush3.bf16.msra.mxu1 %v3701_v38  ;;  %v3751_v38 = vld [vmem:[%s4685_s1 + $0x5e8] sm:$0xff]  }
  0x86   :  { %3415 = vmatprep.subr.bf16.mxu1 %v3703_v41  ;;  %2658 = vmatprep.mubr.bf16.mxu0 %v677_v13  ;;  %v3752_v39 = vld [vmem:[%s4685_s1 + $0x528] sm:$0xff]   ;;  %v3754_v41 = vld [vmem:[%s4685_s1 + $0x570] sm:$0xff]  }
  0x87   :  { %2698 = vmatprep.mubr.bf16.mxu1 %v687_v18  ;;  %v3753_v40 = vld [vmem:[%s4685_s1 + $0x5a8] sm:$0xff]   ;;  %v3789_v13 = vld [vmem:[%s4685_s1 + $0x630] sm:$0xff]   ;;  %v18_v18 = vld [vmem:[%s4686_s0 + $0x18] sm:$0xff] }
  0x88   :  { %3394 = vmatpush3.bf16.msra.mxu0 %v3704_v42  ;;  %v3755_v42 = vld [vmem:[%s4685_s1 + $0x5f0] sm:$0xff]  }
  0x89   :  { %3395 = vmatprep.subr.bf16.mxu0 %v3706_v44  ;;  %3416 = vmatpush3.bf16.msra.mxu1 %v3705_v43  ;;  %v3756_v43 = vld [vmem:[%s4685_s1 + $0x530] sm:$0xff]  }
  0x8a   :  { %3417 = vmatprep.subr.bf16.mxu1 %v3707_v45  ;;  %v3757_v44 = vld [vmem:[%s4685_s1 + $0x5b0] sm:$0xff]   ;;  %v3758_v45 = vld [vmem:[%s4685_s1 + $0x578] sm:$0xff]  }
  0x8c   :  { %3396 = vmatpush3.bf16.msra.mxu0 %v3708_v46  ;;  %v3759_v46 = vld [vmem:[%s4685_s1 + $0x5f8] sm:$0xff]  }
  0x8d   :  { %3397 = vmatprep.subr.bf16.mxu0 %v3710_v48  ;;  %3418 = vmatpush3.bf16.msra.mxu1 %v3709_v47  ;;  %v3760_v47 = vld [vmem:[%s4685_s1 + $0x538] sm:$0xff]  }
  0x8e   :  { %3419 = vmatprep.subr.bf16.mxu1 %v3711_v49  ;;  %v3761_v48 = vld [vmem:[%s4685_s1 + $0x5b8] sm:$0xff]   ;;  %v670_v49 = vrot.slane %v4375_v11, %v3943_v35  ;;  %v3787_v11 = vld [vmem:[%s4685_s1 + $0x670] sm:$0xff]  }
  0x90   :  { %3398 = vmatpush3.bf16.msra.mxu0 %v3712_v50  ;;  %v3763_v50 = vld [vmem:[%s4685_s1 + $0x640] sm:$0xff]  }
  0x91   :  { %3399 = vmatprep.subr.bf16.mxu0 %v3714_v52  ;;  %3420 = vmatpush3.bf16.msra.mxu1 %v3713_v51  ;;  %v3764_v51 = vld [vmem:[%s4685_s1 + $0x6c0] sm:$0xff]  }
  0x92   :  { %3421 = vmatprep.subr.bf16.mxu1 %v3715_v53  ;;  %v3765_v52 = vld [vmem:[%s4685_s1 + $0x600] sm:$0xff]  }
  0x93   :  { %v3766_v53 = vld [vmem:[%s4685_s1 + $0x680] sm:$0xff]  }
  0x94   :  { %3400 = vmatpush3.bf16.msra.mxu0 %v3716_v54  ;;  %v686_v54 = vcombine.high %v670_v49, %v670_v49 }
  0x95   :  { %3401 = vmatprep.subr.bf16.mxu0 %v3718_v56  ;;  %3422 = vmatpush3.bf16.msra.mxu1 %v3717_v55  ;;  %v3767_v55 = vld [vmem:[%s4685_s1 + $0x648] sm:$0xff]  }
  0x96   :  { %3423 = vmatprep.subr.bf16.mxu1 %v3719_v57  ;;  %v3768_v56 = vld [vmem:[%s4685_s1 + $0x6c8] sm:$0xff]  }
  0x97   :  { %v3769_v57 = vld [vmem:[%s4685_s1 + $0x608] sm:$0xff]  }
  0x98   :  { %3402 = vmatpush3.bf16.msra.mxu0 %v3720_v58  ;;  %v3770_v58 = vld [vmem:[%s4685_s1 + $0x688] sm:$0xff]  }
  0x99   :  { %3403 = vmatprep.subr.bf16.mxu0 %v3722_v60  ;;  %3424 = vmatpush3.bf16.msra.mxu1 %v3721_v59  ;;  %v3771_v59 = vld [vmem:[%s4685_s1 + $0x650] sm:$0xff]  }
  0x9a   :  { %3425 = vmatprep.subr.bf16.mxu1 %v3723_v61  ;;  %v3772_v60 = vld [vmem:[%s4685_s1 + $0x6d0] sm:$0xff]  }
  0x9b   :  { %v3773_v61 = vld [vmem:[%s4685_s1 + $0x610] sm:$0xff]  }
  0x9c   :  { %3404 = vmatpush3.bf16.msra.mxu0 %v3724_v62  ;;  %v3774_v62 = vld [vmem:[%s4685_s1 + $0x690] sm:$0xff]  }
  0x9d   :  { %3405 = vmatprep.subr.bf16.mxu0 %v3726_v0  ;;  %3426 = vmatpush3.bf16.msra.mxu1 %v3725_v63  ;;  %v3775_v63 = vld [vmem:[%s4685_s1 + $0x658] sm:$0xff]  }
  0x9e   :  { %3427 = vmatprep.subr.bf16.mxu1 %v3727_v1  ;;  %v3776_v0 = vld [vmem:[%s4685_s1 + $0x6d8] sm:$0xff]  }
  0x9f   :  { %v3777_v1 = vld [vmem:[%s4685_s1 + $0x618] sm:$0xff]  }
  0xa0   :  { %3406 = vmatpush3.bf16.msra.mxu0 %v3728_v2  ;;  %v3778_v2 = vld [vmem:[%s4685_s1 + $0x698] sm:$0xff]  }
  0xa1   :  { %3435 = vmatprep.subr.bf16.mxu0 %v3730_v7  ;;  %3428 = vmatpush3.bf16.msra.mxu1 %v3729_v4  ;;  %v3780_v4 = vld [vmem:[%s4685_s1 + $0x6e0] sm:$0xff]   ;;  %v3783_v7 = vld [vmem:[%s4685_s1 + $0x668] sm:$0xff]  }
  0xa2   :  { %3457 = vmatprep.subr.bf16.mxu1 %v3731_v10  ;;  %v3786_v10 = vld [vmem:[%s4685_s1 + $0x6a8] sm:$0xff]  }
  0xa3   :  { %2659 = vmatmul.mubr.bf16.vlgmr.msra.gmra.mrb[16].mxu0 %v663_v9  ;;  %v3785_v9 = vld [vmem:[%s4685_s1 + $0x628] sm:$0xff]  }
  0xa4   :  { %3436 = vmatpush3.bf16.msra.mxu0 %v3732_v12  ;;  %2699 = vmatmul.mubr.bf16.vlgmr.msra.gmra.mrb[16].mxu1 %v685_v16  ;;  %v3788_v12 = vld [vmem:[%s4685_s1 + $0x6f0] sm:$0xff]   ;;  %v3792_v16 = vld [vmem:[%s4685_s1 + $0x6f8] sm:$0xff]  }
  0xa5   :  { %3437 = vmatprep.subr.bf16.mxu0 %v3734_v17  ;;  %3458 = vmatpush3.bf16.msra.mxu1 %v3733_v14  ;;  %v3790_v14 = vld [vmem:[%s4685_s1 + $0x6b0] sm:$0xff]   ;;  %v3793_v17 = vld [vmem:[%s4685_s1 + $0x638] sm:$0xff]  }
  0xa6   :  { %2738 = vmatprep.mubr.bf16.mxu0 %v684_v20  ;;  %3459 = vmatprep.subr.bf16.mxu1 %v3735_v19  ;;  %v696_v19 = vrot.slane %v18_v18, %v3943_v35  ;;  %v3795_v20 = vld [vmem:[%s4685_s1 + $0x740] sm:$0xff]  }
  0xa7   :  { %2778 = vmatprep.mubr.bf16.mxu1 %v688_v23 }
  0xa8   :  { %3438 = vmatpush3.bf16.msra.mxu0 %v3736_v21  ;;  %v689_v21 = vcombine.high %v18_v18, %v18_v18  ;;  %v704_v23 = vcombine.high %v696_v19, %v696_v19 }
  0xa9   :  { %3439 = vmatprep.subr.bf16.mxu0 %v3738_v24  ;;  %3460 = vmatpush3.bf16.msra.mxu1 %v3737_v22  ;;  %v3794_v22 = vld [vmem:[%s4685_s1 + $0x6b8] sm:$0xff]   ;;  %v712_v24 = vrot.slane %v696_v19, %v3943_v35 }
  0xaa   :  { %3461 = vmatprep.subr.bf16.mxu1 %v3739_v25  ;;  %v3796_v25 = vld [vmem:[%s4685_s1 + $0x7c0] sm:$0xff]  }
  0xac   :  { %3440 = vmatpush3.bf16.msra.mxu0 %v3740_v26  ;;  %v4581_v26 = vrot.slane %v689_v21, %v3943_v35 }
  0xad   :  { %3441 = vmatprep.subr.bf16.mxu0 %v3742_v28  ;;  %3462 = vmatpush3.bf16.msra.mxu1 %v3741_v27  ;;  %v726_v27 = vrot.slane %v704_v23, %v3943_v35  ;;  %v3797_v28 = vld [vmem:[%s4685_s1 + $0x700] sm:$0xff]  }
  0xae   :  { %3463 = vmatprep.subr.bf16.mxu1 %v3743_v29  ;;  %v705_v29 = vcombine.high %v4581_v26, %v4581_v26 }
  0xb0   :  { %3442 = vmatpush3.bf16.msra.mxu0 %v3744_v30  ;;  %v734_v30 = vcombine.high %v712_v24, %v712_v24 }
  0xb1   :  { %3443 = vmatprep.subr.bf16.mxu0 %v3746_v32  ;;  %3464 = vmatpush3.bf16.msra.mxu1 %v3745_v31  ;;  %v3799_v31 = vld [vmem:[%s4685_s1 + $0x748] sm:$0xff]   ;;  %v736_v32 = vcombine.high %v726_v27, %v726_v27 }
  0xb2   :  { %3465 = vmatprep.subr.bf16.mxu1 %v3747_v33  ;;  %v3798_v33 = vld [vmem:[%s4685_s1 + $0x780] sm:$0xff]  }
  0xb4   :  { %3444 = vmatpush3.bf16.msra.mxu0 %v3748_v34  ;;  %v733_v34 = vrot.slane %v705_v29, %v3943_v35 }
  0xb5   :  { %3445 = vmatprep.subr.bf16.mxu0 %v3750_v37  ;;  %3466 = vmatpush3.bf16.msra.mxu1 %v3749_v36  ;;  %v3800_v36 = vld [vmem:[%s4685_s1 + $0x7c8] sm:$0xff]  }
  0xb6   :  { %3467 = vmatprep.subr.bf16.mxu1 %v3751_v38  ;;  %v3801_v37 = vld [vmem:[%s4685_s1 + $0x708] sm:$0xff]   ;;  %v737_v38 = vcombine.high %v733_v34, %v733_v34 }
  0xb8   :  { %3446 = vmatpush3.bf16.msra.mxu0 %v3752_v39  ;;  %v3803_v39 = vld [vmem:[%s4685_s1 + $0x750] sm:$0xff]  }
  0xb9   :  { %3447 = vmatprep.subr.bf16.mxu0 %v3754_v41  ;;  %3468 = vmatpush3.bf16.msra.mxu1 %v3753_v40  ;;  %v3802_v40 = vld [vmem:[%s4685_s1 + $0x788] sm:$0xff]   ;;  %v3804_v41 = vld [vmem:[%s4685_s1 + $0x7d0] sm:$0xff]  }
  0xba   :  { %3469 = vmatprep.subr.bf16.mxu1 %v3755_v42  ;;  %v3805_v42 = vld [vmem:[%s4685_s1 + $0x710] sm:$0xff]  }
  0xbc   :  { %3448 = vmatpush3.bf16.msra.mxu0 %v3756_v43  ;;  %v3807_v43 = vld [vmem:[%s4685_s1 + $0x758] sm:$0xff]  }
  0xbd   :  { %3449 = vmatprep.subr.bf16.mxu0 %v3758_v45  ;;  %3470 = vmatpush3.bf16.msra.mxu1 %v3757_v44  ;;  %v3806_v44 = vld [vmem:[%s4685_s1 + $0x790] sm:$0xff]   ;;  %v3808_v45 = vld [vmem:[%s4685_s1 + $0x7d8] sm:$0xff]  }
  0xbe   :  { %3471 = vmatprep.subr.bf16.mxu1 %v3759_v46  ;;  %v3809_v46 = vld [vmem:[%s4685_s1 + $0x718] sm:$0xff]  }
  0xc0   :  { %3450 = vmatpush3.bf16.msra.mxu0 %v3760_v47  ;;  %v3811_v47 = vld [vmem:[%s4685_s1 + $0x760] sm:$0xff]  }
  0xc1   :  { %3479 = vmatprep.subr.bf16.mxu0 %v3763_v50  ;;  %3472 = vmatpush3.bf16.msra.mxu1 %v3761_v48  ;;  %v3810_v48 = vld [vmem:[%s4685_s1 + $0x798] sm:$0xff]   ;;  %v3813_v50 = vld [vmem:[%s4685_s1 + $0x720] sm:$0xff]  }
  0xc2   :  { %3501 = vmatprep.subr.bf16.mxu1 %v3764_v51  ;;  %v3815_v51 = vld [vmem:[%s4685_s1 + $0x768] sm:$0xff]  }
  0xc3   :  { %2739 = vmatmul.mubr.bf16.vlgmr.msra.gmra.mrb[20].mxu0 %v670_v49  ;;  %v3812_v49 = vld [vmem:[%s4685_s1 + $0x7e0] sm:$0xff]  }
  0xc4   :  { %3480 = vmatpush3.bf16.msra.mxu0 %v3765_v52  ;;  %2779 = vmatmul.mubr.bf16.vlgmr.msra.gmra.mrb[20].mxu1 %v686_v54  ;;  %v3814_v52 = vld [vmem:[%s4685_s1 + $0x7a0] sm:$0xff]  }
  0xc5   :  { %3481 = vmatprep.subr.bf16.mxu0 %v3767_v55  ;;  %3502 = vmatpush3.bf16.msra.mxu1 %v3766_v53  ;;  %v3816_v53 = vld [vmem:[%s4685_s1 + $0x7e8] sm:$0xff]   ;;  %v2958_v54 = vld [vmem:[%s4687_s2] ss:$0 sm:$0xff] }
  0xc6   :  { %3503 = vmatprep.subr.bf16.mxu1 %v3768_v56  ;;  %2818 = vmatprep.mubr.bf16.mxu0 %v726_v27  ;;  %v3817_v55 = vld [vmem:[%s4685_s1 + $0x728] sm:$0xff]  }
  0xc7   :  { %2858 = vmatprep.mubr.bf16.mxu1 %v736_v32 }
  0xc8   :  { %3482 = vmatpush3.bf16.msra.mxu0 %v3769_v57  ;;  %v3819_v57 = vld [vmem:[%s4685_s1 + $0x770] sm:$0xff]  }
  0xc9   :  { %3483 = vmatprep.subr.bf16.mxu0 %v3771_v59  ;;  %3504 = vmatpush3.bf16.msra.mxu1 %v3770_v58  ;;  %v3818_v59 = vld [vmem:[%s4685_s1 + $0x7a8] sm:$0xff]  }
  0xca   :  { %3505 = vmatprep.subr.bf16.mxu1 %v3772_v60 }
  0xcc   :  { %3484 = vmatpush3.bf16.msra.mxu0 %v3773_v61 }
  0xcd   :  { %3485 = vmatprep.subr.bf16.mxu0 %v3775_v63  ;;  %3506 = vmatpush3.bf16.msra.mxu1 %v3774_v62  ;;  %v3820_v63 = vld [vmem:[%s4685_s1 + $0x7f0] sm:$0xff]  }
  0xce   :  { %3507 = vmatprep.subr.bf16.mxu1 %v3776_v0  ;;  %v3821_v0 = vld [vmem:[%s4685_s1 + $0x730] sm:$0xff]  }
  0xd0   :  { %3486 = vmatpush3.bf16.msra.mxu0 %v3777_v1 }
  0xd1   :  { %3487 = vmatprep.subr.bf16.mxu0 %v3779_v3  ;;  %3508 = vmatpush3.bf16.msra.mxu1 %v3778_v2 }
  0xd2   :  { %3509 = vmatprep.subr.bf16.mxu1 %v3780_v4 }
  0xd4   :  { %3488 = vmatpush3.bf16.msra.mxu0 %v3781_v5 }
  0xd5   :  { %3489 = vmatprep.subr.bf16.mxu0 %v3783_v7  ;;  %3510 = vmatpush3.bf16.msra.mxu1 %v3782_v6  ;;  %v3823_v6 = vld [vmem:[%s4685_s1 + $0x778] sm:$0xff]  }
  0xd6   :  { %3511 = vmatprep.subr.bf16.mxu1 %v3784_v8  ;;  %v3822_v8 = vld [vmem:[%s4685_s1 + $0x7b0] sm:$0xff]  }
  0xd8   :  { %3490 = vmatpush3.bf16.msra.mxu0 %v3785_v9 }
  0xd9   :  { %3491 = vmatprep.subr.bf16.mxu0 %v3787_v11  ;;  %3512 = vmatpush3.bf16.msra.mxu1 %v3786_v10  ;;  %v3824_v10 = vld [vmem:[%s4685_s1 + $0x7f8] sm:$0xff]  }
  0xda   :  { %3513 = vmatprep.subr.bf16.mxu1 %v3788_v12  ;;  %v3825_v11 = vld [vmem:[%s4685_s1 + $0x738] sm:$0xff]   ;;  %v719_v12 = vrot.slane %v4581_v26, %v3943_v35 }
  0xdc   :  { %3492 = vmatpush3.bf16.msra.mxu0 %v3789_v13  ;;  %v3826_v13 = vld [vmem:[%s4685_s1 + $0x7b8] sm:$0xff]  }
  0xdd   :  { %3493 = vmatprep.subr.bf16.mxu0 %v3791_v15  ;;  %3514 = vmatpush3.bf16.msra.mxu1 %v3790_v14  ;;  %v735_v14 = vcombine.high %v719_v12, %v719_v12 }
  0xde   :  { %3515 = vmatprep.subr.bf16.mxu1 %v3792_v16 }
  0xe0   :  { %3494 = vmatpush3.bf16.msra.mxu0 %v3793_v17 }
  0xe1   :  { %3523 = vmatprep.subr.bf16.mxu0 %v3795_v20  ;;  %3516 = vmatpush3.bf16.msra.mxu1 %v3794_v22 }
  0xe2   :  { %3545 = vmatprep.subr.bf16.mxu1 %v3796_v25 }
  0xe3   :  { %2819 = vmatmul.mubr.bf16.vlgmr.msra.gmra.mrb[24].mxu0 %v712_v24 }
  0xe4   :  { %3524 = vmatpush3.bf16.msra.mxu0 %v3797_v28  ;;  %2859 = vmatmul.mubr.bf16.vlgmr.msra.gmra.mrb[24].mxu1 %v734_v30 }
  0xe5   :  { %3525 = vmatprep.subr.bf16.mxu0 %v3799_v31  ;;  %3546 = vmatpush3.bf16.msra.mxu1 %v3798_v33 }
  0xe6   :  { %2898 = vmatprep.mubr.bf16.mxu0 %v733_v34  ;;  %3547 = vmatprep.subr.bf16.mxu1 %v3800_v36 }
  0xe7   :  { %2938 = vmatprep.mubr.bf16.mxu1 %v737_v38 }
  0xe8   :  { %3526 = vmatpush3.bf16.msra.mxu0 %v3801_v37 }
  0xe9   :  { %3527 = vmatprep.subr.bf16.mxu0 %v3803_v39  ;;  %3548 = vmatpush3.bf16.msra.mxu1 %v3802_v40 }
  0xea   :  { %3549 = vmatprep.subr.bf16.mxu1 %v3804_v41 }
  0xec   :  { %3528 = vmatpush3.bf16.msra.mxu0 %v3805_v42 }
  0xed   :  { %3529 = vmatprep.subr.bf16.mxu0 %v3807_v43  ;;  %3550 = vmatpush3.bf16.msra.mxu1 %v3806_v44 }
  0xee   :  { %3551 = vmatprep.subr.bf16.mxu1 %v3808_v45 }
  0xf0   :  { %3530 = vmatpush3.bf16.msra.mxu0 %v3809_v46 }
  0xf1   :  { %3531 = vmatprep.subr.bf16.mxu0 %v3811_v47  ;;  %3552 = vmatpush3.bf16.msra.mxu1 %v3810_v48 }
  0xf2   :  { %3553 = vmatprep.subr.bf16.mxu1 %v3812_v49 }
  0xf4   :  { %3532 = vmatpush3.bf16.msra.mxu0 %v3813_v50 }
  0xf5   :  { %3533 = vmatprep.subr.bf16.mxu0 %v3815_v51  ;;  %3554 = vmatpush3.bf16.msra.mxu1 %v3814_v52 }
  0xf6   :  { %v3231_v56 = vpop.f32.mrb[0].mxu0  ;;  %3555 = vmatprep.subr.bf16.mxu1 %v3816_v53 }
  0xf7   :  { %v3232_v58 = vpop.f32.mrb[1].mxu0  ;;  %v3253_v60 = vpop.f32.mrb[0].mxu1 }
  0xf8   :  { %v3233_v61 = vadd.f32 %v3232_v58, %v3231_v56  ;;  %v3234_v62 = vpop.f32.mrb[2].mxu0  ;;  %v3254_v1 = vpop.f32.mrb[1].mxu1  ;;  %3534 = vmatpush3.bf16.msra.mxu0 %v3817_v55 }
  0xf9   :  { %v3235_v2 = vpop.f32.mrb[3].mxu0  ;;  %v3255_v4 = vadd.f32 %v3254_v1, %v3253_v60  ;;  %v3256_v5 = vpop.f32.mrb[2].mxu1  ;;  %3535 = vmatprep.subr.bf16.mxu0 %v3819_v57  ;;  %3556 = vmatpush3.bf16.msra.mxu1 %v3818_v59 }
  0xfa   :  { %v2341_v3 = vadd.f32 %v3233_v61, %v2958_v54  ;;  %v3257_v7 = vpop.f32.mrb[3].mxu1  ;;  %3557 = vmatprep.subr.bf16.mxu1 %v3820_v63 }
  0xfc   :  { %v2381_v9 = vadd.f32 %v3255_v4, %v2341_v3  ;;  %3536 = vmatpush3.bf16.msra.mxu0 %v3821_v0 }
  0xfd   :  { %3537 = vmatprep.subr.bf16.mxu0 %v3823_v6  ;;  %3558 = vmatpush3.bf16.msra.mxu1 %v3822_v8 }
  0xfe   :  { %3559 = vmatprep.subr.bf16.mxu1 %v3824_v10 }
 0x100   :  { %3538 = vmatpush3.bf16.msra.mxu0 %v3825_v11 }
 0x101   :  { %3560 = vmatpush3.bf16.msra.mxu1 %v3826_v13 }
 0x103   :  { %2899 = vmatmul.mubr.bf16.vlgmr.msra.gmra.mrb[28].mxu0 %v719_v12 }
 0x104   :  { %2939 = vmatmul.mubr.bf16.vlgmr.msra.gmra.mrb[28].mxu1 %v735_v14 }
 0x116   :  { %v3275_v15 = vpop.f32.mrb[4].mxu0 }
 0x117   :  { %v3276_v16 = vpop.f32.mrb[5].mxu0  ;;  %v3297_v17 = vpop.f32.mrb[4].mxu1 }
 0x118   :  { %v3277_v18 = vadd.f32 %v3276_v16, %v3275_v15  ;;  %v3278_v19 = vpop.f32.mrb[6].mxu0  ;;  %v3298_v20 = vpop.f32.mrb[5].mxu1 }
 0x119   :  { %v3279_v21 = vpop.f32.mrb[7].mxu0  ;;  %v3299_v35 = vadd.f32 %v3298_v20, %v3297_v17  ;;  %v3300_v23 = vpop.f32.mrb[6].mxu1 }
 0x11a   :  { %v2421_v22 = vadd.f32 %v3277_v18, %v2381_v9  ;;  %v3301_v24 = vpop.f32.mrb[7].mxu1 }
 0x11c   :  { %v2461_v25 = vadd.f32 %v3299_v35, %v2421_v22 }
 0x136   :  { %v3319_v26 = vpop.f32.mrb[8].mxu0 }
 0x137   :  { %v3320_v27 = vpop.f32.mrb[9].mxu0  ;;  %v3341_v28 = vpop.f32.mrb[8].mxu1 }
 0x138   :  { %v3321_v29 = vadd.f32 %v3320_v27, %v3319_v26  ;;  %v3322_v30 = vpop.f32.mrb[10].mxu0  ;;  %v3342_v31 = vpop.f32.mrb[9].mxu1 }
 0x139   :  { %v3323_v32 = vpop.f32.mrb[11].mxu0  ;;  %v3343_v34 = vadd.f32 %v3342_v31, %v3341_v28  ;;  %v3344_v36 = vpop.f32.mrb[10].mxu1 }
 0x13a   :  { %v2501_v33 = vadd.f32 %v3321_v29, %v2461_v25  ;;  %v3345_v37 = vpop.f32.mrb[11].mxu1 }
 0x13c   :  { %v2541_v38 = vadd.f32 %v3343_v34, %v2501_v33 }
 0x156   :  { %v3363_v39 = vpop.f32.mrb[12].mxu0 }
 0x157   :  { %v3364_v40 = vpop.f32.mrb[13].mxu0  ;;  %v3385_v41 = vpop.f32.mrb[12].mxu1 }
 0x158   :  { %v3365_v42 = vadd.f32 %v3364_v40, %v3363_v39  ;;  %v3366_v43 = vpop.f32.mrb[14].mxu0  ;;  %v3386_v44 = vpop.f32.mrb[13].mxu1 }
 0x159   :  { %v3367_v45 = vpop.f32.mrb[15].mxu0  ;;  %v3387_v47 = vadd.f32 %v3386_v44, %v3385_v41  ;;  %v3388_v48 = vpop.f32.mrb[14].mxu1 }
 0x15a   :  { %v2581_v46 = vadd.f32 %v3365_v42, %v2541_v38  ;;  %v3389_v49 = vpop.f32.mrb[15].mxu1 }
 0x15c   :  { %v2621_v50 = vadd.f32 %v3387_v47, %v2581_v46 }
 0x176   :  { %v3407_v51 = vpop.f32.mrb[16].mxu0 }
 0x177   :  { %v3408_v52 = vpop.f32.mrb[17].mxu0  ;;  %v3429_v53 = vpop.f32.mrb[16].mxu1 }
 0x178   :  { %v3409_v54 = vadd.f32 %v3408_v52, %v3407_v51  ;;  %v3410_v55 = vpop.f32.mrb[18].mxu0  ;;  %v3430_v56 = vpop.f32.mrb[17].mxu1 }
 0x179   :  { %v3411_v57 = vpop.f32.mrb[19].mxu0  ;;  %v3431_v59 = vadd.f32 %v3430_v56, %v3429_v53  ;;  %v3432_v60 = vpop.f32.mrb[18].mxu1 }
 0x17a   :  { %v2661_v58 = vadd.f32 %v3409_v54, %v2621_v50  ;;  %v3433_v61 = vpop.f32.mrb[19].mxu1 }
 0x17c   :  { %v2701_v62 = vadd.f32 %v3431_v59, %v2661_v58 }
 0x196   :  { %v3451_v63 = vpop.f32.mrb[20].mxu0 }
 0x197   :  { %v3452_v0 = vpop.f32.mrb[21].mxu0  ;;  %v3473_v1 = vpop.f32.mrb[20].mxu1 }
 0x198   :  { %v3453_v2 = vadd.f32 %v3452_v0, %v3451_v63  ;;  %v3454_v3 = vpop.f32.mrb[22].mxu0  ;;  %v3474_v4 = vpop.f32.mrb[21].mxu1 }
 0x199   :  { %v3455_v5 = vpop.f32.mrb[23].mxu0  ;;  %v3475_v7 = vadd.f32 %v3474_v4, %v3473_v1  ;;  %v3476_v8 = vpop.f32.mrb[22].mxu1 }
 0x19a   :  { %v2741_v6 = vadd.f32 %v3453_v2, %v2701_v62  ;;  %v3477_v9 = vpop.f32.mrb[23].mxu1 }
 0x19c   :  { %v2781_v10 = vadd.f32 %v3475_v7, %v2741_v6 }
 0x1b6   :  { %v3495_v11 = vpop.f32.mrb[24].mxu0 }
 0x1b7   :  { %v3496_v12 = vpop.f32.mrb[25].mxu0  ;;  %v3517_v13 = vpop.f32.mrb[24].mxu1 }
 0x1b8   :  { %v3497_v14 = vadd.f32 %v3496_v12, %v3495_v11  ;;  %v3498_v15 = vpop.f32.mrb[26].mxu0  ;;  %v3518_v16 = vpop.f32.mrb[25].mxu1 }
 0x1b9   :  { %v3499_v17 = vpop.f32.mrb[27].mxu0  ;;  %v3519_v19 = vadd.f32 %v3518_v16, %v3517_v13  ;;  %v3520_v20 = vpop.f32.mrb[26].mxu1 }
 0x1ba   :  { %v2821_v18 = vadd.f32 %v3497_v14, %v2781_v10  ;;  %v3521_v21 = vpop.f32.mrb[27].mxu1 }
 0x1bc   :  { %v2861_v22 = vadd.f32 %v3519_v19, %v2821_v18 }
 0x1d6   :  { %v3539_v35 = vpop.f32.mrb[28].mxu0 }
 0x1d7   :  { %v3540_v23 = vpop.f32.mrb[29].mxu0  ;;  %v3561_v24 = vpop.f32.mrb[28].mxu1 }
 0x1d8   :  { %v3541_v25 = vadd.f32 %v3540_v23, %v3539_v35  ;;  %v3542_v26 = vpop.f32.mrb[30].mxu0  ;;  %v3562_v27 = vpop.f32.mrb[29].mxu1 }
 0x1d9   :  { %v3543_v28 = vpop.f32.mrb[31].mxu0  ;;  %v3563_v30 = vadd.f32 %v3562_v27, %v3561_v24  ;;  %v3564_v31 = vpop.f32.mrb[30].mxu1 }
 0x1da   :  { %v2901_v29 = vadd.f32 %v3541_v25, %v2861_v22  ;;  %v3565_v32 = vpop.f32.mrb[31].mxu1 }
 0x1dc   :  { %v2941_v33 = vadd.f32 %v3563_v30, %v2901_v29 }
 0x1de   :  { %v2946_v34 = vsub.f32 0.0, %v2941_v33 }
 0x1e0   :  { %v2947_v36 = vmul.f32 1.442695, %v2946_v34 }
 0x1e2   :  { %3828 = vpow2.f32 %v2947_v36 }
 0x1ec   :  { %v3829_v37 = vpop.eup %3828 }
 0x1ed   :  { %v2949_v38 = vadd.f32 1.0, %v3829_v37 }
 0x1ef   :  { %3830 = vrcp.f32 %v2949_v38 }
 0x1f9   :  { %v3831_v39 = vpop.eup %3830 }
 0x1fa   :  { %v2951_v40 = vmax.f32 %v3831_v39, 0.0 }
 0x1fc   :  { %v2952_v41 = vmin.f32 %v2951_v40, 1.0 }
 0x1fe   :  { %2953 = vst [vmem:[%s4688_s3] sm:$0x3] %v2952_v41 }

</bundles_post_ra>
